<compile_context>
chip_gen: v7x
topology: tpu7x:2x2x1
jax: 0.10.0
libtpu: 0.0.40
codegen_flags: <defaults>
</compile_context>

<pallas_src>
import jax
import jax.numpy as jnp
import numpy as np
from jax import lax
from jax.experimental import pallas as pl
from jax.experimental.pallas import tpu as pltpu

HIDDEN = 64        # CfC units
BACKBONE = 128     # ncps default backbone_units (backbone_layers=1, dropout=0.0)
HP = 128           # hidden padded to one full 128-lane vreg width
TB = 8             # batch tile = sublane count


def _round_up(n, m):
    return ((n + m - 1) // m) * m


# ----------------------------- Pallas kernel -----------------------------

def _make_kernel(T, Dp):
    """Build the ActorCfC kernel for static T (timesteps) and Dp (padded obs dim)."""
    TTB = T * TB

    def _recurrence(xproj_ref, hseq_ref, w_in_ref, w_head_ref, b_ref, dx):
        # Fused head bias, broadcast once (hoisted out of the unrolled loop).
        b_head = jnp.broadcast_to(b_ref[0:1, HP:HP + 3 * HP], (TB, 3 * HP))
        h = jnp.zeros((TB, HP), jnp.float32)            # hidden state lives in vregs
        for t in range(T):                              # fully unrolled, static indices
            r0 = t * TB
            # input projection was precomputed (incl. backbone bias); add h @ W_h
            pre = xproj_ref[r0:r0 + TB, :] + jnp.dot(
                h, w_in_ref[dx:dx + HP, :], preferred_element_type=jnp.float32)
            bb = 1.7159 * jnp.tanh(0.666 * pre)         # LeCun-tanh backbone activation
            # single fused head matmul: [ff1 | ff2 | folded gate], each 128 lanes wide
            g = jnp.dot(bb, w_head_ref[...],
                        preferred_element_type=jnp.float32) + b_head
            ff1 = jnp.tanh(g[:, 0:HP])
            ff2 = jnp.tanh(g[:, HP:2 * HP])
            ti = jax.nn.sigmoid(g[:, 2 * HP:3 * HP])    # sigmoid(t_a*1 + t_b), ts == 1.0
            h = ff1 + ti * (ff2 - ff1)                  # == ff1*(1-ti) + ti*ff2
            hseq_ref[r0:r0 + TB, :] = h                 # collect sequence (not on serial chain)

    def kernel(x_ref, w_in1_ref, w_head1_ref, b1_ref,
               w_in2_ref, w_head2_ref, b2_ref,
               w_out_ref, b_out_ref,
               out_ref, xproj_ref, hseq_ref):
        # Phase A: layer-1 input projection for ALL timesteps (one matmul, bias folded).
        xproj_ref[...] = jnp.dot(
            x_ref[...], w_in1_ref[0:Dp, :],
            preferred_element_type=jnp.float32) + b1_ref[0:1, 0:HP]
        # Phase B: layer-1 recurrence (2 matmuls / step).
        _recurrence(xproj_ref, hseq_ref, w_in1_ref, w_head1_ref, b1_ref, Dp)
        # Phase C: layer-2 input projection over the whole layer-1 sequence.
        xproj_ref[...] = jnp.dot(
            hseq_ref[...], w_in2_ref[0:HP, :],
            preferred_element_type=jnp.float32) + b2_ref[0:1, 0:HP]
        # Phase D: layer-2 recurrence.
        _recurrence(xproj_ref, hseq_ref, w_in2_ref, w_head2_ref, b2_ref, HP)
        # Phase E: output head over the whole sequence (one matmul, one store).
        out_ref[...] = (jnp.dot(hseq_ref[...], w_out_ref[...],
                                preferred_element_type=jnp.float32)
                        + b_out_ref[...]).astype(out_ref.dtype)

    return kernel


def actor_cfc_forward(x, packed):
    """x: (B, T, obs_dim) float32 -> logits (B, T, action_dim)."""
    B, T, D = x.shape
    A = packed["w_out"].shape[1]
    Dp = packed["w_in1"].shape[0] - HP      # padded obs dim used when packing
    Bp = _round_up(max(B, 1), TB)
    nb = Bp // TB
    TTB = T * TB

    x = x.astype(jnp.float32)
    x_tm = jnp.transpose(x, (1, 0, 2))                               # (T, B, D)
    x_tm = jnp.pad(x_tm, ((0, 0), (0, Bp - B), (0, Dp - D)))         # (T, Bp, Dp)
    # batch tiles of TB rows; rows inside a tile ordered (t, b)
    x_tiles = (x_tm.reshape(T, nb, TB, Dp)
               .transpose(1, 0, 2, 3)
               .reshape(nb, TTB, Dp))

    kernel = _make_kernel(T, Dp)

    def full_spec(arr):
        nd = arr.ndim
        return pl.BlockSpec(arr.shape, lambda i, _nd=nd: (0,) * _nd)

    out_tiles = pl.pallas_call(
        kernel,
        out_shape=jax.ShapeDtypeStruct((nb, TTB, A), jnp.float32),
        grid=(nb,),
        in_specs=[
            pl.BlockSpec((None, TTB, Dp), lambda i: (i, 0, 0)),      # x batch tile
            full_spec(packed["w_in1"]), full_spec(packed["w_head1"]), full_spec(packed["b1"]),
            full_spec(packed["w_in2"]), full_spec(packed["w_head2"]), full_spec(packed["b2"]),
            full_spec(packed["w_out"]), full_spec(packed["b_out"]),
        ],
        out_specs=pl.BlockSpec((None, TTB, A), lambda i: (i, 0, 0)),
        scratch_shapes=[pltpu.VMEM((TTB, HP), jnp.float32),          # xproj (reused by both layers)
                        pltpu.VMEM((TTB, HP), jnp.float32)],         # h sequence (reused)
        compiler_params=pltpu.CompilerParams(
            dimension_semantics=("parallel",)),                      # batch tiles across TCs (v7x)
    )(x_tiles, packed["w_in1"], packed["w_head1"], packed["b1"],
      packed["w_in2"], packed["w_head2"], packed["b2"],
      packed["w_out"], packed["b_out"])

    out = (out_tiles.reshape(nb, T, TB, A)
           .transpose(1, 0, 2, 3)
           .reshape(T, Bp, A))
    return jnp.transpose(out, (1, 0, 2))[:B]                         # (B, T, A)


# ----------------- parameter construction / packing (synthetic) -----------------

def _xavier_uniform(key, fan_in, fan_out):
    limit = float(np.sqrt(6.0 / (fan_in + fan_out)))
    return jax.random.uniform(key, (fan_in, fan_out), jnp.float32, -limit, limit)


def _make_cfc_layer_params(key, in_dim):
    keys = jax.random.split(key, 10)
    cat = in_dim + HIDDEN
    return {
        "wb": _xavier_uniform(keys[0], cat, BACKBONE),               # Linear([x,h] -> 128)
        "bb": 0.01 * jax.random.normal(keys[1], (BACKBONE,), jnp.float32),
        "w_ff1": _xavier_uniform(keys[2], BACKBONE, HIDDEN),
        "b_ff1": 0.01 * jax.random.normal(keys[3], (HIDDEN,), jnp.float32),
        "w_ff2": _xavier_uniform(keys[4], BACKBONE, HIDDEN),
        "b_ff2": 0.01 * jax.random.normal(keys[5], (HIDDEN,), jnp.float32),
        "w_ta": _xavier_uniform(keys[6], BACKBONE, HIDDEN),
        "b_ta": 0.01 * jax.random.normal(keys[7], (HIDDEN,), jnp.float32),
        "w_tb": _xavier_uniform(keys[8], BACKBONE, HIDDEN),
        "b_tb": 0.01 * jax.random.normal(keys[9], (HIDDEN,), jnp.float32),
    }


def init_params(key, obs_dim, action_dim):
    k1, k2, k3 = jax.random.split(key, 3)
    out_w = jax.nn.initializers.orthogonal(scale=0.01)(k3, (HIDDEN, action_dim), jnp.float32)
    return {
        "l1": _make_cfc_layer_params(k1, obs_dim),
        "l2": _make_cfc_layer_params(k2, HIDDEN),
        "out_w": out_w,
        "out_b": jnp.zeros((action_dim,), jnp.float32),              # layer_init bias_const=0.0
    }


def pack_params(params, obs_dim):
    """Fold the time gate, fuse the head matmuls, pad heads/hidden to 128 lanes,
    and pack everything into 8 arrays (3 per CfC layer + output W/b)."""
    Dp = _round_up(obs_dim, 8)

    def pad_head_w(w):   # (128, 64) -> (128, 128), zero pad cols
        return jnp.pad(w, ((0, 0), (0, HP - HIDDEN)))

    def pad_head_b(b):   # (64,) -> (128,)
        return jnp.pad(b, (0, HP - HIDDEN))

    def pack_layer(p, in_dim, in_pad):
        wb = p["wb"]                                                 # (in_dim + 64, 128)
        w_x = jnp.pad(wb[:in_dim], ((0, in_pad - in_dim), (0, 0)))   # (in_pad, 128)
        w_h = jnp.pad(wb[in_dim:], ((0, HP - HIDDEN), (0, 0)))       # (128, 128), pad rows 0
        w_in = jnp.concatenate([w_x, w_h], axis=0)                   # (in_pad + 128, 128)
        # fused, gate-folded head: [ff1 | ff2 | (time_a + time_b)]
        w_head = jnp.concatenate(
            [pad_head_w(p["w_ff1"]), pad_head_w(p["w_ff2"]),
             pad_head_w(p["w_ta"] + p["w_tb"])], axis=1)             # (128, 384)
        b_all = jnp.concatenate(
            [p["bb"], pad_head_b(p["b_ff1"]), pad_head_b(p["b_ff2"]),
             pad_head_b(p["b_ta"] + p["b_tb"])])[None, :]            # (1, 512)
        return w_in, w_head, b_all

    w_in1, w_head1, b1 = pack_layer(params["l1"], obs_dim, Dp)
    w_in2, w_head2, b2 = pack_layer(params["l2"], HIDDEN, HP)
    w_out = jnp.pad(params["out_w"], ((0, HP - HIDDEN), (0, 0)))     # (128, A), pad rows 0
    b_out = params["out_b"][None, :]                                 # (1, A)
    return {"w_in1": w_in1, "w_head1": w_head1, "b1": b1,
            "w_in2": w_in2, "w_head2": w_head2, "b2": b2,
            "w_out": w_out, "b_out": b_out}


# ---------------- pure-JAX reference (original, unfused math) ----------------

def _cfc_step_ref(inp, h, p):
    cat = jnp.concatenate([inp, h], axis=-1)
    bb = 1.7159 * jnp.tanh(0.666 * (cat @ p["wb"] + p["bb"]))
    ff1 = jnp.tanh(bb @ p["w_ff1"] + p["b_ff1"])
    ff2 = jnp.tanh(bb @ p["w_ff2"] + p["b_ff2"])
    t_a = bb @ p["w_ta"] + p["b_ta"]
    t_b = bb @ p["w_tb"] + p["b_tb"]
    ti = jax.nn.sigmoid(t_a * 1.0 + t_b)                 # ts == 1.0 (no timespans)
    return ff1 * (1.0 - ti) + ti * ff2


def actor_cfc_reference(x, params):
    B, T, D = x.shape

    def run_layer(xseq, p):
        def step(h, xt):
            hn = _cfc_step_ref(xt, h, p)
            return hn, hn
        h0 = jnp.zeros((B, HIDDEN), jnp.float32)
        _, ys = lax.scan(step, h0, jnp.transpose(xseq, (1, 0, 2)))
        return jnp.transpose(ys, (1, 0, 2))

    h1 = run_layer(x.astype(jnp.float32), params["l1"])
    h2 = run_layer(h1, params["l2"])
    return h2 @ params["out_w"] + params["out_b"]


if __name__ == "__main__":
    B, T, OBS, ACTIONS = 2, 8, 16, 7  # minigrid-ish: 7 discrete actions

    key = jax.random.PRNGKey(0)
    kx, kp = jax.random.split(key)
    x = jax.random.normal(kx, (B, T, OBS), dtype=jnp.float32)
    params = init_params(kp, OBS, ACTIONS)
    packed = pack_params(params, OBS)

    out = actor_cfc_forward(x, packed)
    out = jax.block_until_ready(out)
    assert out.shape == (B, T, ACTIONS)

    ref = actor_cfc_reference(x, params)
    np.testing.assert_allclose(np.asarray(out), np.asarray(ref), rtol=1e-4, atol=1e-4)

    print("KERNEL_OK")
</pallas_src>

<mosaic_0001>
module attributes {stable_mosaic.version = 11 : i64} {
  func.func @kernel(%arg0: i32, %arg1: memref<1x64x16xf32, #tpu.memory_space<vmem>>, %arg2: memref<144x128xf32, #tpu.memory_space<vmem>>, %arg3: memref<128x384xf32, #tpu.memory_space<vmem>>, %arg4: memref<1x512xf32, #tpu.memory_space<vmem>>, %arg5: memref<256x128xf32, #tpu.memory_space<vmem>>, %arg6: memref<128x384xf32, #tpu.memory_space<vmem>>, %arg7: memref<1x512xf32, #tpu.memory_space<vmem>>, %arg8: memref<128x7xf32, #tpu.memory_space<vmem>>, %arg9: memref<1x7xf32, #tpu.memory_space<vmem>>, %arg10: memref<1x64x7xf32, #tpu.memory_space<vmem>>, %arg11: memref<64x128xf32, #tpu.memory_space<vmem>>, %arg12: memref<64x128xf32, #tpu.memory_space<vmem>>) attributes {dimension_semantics = [#tpu.dimension_semantics<parallel>], iteration_bounds = array<i64: 1>, scalar_prefetch = 0 : i64, scratch_operands = 2 : i64, tpu.core_type = #tpu.core_type<tc>, window_params = [{transform_indices = @transform_0, window_bounds = array<i64: 1, 64, 16>}, {pipeline_mode = #tpu.pipeline_mode<synchronous>, transform_indices = @transform_1, window_bounds = array<i64: 144, 128>}, {pipeline_mode = #tpu.pipeline_mode<synchronous>, transform_indices = @transform_2, window_bounds = array<i64: 128, 384>}, {pipeline_mode = #tpu.pipeline_mode<synchronous>, transform_indices = @transform_3, window_bounds = array<i64: 1, 512>}, {pipeline_mode = #tpu.pipeline_mode<synchronous>, transform_indices = @transform_4, window_bounds = array<i64: 256, 128>}, {pipeline_mode = #tpu.pipeline_mode<synchronous>, transform_indices = @transform_5, window_bounds = array<i64: 128, 384>}, {pipeline_mode = #tpu.pipeline_mode<synchronous>, transform_indices = @transform_6, window_bounds = array<i64: 1, 512>}, {pipeline_mode = #tpu.pipeline_mode<synchronous>, transform_indices = @transform_7, window_bounds = array<i64: 128, 7>}, {pipeline_mode = #tpu.pipeline_mode<synchronous>, transform_indices = @transform_8, window_bounds = array<i64: 1, 7>}, {transform_indices = @transform_9, window_bounds = array<i64: 1, 64, 7>}]} {
    %c0 = arith.constant 0 : index
    %c0_0 = arith.constant 0 : index
    %c0_1 = arith.constant 0 : index
    %0 = vector.load %arg1[%c0, %c0_0, %c0_1] : memref<1x64x16xf32, #tpu.memory_space<vmem>>, vector<1x64x16xf32>
    %1 = vector.shape_cast %0 : vector<1x64x16xf32> to vector<64x16xf32>
    %c0_2 = arith.constant 0 : index
    %c0_3 = arith.constant 0 : index
    %2 = vector.load %arg2[%c0_2, %c0_3] : memref<144x128xf32, #tpu.memory_space<vmem>>, vector<16x128xf32>
    %cst = arith.constant dense<0.000000e+00> : vector<64x128xf32>
    %3 = tpu.matmul %1, %2, %cst {dimension_numbers = #tpu.dot_dimension_numbers<[1], [0], [0], [1], [0, 0, 1, 1], [], []>} : vector<64x16xf32>, vector<16x128xf32>, vector<64x128xf32> -> vector<64x128xf32>
    %c0_4 = arith.constant 0 : index
    %c0_5 = arith.constant 0 : index
    %4 = vector.load %arg4[%c0_4, %c0_5] : memref<1x512xf32, #tpu.memory_space<vmem>>, vector<1x128xf32>
    %5 = vector.broadcast %4 : vector<1x128xf32> to vector<64x128xf32>
    %6 = arith.addf %3, %5 : vector<64x128xf32>
    %c0_6 = arith.constant 0 : index
    %c0_7 = arith.constant 0 : index
    %7 = vector.load %arg11[%c0_6, %c0_7] : memref<64x128xf32, #tpu.memory_space<vmem>>, vector<64x128xf32>
    tpu.vector_store %arg11[%c0_6, %c0_7], %6 {strides = array<i32>} : memref<64x128xf32, #tpu.memory_space<vmem>>, vector<64x128xf32>,
    %c0_8 = arith.constant 0 : index
    %c128 = arith.constant 128 : index
    %8 = vector.load %arg4[%c0_8, %c128] : memref<1x512xf32, #tpu.memory_space<vmem>>, vector<1x384xf32>
    %9 = vector.shape_cast %8 : vector<1x384xf32> to vector<1x384xf32>
    %10 = vector.broadcast %9 : vector<1x384xf32> to vector<8x384xf32>
    %cst_9 = arith.constant 0.000000e+00 : f32
    %11 = vector.broadcast %cst_9 : f32 to vector<8x128xf32>
    %c0_10 = arith.constant 0 : index
    %c0_11 = arith.constant 0 : index
    %12 = vector.load %arg11[%c0_10, %c0_11] : memref<64x128xf32, #tpu.memory_space<vmem>>, vector<8x128xf32>
    %c16 = arith.constant 16 : index
    %c0_12 = arith.constant 0 : index
    %13 = vector.load %arg2[%c16, %c0_12] : memref<144x128xf32, #tpu.memory_space<vmem>>, vector<128x128xf32>
    %cst_13 = arith.constant dense<0.000000e+00> : vector<8x128xf32>
    %14 = tpu.matmul %11, %13, %cst_13 {dimension_numbers = #tpu.dot_dimension_numbers<[1], [0], [0], [1], [0, 0, 1, 1], [], []>} : vector<8x128xf32>, vector<128x128xf32>, vector<8x128xf32> -> vector<8x128xf32>
    %15 = arith.addf %12, %14 : vector<8x128xf32>
    %cst_14 = arith.constant 6.660000e-01 : f32
    %16 = vector.broadcast %cst_14 : f32 to vector<8x128xf32>
    %17 = arith.mulf %16, %15 : vector<8x128xf32>
    %18 = math.tanh %17 : vector<8x128xf32>
    %cst_15 = arith.constant 1.715900e+00 : f32
    %19 = vector.broadcast %cst_15 : f32 to vector<8x128xf32>
    %20 = arith.mulf %19, %18 : vector<8x128xf32>
    %c0_16 = arith.constant 0 : index
    %c0_17 = arith.constant 0 : index
    %21 = vector.load %arg3[%c0_16, %c0_17] : memref<128x384xf32, #tpu.memory_space<vmem>>, vector<128x384xf32>
    %cst_18 = arith.constant dense<0.000000e+00> : vector<8x384xf32>
    %22 = tpu.matmul %20, %21, %cst_18 {dimension_numbers = #tpu.dot_dimension_numbers<[1], [0], [0], [1], [0, 0, 1, 1], [], []>} : vector<8x128xf32>, vector<128x384xf32>, vector<8x384xf32> -> vector<8x384xf32>
    %23 = arith.addf %22, %10 : vector<8x384xf32>
    %24 = vector.extract_strided_slice %23 {offsets = [0, 0], sizes = [8, 128], strides = [1, 1]} : vector<8x384xf32> to vector<8x128xf32>
    %25 = math.tanh %24 : vector<8x128xf32>
    %26 = vector.extract_strided_slice %23 {offsets = [0, 128], sizes = [8, 128], strides = [1, 1]} : vector<8x384xf32> to vector<8x128xf32>
    %27 = math.tanh %26 : vector<8x128xf32>
    %28 = vector.extract_strided_slice %23 {offsets = [0, 256], sizes = [8, 128], strides = [1, 1]} : vector<8x384xf32> to vector<8x128xf32>
    %29 = arith.negf %28 : vector<8x128xf32>
    %30 = math.exp %29 : vector<8x128xf32>
    %cst_19 = arith.constant 1.000000e+00 : f32
    %31 = vector.broadcast %cst_19 : f32 to vector<8x128xf32>
    %32 = arith.addf %31, %30 : vector<8x128xf32>
    %33 = arith.divf %31, %32 : vector<8x128xf32>
    %34 = arith.subf %27, %25 : vector<8x128xf32>
    %35 = arith.mulf %33, %34 : vector<8x128xf32>
    %36 = arith.addf %25, %35 : vector<8x128xf32>
    %c0_20 = arith.constant 0 : index
    %c0_21 = arith.constant 0 : index
    %37 = vector.load %arg12[%c0_20, %c0_21] : memref<64x128xf32, #tpu.memory_space<vmem>>, vector<8x128xf32>
    tpu.vector_store %arg12[%c0_20, %c0_21], %36 {strides = array<i32>} : memref<64x128xf32, #tpu.memory_space<vmem>>, vector<8x128xf32>,
    %c8 = arith.constant 8 : index
    %c0_22 = arith.constant 0 : index
    %38 = vector.load %arg11[%c8, %c0_22] : memref<64x128xf32, #tpu.memory_space<vmem>>, vector<8x128xf32>
    %c16_23 = arith.constant 16 : index
    %c0_24 = arith.constant 0 : index
    %39 = vector.load %arg2[%c16_23, %c0_24] : memref<144x128xf32, #tpu.memory_space<vmem>>, vector<128x128xf32>
    %cst_25 = arith.constant dense<0.000000e+00> : vector<8x128xf32>
    %40 = tpu.matmul %36, %39, %cst_25 {dimension_numbers = #tpu.dot_dimension_numbers<[1], [0], [0], [1], [0, 0, 1, 1], [], []>} : vector<8x128xf32>, vector<128x128xf32>, vector<8x128xf32> -> vector<8x128xf32>
    %41 = arith.addf %38, %40 : vector<8x128xf32>
    %cst_26 = arith.constant 6.660000e-01 : f32
    %42 = vector.broadcast %cst_26 : f32 to vector<8x128xf32>
    %43 = arith.mulf %42, %41 : vector<8x128xf32>
    %44 = math.tanh %43 : vector<8x128xf32>
    %cst_27 = arith.constant 1.715900e+00 : f32
    %45 = vector.broadcast %cst_27 : f32 to vector<8x128xf32>
    %46 = arith.mulf %45, %44 : vector<8x128xf32>
    %c0_28 = arith.constant 0 : index
    %c0_29 = arith.constant 0 : index
    %47 = vector.load %arg3[%c0_28, %c0_29] : memref<128x384xf32, #tpu.memory_space<vmem>>, vector<128x384xf32>
    %cst_30 = arith.constant dense<0.000000e+00> : vector<8x384xf32>
    %48 = tpu.matmul %46, %47, %cst_30 {dimension_numbers = #tpu.dot_dimension_numbers<[1], [0], [0], [1], [0, 0, 1, 1], [], []>} : vector<8x128xf32>, vector<128x384xf32>, vector<8x384xf32> -> vector<8x384xf32>
    %49 = arith.addf %48, %10 : vector<8x384xf32>
    %50 = vector.extract_strided_slice %49 {offsets = [0, 0], sizes = [8, 128], strides = [1, 1]} : vector<8x384xf32> to vector<8x128xf32>
    %51 = math.tanh %50 : vector<8x128xf32>
    %52 = vector.extract_strided_slice %49 {offsets = [0, 128], sizes = [8, 128], strides = [1, 1]} : vector<8x384xf32> to vector<8x128xf32>
    %53 = math.tanh %52 : vector<8x128xf32>
    %54 = vector.extract_strided_slice %49 {offsets = [0, 256], sizes = [8, 128], strides = [1, 1]} : vector<8x384xf32> to vector<8x128xf32>
    %55 = arith.negf %54 : vector<8x128xf32>
    %56 = math.exp %55 : vector<8x128xf32>
    %cst_31 = arith.constant 1.000000e+00 : f32
    %57 = vector.broadcast %cst_31 : f32 to vector<8x128xf32>
    %58 = arith.addf %57, %56 : vector<8x128xf32>
    %59 = arith.divf %57, %58 : vector<8x128xf32>
    %60 = arith.subf %53, %51 : vector<8x128xf32>
    %61 = arith.mulf %59, %60 : vector<8x128xf32>
    %62 = arith.addf %51, %61 : vector<8x128xf32>
    %c8_32 = arith.constant 8 : index
    %c0_33 = arith.constant 0 : index
    %63 = vector.load %arg12[%c8_32, %c0_33] : memref<64x128xf32, #tpu.memory_space<vmem>>, vector<8x128xf32>
    tpu.vector_store %arg12[%c8_32, %c0_33], %62 {strides = array<i32>} : memref<64x128xf32, #tpu.memory_space<vmem>>, vector<8x128xf32>,
    %c16_34 = arith.constant 16 : index
    %c0_35 = arith.constant 0 : index
    %64 = vector.load %arg11[%c16_34, %c0_35] : memref<64x128xf32, #tpu.memory_space<vmem>>, vector<8x128xf32>
    %c16_36 = arith.constant 16 : index
    %c0_37 = arith.constant 0 : index
    %65 = vector.load %arg2[%c16_36, %c0_37] : memref<144x128xf32, #tpu.memory_space<vmem>>, vector<128x128xf32>
    %cst_38 = arith.constant dense<0.000000e+00> : vector<8x128xf32>
    %66 = tpu.matmul %62, %65, %cst_38 {dimension_numbers = #tpu.dot_dimension_numbers<[1], [0], [0], [1], [0, 0, 1, 1], [], []>} : vector<8x128xf32>, vector<128x128xf32>, vector<8x128xf32> -> vector<8x128xf32>
    %67 = arith.addf %64, %66 : vector<8x128xf32>
    %cst_39 = arith.constant 6.660000e-01 : f32
    %68 = vector.broadcast %cst_39 : f32 to vector<8x128xf32>
    %69 = arith.mulf %68, %67 : vector<8x128xf32>
    %70 = math.tanh %69 : vector<8x128xf32>
    %cst_40 = arith.constant 1.715900e+00 : f32
    %71 = vector.broadcast %cst_40 : f32 to vector<8x128xf32>
    %72 = arith.mulf %71, %70 : vector<8x128xf32>
    %c0_41 = arith.constant 0 : index
    %c0_42 = arith.constant 0 : index
    %73 = vector.load %arg3[%c0_41, %c0_42] : memref<128x384xf32, #tpu.memory_space<vmem>>, vector<128x384xf32>
    %cst_43 = arith.constant dense<0.000000e+00> : vector<8x384xf32>
    %74 = tpu.matmul %72, %73, %cst_43 {dimension_numbers = #tpu.dot_dimension_numbers<[1], [0], [0], [1], [0, 0, 1, 1], [], []>} : vector<8x128xf32>, vector<128x384xf32>, vector<8x384xf32> -> vector<8x384xf32>
    %75 = arith.addf %74, %10 : vector<8x384xf32>
    %76 = vector.extract_strided_slice %75 {offsets = [0, 0], sizes = [8, 128], strides = [1, 1]} : vector<8x384xf32> to vector<8x128xf32>
    %77 = math.tanh %76 : vector<8x128xf32>
    %78 = vector.extract_strided_slice %75 {offsets = [0, 128], sizes = [8, 128], strides = [1, 1]} : vector<8x384xf32> to vector<8x128xf32>
    %79 = math.tanh %78 : vector<8x128xf32>
    %80 = vector.extract_strided_slice %75 {offsets = [0, 256], sizes = [8, 128], strides = [1, 1]} : vector<8x384xf32> to vector<8x128xf32>
    %81 = arith.negf %80 : vector<8x128xf32>
    %82 = math.exp %81 : vector<8x128xf32>
    %cst_44 = arith.constant 1.000000e+00 : f32
    %83 = vector.broadcast %cst_44 : f32 to vector<8x128xf32>
    %84 = arith.addf %83, %82 : vector<8x128xf32>
    %85 = arith.divf %83, %84 : vector<8x128xf32>
    %86 = arith.subf %79, %77 : vector<8x128xf32>
    %87 = arith.mulf %85, %86 : vector<8x128xf32>
    %88 = arith.addf %77, %87 : vector<8x128xf32>
    %c16_45 = arith.constant 16 : index
    %c0_46 = arith.constant 0 : index
    %89 = vector.load %arg12[%c16_45, %c0_46] : memref<64x128xf32, #tpu.memory_space<vmem>>, vector<8x128xf32>
    tpu.vector_store %arg12[%c16_45, %c0_46], %88 {strides = array<i32>} : memref<64x128xf32, #tpu.memory_space<vmem>>, vector<8x128xf32>,
    %c24 = arith.constant 24 : index
    %c0_47 = arith.constant 0 : index
    %90 = vector.load %arg11[%c24, %c0_47] : memref<64x128xf32, #tpu.memory_space<vmem>>, vector<8x128xf32>
    %c16_48 = arith.constant 16 : index
    %c0_49 = arith.constant 0 : index
    %91 = vector.load %arg2[%c16_48, %c0_49] : memref<144x128xf32, #tpu.memory_space<vmem>>, vector<128x128xf32>
    %cst_50 = arith.constant dense<0.000000e+00> : vector<8x128xf32>
    %92 = tpu.matmul %88, %91, %cst_50 {dimension_numbers = #tpu.dot_dimension_numbers<[1], [0], [0], [1], [0, 0, 1, 1], [], []>} : vector<8x128xf32>, vector<128x128xf32>, vector<8x128xf32> -> vector<8x128xf32>
    %93 = arith.addf %90, %92 : vector<8x128xf32>
    %cst_51 = arith.constant 6.660000e-01 : f32
    %94 = vector.broadcast %cst_51 : f32 to vector<8x128xf32>
    %95 = arith.mulf %94, %93 : vector<8x128xf32>
    %96 = math.tanh %95 : vector<8x128xf32>
    %cst_52 = arith.constant 1.715900e+00 : f32
    %97 = vector.broadcast %cst_52 : f32 to vector<8x128xf32>
    %98 = arith.mulf %97, %96 : vector<8x128xf32>
    %c0_53 = arith.constant 0 : index
    %c0_54 = arith.constant 0 : index
    %99 = vector.load %arg3[%c0_53, %c0_54] : memref<128x384xf32, #tpu.memory_space<vmem>>, vector<128x384xf32>
    %cst_55 = arith.constant dense<0.000000e+00> : vector<8x384xf32>
    %100 = tpu.matmul %98, %99, %cst_55 {dimension_numbers = #tpu.dot_dimension_numbers<[1], [0], [0], [1], [0, 0, 1, 1], [], []>} : vector<8x128xf32>, vector<128x384xf32>, vector<8x384xf32> -> vector<8x384xf32>
    %101 = arith.addf %100, %10 : vector<8x384xf32>
    %102 = vector.extract_strided_slice %101 {offsets = [0, 0], sizes = [8, 128], strides = [1, 1]} : vector<8x384xf32> to vector<8x128xf32>
    %103 = math.tanh %102 : vector<8x128xf32>
    %104 = vector.extract_strided_slice %101 {offsets = [0, 128], sizes = [8, 128], strides = [1, 1]} : vector<8x384xf32> to vector<8x128xf32>
    %105 = math.tanh %104 : vector<8x128xf32>
    %106 = vector.extract_strided_slice %101 {offsets = [0, 256], sizes = [8, 128], strides = [1, 1]} : vector<8x384xf32> to vector<8x128xf32>
    %107 = arith.negf %106 : vector<8x128xf32>
    %108 = math.exp %107 : vector<8x128xf32>
    %cst_56 = arith.constant 1.000000e+00 : f32
    %109 = vector.broadcast %cst_56 : f32 to vector<8x128xf32>
    %110 = arith.addf %109, %108 : vector<8x128xf32>
    %111 = arith.divf %109, %110 : vector<8x128xf32>
    %112 = arith.subf %105, %103 : vector<8x128xf32>
    %113 = arith.mulf %111, %112 : vector<8x128xf32>
    %114 = arith.addf %103, %113 : vector<8x128xf32>
    %c24_57 = arith.constant 24 : index
    %c0_58 = arith.constant 0 : index
    %115 = vector.load %arg12[%c24_57, %c0_58] : memref<64x128xf32, #tpu.memory_space<vmem>>, vector<8x128xf32>
    tpu.vector_store %arg12[%c24_57, %c0_58], %114 {strides = array<i32>} : memref<64x128xf32, #tpu.memory_space<vmem>>, vector<8x128xf32>,
    %c32 = arith.constant 32 : index
    %c0_59 = arith.constant 0 : index
    %116 = vector.load %arg11[%c32, %c0_59] : memref<64x128xf32, #tpu.memory_space<vmem>>, vector<8x128xf32>
    %c16_60 = arith.constant 16 : index
    %c0_61 = arith.constant 0 : index
    %117 = vector.load %arg2[%c16_60, %c0_61] : memref<144x128xf32, #tpu.memory_space<vmem>>, vector<128x128xf32>
    %cst_62 = arith.constant dense<0.000000e+00> : vector<8x128xf32>
    %118 = tpu.matmul %114, %117, %cst_62 {dimension_numbers = #tpu.dot_dimension_numbers<[1], [0], [0], [1], [0, 0, 1, 1], [], []>} : vector<8x128xf32>, vector<128x128xf32>, vector<8x128xf32> -> vector<8x128xf32>
    %119 = arith.addf %116, %118 : vector<8x128xf32>
    %cst_63 = arith.constant 6.660000e-01 : f32
    %120 = vector.broadcast %cst_63 : f32 to vector<8x128xf32>
    %121 = arith.mulf %120, %119 : vector<8x128xf32>
    %122 = math.tanh %121 : vector<8x128xf32>
    %cst_64 = arith.constant 1.715900e+00 : f32
    %123 = vector.broadcast %cst_64 : f32 to vector<8x128xf32>
    %124 = arith.mulf %123, %122 : vector<8x128xf32>
    %c0_65 = arith.constant 0 : index
    %c0_66 = arith.constant 0 : index
    %125 = vector.load %arg3[%c0_65, %c0_66] : memref<128x384xf32, #tpu.memory_space<vmem>>, vector<128x384xf32>
    %cst_67 = arith.constant dense<0.000000e+00> : vector<8x384xf32>
    %126 = tpu.matmul %124, %125, %cst_67 {dimension_numbers = #tpu.dot_dimension_numbers<[1], [0], [0], [1], [0, 0, 1, 1], [], []>} : vector<8x128xf32>, vector<128x384xf32>, vector<8x384xf32> -> vector<8x384xf32>
    %127 = arith.addf %126, %10 : vector<8x384xf32>
    %128 = vector.extract_strided_slice %127 {offsets = [0, 0], sizes = [8, 128], strides = [1, 1]} : vector<8x384xf32> to vector<8x128xf32>
    %129 = math.tanh %128 : vector<8x128xf32>
    %130 = vector.extract_strided_slice %127 {offsets = [0, 128], sizes = [8, 128], strides = [1, 1]} : vector<8x384xf32> to vector<8x128xf32>
    %131 = math.tanh %130 : vector<8x128xf32>
    %132 = vector.extract_strided_slice %127 {offsets = [0, 256], sizes = [8, 128], strides = [1, 1]} : vector<8x384xf32> to vector<8x128xf32>
    %133 = arith.negf %132 : vector<8x128xf32>
    %134 = math.exp %133 : vector<8x128xf32>
    %cst_68 = arith.constant 1.000000e+00 : f32
    %135 = vector.broadcast %cst_68 : f32 to vector<8x128xf32>
    %136 = arith.addf %135, %134 : vector<8x128xf32>
    %137 = arith.divf %135, %136 : vector<8x128xf32>
    %138 = arith.subf %131, %129 : vector<8x128xf32>
    %139 = arith.mulf %137, %138 : vector<8x128xf32>
    %140 = arith.addf %129, %139 : vector<8x128xf32>
    %c32_69 = arith.constant 32 : index
    %c0_70 = arith.constant 0 : index
    %141 = vector.load %arg12[%c32_69, %c0_70] : memref<64x128xf32, #tpu.memory_space<vmem>>, vector<8x128xf32>
    tpu.vector_store %arg12[%c32_69, %c0_70], %140 {strides = array<i32>} : memref<64x128xf32, #tpu.memory_space<vmem>>, vector<8x128xf32>,
    %c40 = arith.constant 40 : index
    %c0_71 = arith.constant 0 : index
    %142 = vector.load %arg11[%c40, %c0_71] : memref<64x128xf32, #tpu.memory_space<vmem>>, vector<8x128xf32>
    %c16_72 = arith.constant 16 : index
    %c0_73 = arith.constant 0 : index
    %143 = vector.load %arg2[%c16_72, %c0_73] : memref<144x128xf32, #tpu.memory_space<vmem>>, vector<128x128xf32>
    %cst_74 = arith.constant dense<0.000000e+00> : vector<8x128xf32>
    %144 = tpu.matmul %140, %143, %cst_74 {dimension_numbers = #tpu.dot_dimension_numbers<[1], [0], [0], [1], [0, 0, 1, 1], [], []>} : vector<8x128xf32>, vector<128x128xf32>, vector<8x128xf32> -> vector<8x128xf32>
    %145 = arith.addf %142, %144 : vector<8x128xf32>
    %cst_75 = arith.constant 6.660000e-01 : f32
    %146 = vector.broadcast %cst_75 : f32 to vector<8x128xf32>
    %147 = arith.mulf %146, %145 : vector<8x128xf32>
    %148 = math.tanh %147 : vector<8x128xf32>
    %cst_76 = arith.constant 1.715900e+00 : f32
    %149 = vector.broadcast %cst_76 : f32 to vector<8x128xf32>
    %150 = arith.mulf %149, %148 : vector<8x128xf32>
    %c0_77 = arith.constant 0 : index
    %c0_78 = arith.constant 0 : index
    %151 = vector.load %arg3[%c0_77, %c0_78] : memref<128x384xf32, #tpu.memory_space<vmem>>, vector<128x384xf32>
    %cst_79 = arith.constant dense<0.000000e+00> : vector<8x384xf32>
    %152 = tpu.matmul %150, %151, %cst_79 {dimension_numbers = #tpu.dot_dimension_numbers<[1], [0], [0], [1], [0, 0, 1, 1], [], []>} : vector<8x128xf32>, vector<128x384xf32>, vector<8x384xf32> -> vector<8x384xf32>
    %153 = arith.addf %152, %10 : vector<8x384xf32>
    %154 = vector.extract_strided_slice %153 {offsets = [0, 0], sizes = [8, 128], strides = [1, 1]} : vector<8x384xf32> to vector<8x128xf32>
    %155 = math.tanh %154 : vector<8x128xf32>
    %156 = vector.extract_strided_slice %153 {offsets = [0, 128], sizes = [8, 128], strides = [1, 1]} : vector<8x384xf32> to vector<8x128xf32>
    %157 = math.tanh %156 : vector<8x128xf32>
    %158 = vector.extract_strided_slice %153 {offsets = [0, 256], sizes = [8, 128], strides = [1, 1]} : vector<8x384xf32> to vector<8x128xf32>
    %159 = arith.negf %158 : vector<8x128xf32>
    %160 = math.exp %159 : vector<8x128xf32>
    %cst_80 = arith.constant 1.000000e+00 : f32
    %161 = vector.broadcast %cst_80 : f32 to vector<8x128xf32>
    %162 = arith.addf %161, %160 : vector<8x128xf32>
    %163 = arith.divf %161, %162 : vector<8x128xf32>
    %164 = arith.subf %157, %155 : vector<8x128xf32>
    %165 = arith.mulf %163, %164 : vector<8x128xf32>
    %166 = arith.addf %155, %165 : vector<8x128xf32>
    %c40_81 = arith.constant 40 : index
    %c0_82 = arith.constant 0 : index
    %167 = vector.load %arg12[%c40_81, %c0_82] : memref<64x128xf32, #tpu.memory_space<vmem>>, vector<8x128xf32>
    tpu.vector_store %arg12[%c40_81, %c0_82], %166 {strides = array<i32>} : memref<64x128xf32, #tpu.memory_space<vmem>>, vector<8x128xf32>,
    %c48 = arith.constant 48 : index
    %c0_83 = arith.constant 0 : index
    %168 = vector.load %arg11[%c48, %c0_83] : memref<64x128xf32, #tpu.memory_space<vmem>>, vector<8x128xf32>
    %c16_84 = arith.constant 16 : index
    %c0_85 = arith.constant 0 : index
    %169 = vector.load %arg2[%c16_84, %c0_85] : memref<144x128xf32, #tpu.memory_space<vmem>>, vector<128x128xf32>
    %cst_86 = arith.constant dense<0.000000e+00> : vector<8x128xf32>
    %170 = tpu.matmul %166, %169, %cst_86 {dimension_numbers = #tpu.dot_dimension_numbers<[1], [0], [0], [1], [0, 0, 1, 1], [], []>} : vector<8x128xf32>, vector<128x128xf32>, vector<8x128xf32> -> vector<8x128xf32>
    %171 = arith.addf %168, %170 : vector<8x128xf32>
    %cst_87 = arith.constant 6.660000e-01 : f32
    %172 = vector.broadcast %cst_87 : f32 to vector<8x128xf32>
    %173 = arith.mulf %172, %171 : vector<8x128xf32>
    %174 = math.tanh %173 : vector<8x128xf32>
    %cst_88 = arith.constant 1.715900e+00 : f32
    %175 = vector.broadcast %cst_88 : f32 to vector<8x128xf32>
    %176 = arith.mulf %175, %174 : vector<8x128xf32>
    %c0_89 = arith.constant 0 : index
    %c0_90 = arith.constant 0 : index
    %177 = vector.load %arg3[%c0_89, %c0_90] : memref<128x384xf32, #tpu.memory_space<vmem>>, vector<128x384xf32>
    %cst_91 = arith.constant dense<0.000000e+00> : vector<8x384xf32>
    %178 = tpu.matmul %176, %177, %cst_91 {dimension_numbers = #tpu.dot_dimension_numbers<[1], [0], [0], [1], [0, 0, 1, 1], [], []>} : vector<8x128xf32>, vector<128x384xf32>, vector<8x384xf32> -> vector<8x384xf32>
    %179 = arith.addf %178, %10 : vector<8x384xf32>
    %180 = vector.extract_strided_slice %179 {offsets = [0, 0], sizes = [8, 128], strides = [1, 1]} : vector<8x384xf32> to vector<8x128xf32>
    %181 = math.tanh %180 : vector<8x128xf32>
    %182 = vector.extract_strided_slice %179 {offsets = [0, 128], sizes = [8, 128], strides = [1, 1]} : vector<8x384xf32> to vector<8x128xf32>
    %183 = math.tanh %182 : vector<8x128xf32>
    %184 = vector.extract_strided_slice %179 {offsets = [0, 256], sizes = [8, 128], strides = [1, 1]} : vector<8x384xf32> to vector<8x128xf32>
    %185 = arith.negf %184 : vector<8x128xf32>
    %186 = math.exp %185 : vector<8x128xf32>
    %cst_92 = arith.constant 1.000000e+00 : f32
    %187 = vector.broadcast %cst_92 : f32 to vector<8x128xf32>
    %188 = arith.addf %187, %186 : vector<8x128xf32>
    %189 = arith.divf %187, %188 : vector<8x128xf32>
    %190 = arith.subf %183, %181 : vector<8x128xf32>
    %191 = arith.mulf %189, %190 : vector<8x128xf32>
    %192 = arith.addf %181, %191 : vector<8x128xf32>
    %c48_93 = arith.constant 48 : index
    %c0_94 = arith.constant 0 : index
    %193 = vector.load %arg12[%c48_93, %c0_94] : memref<64x128xf32, #tpu.memory_space<vmem>>, vector<8x128xf32>
    tpu.vector_store %arg12[%c48_93, %c0_94], %192 {strides = array<i32>} : memref<64x128xf32, #tpu.memory_space<vmem>>, vector<8x128xf32>,
    %c56 = arith.constant 56 : index
    %c0_95 = arith.constant 0 : index
    %194 = vector.load %arg11[%c56, %c0_95] : memref<64x128xf32, #tpu.memory_space<vmem>>, vector<8x128xf32>
    %c16_96 = arith.constant 16 : index
    %c0_97 = arith.constant 0 : index
    %195 = vector.load %arg2[%c16_96, %c0_97] : memref<144x128xf32, #tpu.memory_space<vmem>>, vector<128x128xf32>
    %cst_98 = arith.constant dense<0.000000e+00> : vector<8x128xf32>
    %196 = tpu.matmul %192, %195, %cst_98 {dimension_numbers = #tpu.dot_dimension_numbers<[1], [0], [0], [1], [0, 0, 1, 1], [], []>} : vector<8x128xf32>, vector<128x128xf32>, vector<8x128xf32> -> vector<8x128xf32>
    %197 = arith.addf %194, %196 : vector<8x128xf32>
    %cst_99 = arith.constant 6.660000e-01 : f32
    %198 = vector.broadcast %cst_99 : f32 to vector<8x128xf32>
    %199 = arith.mulf %198, %197 : vector<8x128xf32>
    %200 = math.tanh %199 : vector<8x128xf32>
    %cst_100 = arith.constant 1.715900e+00 : f32
    %201 = vector.broadcast %cst_100 : f32 to vector<8x128xf32>
    %202 = arith.mulf %201, %200 : vector<8x128xf32>
    %c0_101 = arith.constant 0 : index
    %c0_102 = arith.constant 0 : index
    %203 = vector.load %arg3[%c0_101, %c0_102] : memref<128x384xf32, #tpu.memory_space<vmem>>, vector<128x384xf32>
    %cst_103 = arith.constant dense<0.000000e+00> : vector<8x384xf32>
    %204 = tpu.matmul %202, %203, %cst_103 {dimension_numbers = #tpu.dot_dimension_numbers<[1], [0], [0], [1], [0, 0, 1, 1], [], []>} : vector<8x128xf32>, vector<128x384xf32>, vector<8x384xf32> -> vector<8x384xf32>
    %205 = arith.addf %204, %10 : vector<8x384xf32>
    %206 = vector.extract_strided_slice %205 {offsets = [0, 0], sizes = [8, 128], strides = [1, 1]} : vector<8x384xf32> to vector<8x128xf32>
    %207 = math.tanh %206 : vector<8x128xf32>
    %208 = vector.extract_strided_slice %205 {offsets = [0, 128], sizes = [8, 128], strides = [1, 1]} : vector<8x384xf32> to vector<8x128xf32>
    %209 = math.tanh %208 : vector<8x128xf32>
    %210 = vector.extract_strided_slice %205 {offsets = [0, 256], sizes = [8, 128], strides = [1, 1]} : vector<8x384xf32> to vector<8x128xf32>
    %211 = arith.negf %210 : vector<8x128xf32>
    %212 = math.exp %211 : vector<8x128xf32>
    %cst_104 = arith.constant 1.000000e+00 : f32
    %213 = vector.broadcast %cst_104 : f32 to vector<8x128xf32>
    %214 = arith.addf %213, %212 : vector<8x128xf32>
    %215 = arith.divf %213, %214 : vector<8x128xf32>
    %216 = arith.subf %209, %207 : vector<8x128xf32>
    %217 = arith.mulf %215, %216 : vector<8x128xf32>
    %218 = arith.addf %207, %217 : vector<8x128xf32>
    %c56_105 = arith.constant 56 : index
    %c0_106 = arith.constant 0 : index
    %219 = vector.load %arg12[%c56_105, %c0_106] : memref<64x128xf32, #tpu.memory_space<vmem>>, vector<8x128xf32>
    tpu.vector_store %arg12[%c56_105, %c0_106], %218 {strides = array<i32>} : memref<64x128xf32, #tpu.memory_space<vmem>>, vector<8x128xf32>,
    %c0_107 = arith.constant 0 : index
    %c0_108 = arith.constant 0 : index
    %220 = vector.load %arg12[%c0_107, %c0_108] : memref<64x128xf32, #tpu.memory_space<vmem>>, vector<64x128xf32>
    %c0_109 = arith.constant 0 : index
    %c0_110 = arith.constant 0 : index
    %221 = vector.load %arg5[%c0_109, %c0_110] : memref<256x128xf32, #tpu.memory_space<vmem>>, vector<128x128xf32>
    %cst_111 = arith.constant dense<0.000000e+00> : vector<64x128xf32>
    %222 = tpu.matmul %220, %221, %cst_111 {dimension_numbers = #tpu.dot_dimension_numbers<[1], [0], [0], [1], [0, 0, 1, 1], [], []>} : vector<64x128xf32>, vector<128x128xf32>, vector<64x128xf32> -> vector<64x128xf32>
    %c0_112 = arith.constant 0 : index
    %c0_113 = arith.constant 0 : index
    %223 = vector.load %arg7[%c0_112, %c0_113] : memref<1x512xf32, #tpu.memory_space<vmem>>, vector<1x128xf32>
    %224 = vector.broadcast %223 : vector<1x128xf32> to vector<64x128xf32>
    %225 = arith.addf %222, %224 : vector<64x128xf32>
    %c0_114 = arith.constant 0 : index
    %c0_115 = arith.constant 0 : index
    %226 = vector.load %arg11[%c0_114, %c0_115] : memref<64x128xf32, #tpu.memory_space<vmem>>, vector<64x128xf32>
    tpu.vector_store %arg11[%c0_114, %c0_115], %225 {strides = array<i32>} : memref<64x128xf32, #tpu.memory_space<vmem>>, vector<64x128xf32>,
    %c0_116 = arith.constant 0 : index
    %c128_117 = arith.constant 128 : index
    %227 = vector.load %arg7[%c0_116, %c128_117] : memref<1x512xf32, #tpu.memory_space<vmem>>, vector<1x384xf32>
    %228 = vector.shape_cast %227 : vector<1x384xf32> to vector<1x384xf32>
    %229 = vector.broadcast %228 : vector<1x384xf32> to vector<8x384xf32>
    %cst_118 = arith.constant 0.000000e+00 : f32
    %230 = vector.broadcast %cst_118 : f32 to vector<8x128xf32>
    %c0_119 = arith.constant 0 : index
    %c0_120 = arith.constant 0 : index
    %231 = vector.load %arg11[%c0_119, %c0_120] : memref<64x128xf32, #tpu.memory_space<vmem>>, vector<8x128xf32>
    %c128_121 = arith.constant 128 : index
    %c0_122 = arith.constant 0 : index
    %232 = vector.load %arg5[%c128_121, %c0_122] : memref<256x128xf32, #tpu.memory_space<vmem>>, vector<128x128xf32>
    %cst_123 = arith.constant dense<0.000000e+00> : vector<8x128xf32>
    %233 = tpu.matmul %230, %232, %cst_123 {dimension_numbers = #tpu.dot_dimension_numbers<[1], [0], [0], [1], [0, 0, 1, 1], [], []>} : vector<8x128xf32>, vector<128x128xf32>, vector<8x128xf32> -> vector<8x128xf32>
    %234 = arith.addf %231, %233 : vector<8x128xf32>
    %cst_124 = arith.constant 6.660000e-01 : f32
    %235 = vector.broadcast %cst_124 : f32 to vector<8x128xf32>
    %236 = arith.mulf %235, %234 : vector<8x128xf32>
    %237 = math.tanh %236 : vector<8x128xf32>
    %cst_125 = arith.constant 1.715900e+00 : f32
    %238 = vector.broadcast %cst_125 : f32 to vector<8x128xf32>
    %239 = arith.mulf %238, %237 : vector<8x128xf32>
    %c0_126 = arith.constant 0 : index
    %c0_127 = arith.constant 0 : index
    %240 = vector.load %arg6[%c0_126, %c0_127] : memref<128x384xf32, #tpu.memory_space<vmem>>, vector<128x384xf32>
    %cst_128 = arith.constant dense<0.000000e+00> : vector<8x384xf32>
    %241 = tpu.matmul %239, %240, %cst_128 {dimension_numbers = #tpu.dot_dimension_numbers<[1], [0], [0], [1], [0, 0, 1, 1], [], []>} : vector<8x128xf32>, vector<128x384xf32>, vector<8x384xf32> -> vector<8x384xf32>
    %242 = arith.addf %241, %229 : vector<8x384xf32>
    %243 = vector.extract_strided_slice %242 {offsets = [0, 0], sizes = [8, 128], strides = [1, 1]} : vector<8x384xf32> to vector<8x128xf32>
    %244 = math.tanh %243 : vector<8x128xf32>
    %245 = vector.extract_strided_slice %242 {offsets = [0, 128], sizes = [8, 128], strides = [1, 1]} : vector<8x384xf32> to vector<8x128xf32>
    %246 = math.tanh %245 : vector<8x128xf32>
    %247 = vector.extract_strided_slice %242 {offsets = [0, 256], sizes = [8, 128], strides = [1, 1]} : vector<8x384xf32> to vector<8x128xf32>
    %248 = arith.negf %247 : vector<8x128xf32>
    %249 = math.exp %248 : vector<8x128xf32>
    %cst_129 = arith.constant 1.000000e+00 : f32
    %250 = vector.broadcast %cst_129 : f32 to vector<8x128xf32>
    %251 = arith.addf %250, %249 : vector<8x128xf32>
    %252 = arith.divf %250, %251 : vector<8x128xf32>
    %253 = arith.subf %246, %244 : vector<8x128xf32>
    %254 = arith.mulf %252, %253 : vector<8x128xf32>
    %255 = arith.addf %244, %254 : vector<8x128xf32>
    %c0_130 = arith.constant 0 : index
    %c0_131 = arith.constant 0 : index
    %256 = vector.load %arg12[%c0_130, %c0_131] : memref<64x128xf32, #tpu.memory_space<vmem>>, vector<8x128xf32>
    tpu.vector_store %arg12[%c0_130, %c0_131], %255 {strides = array<i32>} : memref<64x128xf32, #tpu.memory_space<vmem>>, vector<8x128xf32>,
    %c8_132 = arith.constant 8 : index
    %c0_133 = arith.constant 0 : index
    %257 = vector.load %arg11[%c8_132, %c0_133] : memref<64x128xf32, #tpu.memory_space<vmem>>, vector<8x128xf32>
    %c128_134 = arith.constant 128 : index
    %c0_135 = arith.constant 0 : index
    %258 = vector.load %arg5[%c128_134, %c0_135] : memref<256x128xf32, #tpu.memory_space<vmem>>, vector<128x128xf32>
    %cst_136 = arith.constant dense<0.000000e+00> : vector<8x128xf32>
    %259 = tpu.matmul %255, %258, %cst_136 {dimension_numbers = #tpu.dot_dimension_numbers<[1], [0], [0], [1], [0, 0, 1, 1], [], []>} : vector<8x128xf32>, vector<128x128xf32>, vector<8x128xf32> -> vector<8x128xf32>
    %260 = arith.addf %257, %259 : vector<8x128xf32>
    %cst_137 = arith.constant 6.660000e-01 : f32
    %261 = vector.broadcast %cst_137 : f32 to vector<8x128xf32>
    %262 = arith.mulf %261, %260 : vector<8x128xf32>
    %263 = math.tanh %262 : vector<8x128xf32>
    %cst_138 = arith.constant 1.715900e+00 : f32
    %264 = vector.broadcast %cst_138 : f32 to vector<8x128xf32>
    %265 = arith.mulf %264, %263 : vector<8x128xf32>
    %c0_139 = arith.constant 0 : index
    %c0_140 = arith.constant 0 : index
    %266 = vector.load %arg6[%c0_139, %c0_140] : memref<128x384xf32, #tpu.memory_space<vmem>>, vector<128x384xf32>
    %cst_141 = arith.constant dense<0.000000e+00> : vector<8x384xf32>
    %267 = tpu.matmul %265, %266, %cst_141 {dimension_numbers = #tpu.dot_dimension_numbers<[1], [0], [0], [1], [0, 0, 1, 1], [], []>} : vector<8x128xf32>, vector<128x384xf32>, vector<8x384xf32> -> vector<8x384xf32>
    %268 = arith.addf %267, %229 : vector<8x384xf32>
    %269 = vector.extract_strided_slice %268 {offsets = [0, 0], sizes = [8, 128], strides = [1, 1]} : vector<8x384xf32> to vector<8x128xf32>
    %270 = math.tanh %269 : vector<8x128xf32>
    %271 = vector.extract_strided_slice %268 {offsets = [0, 128], sizes = [8, 128], strides = [1, 1]} : vector<8x384xf32> to vector<8x128xf32>
    %272 = math.tanh %271 : vector<8x128xf32>
    %273 = vector.extract_strided_slice %268 {offsets = [0, 256], sizes = [8, 128], strides = [1, 1]} : vector<8x384xf32> to vector<8x128xf32>
    %274 = arith.negf %273 : vector<8x128xf32>
    %275 = math.exp %274 : vector<8x128xf32>
    %cst_142 = arith.constant 1.000000e+00 : f32
    %276 = vector.broadcast %cst_142 : f32 to vector<8x128xf32>
    %277 = arith.addf %276, %275 : vector<8x128xf32>
    %278 = arith.divf %276, %277 : vector<8x128xf32>
    %279 = arith.subf %272, %270 : vector<8x128xf32>
    %280 = arith.mulf %278, %279 : vector<8x128xf32>
    %281 = arith.addf %270, %280 : vector<8x128xf32>
    %c8_143 = arith.constant 8 : index
    %c0_144 = arith.constant 0 : index
    %282 = vector.load %arg12[%c8_143, %c0_144] : memref<64x128xf32, #tpu.memory_space<vmem>>, vector<8x128xf32>
    tpu.vector_store %arg12[%c8_143, %c0_144], %281 {strides = array<i32>} : memref<64x128xf32, #tpu.memory_space<vmem>>, vector<8x128xf32>,
    %c16_145 = arith.constant 16 : index
    %c0_146 = arith.constant 0 : index
    %283 = vector.load %arg11[%c16_145, %c0_146] : memref<64x128xf32, #tpu.memory_space<vmem>>, vector<8x128xf32>
    %c128_147 = arith.constant 128 : index
    %c0_148 = arith.constant 0 : index
    %284 = vector.load %arg5[%c128_147, %c0_148] : memref<256x128xf32, #tpu.memory_space<vmem>>, vector<128x128xf32>
    %cst_149 = arith.constant dense<0.000000e+00> : vector<8x128xf32>
    %285 = tpu.matmul %281, %284, %cst_149 {dimension_numbers = #tpu.dot_dimension_numbers<[1], [0], [0], [1], [0, 0, 1, 1], [], []>} : vector<8x128xf32>, vector<128x128xf32>, vector<8x128xf32> -> vector<8x128xf32>
    %286 = arith.addf %283, %285 : vector<8x128xf32>
    %cst_150 = arith.constant 6.660000e-01 : f32
    %287 = vector.broadcast %cst_150 : f32 to vector<8x128xf32>
    %288 = arith.mulf %287, %286 : vector<8x128xf32>
    %289 = math.tanh %288 : vector<8x128xf32>
    %cst_151 = arith.constant 1.715900e+00 : f32
    %290 = vector.broadcast %cst_151 : f32 to vector<8x128xf32>
    %291 = arith.mulf %290, %289 : vector<8x128xf32>
    %c0_152 = arith.constant 0 : index
    %c0_153 = arith.constant 0 : index
    %292 = vector.load %arg6[%c0_152, %c0_153] : memref<128x384xf32, #tpu.memory_space<vmem>>, vector<128x384xf32>
    %cst_154 = arith.constant dense<0.000000e+00> : vector<8x384xf32>
    %293 = tpu.matmul %291, %292, %cst_154 {dimension_numbers = #tpu.dot_dimension_numbers<[1], [0], [0], [1], [0, 0, 1, 1], [], []>} : vector<8x128xf32>, vector<128x384xf32>, vector<8x384xf32> -> vector<8x384xf32>
    %294 = arith.addf %293, %229 : vector<8x384xf32>
    %295 = vector.extract_strided_slice %294 {offsets = [0, 0], sizes = [8, 128], strides = [1, 1]} : vector<8x384xf32> to vector<8x128xf32>
    %296 = math.tanh %295 : vector<8x128xf32>
    %297 = vector.extract_strided_slice %294 {offsets = [0, 128], sizes = [8, 128], strides = [1, 1]} : vector<8x384xf32> to vector<8x128xf32>
    %298 = math.tanh %297 : vector<8x128xf32>
    %299 = vector.extract_strided_slice %294 {offsets = [0, 256], sizes = [8, 128], strides = [1, 1]} : vector<8x384xf32> to vector<8x128xf32>
    %300 = arith.negf %299 : vector<8x128xf32>
    %301 = math.exp %300 : vector<8x128xf32>
    %cst_155 = arith.constant 1.000000e+00 : f32
    %302 = vector.broadcast %cst_155 : f32 to vector<8x128xf32>
    %303 = arith.addf %302, %301 : vector<8x128xf32>
    %304 = arith.divf %302, %303 : vector<8x128xf32>
    %305 = arith.subf %298, %296 : vector<8x128xf32>
    %306 = arith.mulf %304, %305 : vector<8x128xf32>
    %307 = arith.addf %296, %306 : vector<8x128xf32>
    %c16_156 = arith.constant 16 : index
    %c0_157 = arith.constant 0 : index
    %308 = vector.load %arg12[%c16_156, %c0_157] : memref<64x128xf32, #tpu.memory_space<vmem>>, vector<8x128xf32>
    tpu.vector_store %arg12[%c16_156, %c0_157], %307 {strides = array<i32>} : memref<64x128xf32, #tpu.memory_space<vmem>>, vector<8x128xf32>,
    %c24_158 = arith.constant 24 : index
    %c0_159 = arith.constant 0 : index
    %309 = vector.load %arg11[%c24_158, %c0_159] : memref<64x128xf32, #tpu.memory_space<vmem>>, vector<8x128xf32>
    %c128_160 = arith.constant 128 : index
    %c0_161 = arith.constant 0 : index
    %310 = vector.load %arg5[%c128_160, %c0_161] : memref<256x128xf32, #tpu.memory_space<vmem>>, vector<128x128xf32>
    %cst_162 = arith.constant dense<0.000000e+00> : vector<8x128xf32>
    %311 = tpu.matmul %307, %310, %cst_162 {dimension_numbers = #tpu.dot_dimension_numbers<[1], [0], [0], [1], [0, 0, 1, 1], [], []>} : vector<8x128xf32>, vector<128x128xf32>, vector<8x128xf32> -> vector<8x128xf32>
    %312 = arith.addf %309, %311 : vector<8x128xf32>
    %cst_163 = arith.constant 6.660000e-01 : f32
    %313 = vector.broadcast %cst_163 : f32 to vector<8x128xf32>
    %314 = arith.mulf %313, %312 : vector<8x128xf32>
    %315 = math.tanh %314 : vector<8x128xf32>
    %cst_164 = arith.constant 1.715900e+00 : f32
    %316 = vector.broadcast %cst_164 : f32 to vector<8x128xf32>
    %317 = arith.mulf %316, %315 : vector<8x128xf32>
    %c0_165 = arith.constant 0 : index
    %c0_166 = arith.constant 0 : index
    %318 = vector.load %arg6[%c0_165, %c0_166] : memref<128x384xf32, #tpu.memory_space<vmem>>, vector<128x384xf32>
    %cst_167 = arith.constant dense<0.000000e+00> : vector<8x384xf32>
    %319 = tpu.matmul %317, %318, %cst_167 {dimension_numbers = #tpu.dot_dimension_numbers<[1], [0], [0], [1], [0, 0, 1, 1], [], []>} : vector<8x128xf32>, vector<128x384xf32>, vector<8x384xf32> -> vector<8x384xf32>
    %320 = arith.addf %319, %229 : vector<8x384xf32>
    %321 = vector.extract_strided_slice %320 {offsets = [0, 0], sizes = [8, 128], strides = [1, 1]} : vector<8x384xf32> to vector<8x128xf32>
    %322 = math.tanh %321 : vector<8x128xf32>
    %323 = vector.extract_strided_slice %320 {offsets = [0, 128], sizes = [8, 128], strides = [1, 1]} : vector<8x384xf32> to vector<8x128xf32>
    %324 = math.tanh %323 : vector<8x128xf32>
    %325 = vector.extract_strided_slice %320 {offsets = [0, 256], sizes = [8, 128], strides = [1, 1]} : vector<8x384xf32> to vector<8x128xf32>
    %326 = arith.negf %325 : vector<8x128xf32>
    %327 = math.exp %326 : vector<8x128xf32>
    %cst_168 = arith.constant 1.000000e+00 : f32
    %328 = vector.broadcast %cst_168 : f32 to vector<8x128xf32>
    %329 = arith.addf %328, %327 : vector<8x128xf32>
    %330 = arith.divf %328, %329 : vector<8x128xf32>
    %331 = arith.subf %324, %322 : vector<8x128xf32>
    %332 = arith.mulf %330, %331 : vector<8x128xf32>
    %333 = arith.addf %322, %332 : vector<8x128xf32>
    %c24_169 = arith.constant 24 : index
    %c0_170 = arith.constant 0 : index
    %334 = vector.load %arg12[%c24_169, %c0_170] : memref<64x128xf32, #tpu.memory_space<vmem>>, vector<8x128xf32>
    tpu.vector_store %arg12[%c24_169, %c0_170], %333 {strides = array<i32>} : memref<64x128xf32, #tpu.memory_space<vmem>>, vector<8x128xf32>,
    %c32_171 = arith.constant 32 : index
    %c0_172 = arith.constant 0 : index
    %335 = vector.load %arg11[%c32_171, %c0_172] : memref<64x128xf32, #tpu.memory_space<vmem>>, vector<8x128xf32>
    %c128_173 = arith.constant 128 : index
    %c0_174 = arith.constant 0 : index
    %336 = vector.load %arg5[%c128_173, %c0_174] : memref<256x128xf32, #tpu.memory_space<vmem>>, vector<128x128xf32>
    %cst_175 = arith.constant dense<0.000000e+00> : vector<8x128xf32>
    %337 = tpu.matmul %333, %336, %cst_175 {dimension_numbers = #tpu.dot_dimension_numbers<[1], [0], [0], [1], [0, 0, 1, 1], [], []>} : vector<8x128xf32>, vector<128x128xf32>, vector<8x128xf32> -> vector<8x128xf32>
    %338 = arith.addf %335, %337 : vector<8x128xf32>
    %cst_176 = arith.constant 6.660000e-01 : f32
    %339 = vector.broadcast %cst_176 : f32 to vector<8x128xf32>
    %340 = arith.mulf %339, %338 : vector<8x128xf32>
    %341 = math.tanh %340 : vector<8x128xf32>
    %cst_177 = arith.constant 1.715900e+00 : f32
    %342 = vector.broadcast %cst_177 : f32 to vector<8x128xf32>
    %343 = arith.mulf %342, %341 : vector<8x128xf32>
    %c0_178 = arith.constant 0 : index
    %c0_179 = arith.constant 0 : index
    %344 = vector.load %arg6[%c0_178, %c0_179] : memref<128x384xf32, #tpu.memory_space<vmem>>, vector<128x384xf32>
    %cst_180 = arith.constant dense<0.000000e+00> : vector<8x384xf32>
    %345 = tpu.matmul %343, %344, %cst_180 {dimension_numbers = #tpu.dot_dimension_numbers<[1], [0], [0], [1], [0, 0, 1, 1], [], []>} : vector<8x128xf32>, vector<128x384xf32>, vector<8x384xf32> -> vector<8x384xf32>
    %346 = arith.addf %345, %229 : vector<8x384xf32>
    %347 = vector.extract_strided_slice %346 {offsets = [0, 0], sizes = [8, 128], strides = [1, 1]} : vector<8x384xf32> to vector<8x128xf32>
    %348 = math.tanh %347 : vector<8x128xf32>
    %349 = vector.extract_strided_slice %346 {offsets = [0, 128], sizes = [8, 128], strides = [1, 1]} : vector<8x384xf32> to vector<8x128xf32>
    %350 = math.tanh %349 : vector<8x128xf32>
    %351 = vector.extract_strided_slice %346 {offsets = [0, 256], sizes = [8, 128], strides = [1, 1]} : vector<8x384xf32> to vector<8x128xf32>
    %352 = arith.negf %351 : vector<8x128xf32>
    %353 = math.exp %352 : vector<8x128xf32>
    %cst_181 = arith.constant 1.000000e+00 : f32
    %354 = vector.broadcast %cst_181 : f32 to vector<8x128xf32>
    %355 = arith.addf %354, %353 : vector<8x128xf32>
    %356 = arith.divf %354, %355 : vector<8x128xf32>
    %357 = arith.subf %350, %348 : vector<8x128xf32>
    %358 = arith.mulf %356, %357 : vector<8x128xf32>
    %359 = arith.addf %348, %358 : vector<8x128xf32>
    %c32_182 = arith.constant 32 : index
    %c0_183 = arith.constant 0 : index
    %360 = vector.load %arg12[%c32_182, %c0_183] : memref<64x128xf32, #tpu.memory_space<vmem>>, vector<8x128xf32>
    tpu.vector_store %arg12[%c32_182, %c0_183], %359 {strides = array<i32>} : memref<64x128xf32, #tpu.memory_space<vmem>>, vector<8x128xf32>,
    %c40_184 = arith.constant 40 : index
    %c0_185 = arith.constant 0 : index
    %361 = vector.load %arg11[%c40_184, %c0_185] : memref<64x128xf32, #tpu.memory_space<vmem>>, vector<8x128xf32>
    %c128_186 = arith.constant 128 : index
    %c0_187 = arith.constant 0 : index
    %362 = vector.load %arg5[%c128_186, %c0_187] : memref<256x128xf32, #tpu.memory_space<vmem>>, vector<128x128xf32>
    %cst_188 = arith.constant dense<0.000000e+00> : vector<8x128xf32>
    %363 = tpu.matmul %359, %362, %cst_188 {dimension_numbers = #tpu.dot_dimension_numbers<[1], [0], [0], [1], [0, 0, 1, 1], [], []>} : vector<8x128xf32>, vector<128x128xf32>, vector<8x128xf32> -> vector<8x128xf32>
    %364 = arith.addf %361, %363 : vector<8x128xf32>
    %cst_189 = arith.constant 6.660000e-01 : f32
    %365 = vector.broadcast %cst_189 : f32 to vector<8x128xf32>
    %366 = arith.mulf %365, %364 : vector<8x128xf32>
    %367 = math.tanh %366 : vector<8x128xf32>
    %cst_190 = arith.constant 1.715900e+00 : f32
    %368 = vector.broadcast %cst_190 : f32 to vector<8x128xf32>
    %369 = arith.mulf %368, %367 : vector<8x128xf32>
    %c0_191 = arith.constant 0 : index
    %c0_192 = arith.constant 0 : index
    %370 = vector.load %arg6[%c0_191, %c0_192] : memref<128x384xf32, #tpu.memory_space<vmem>>, vector<128x384xf32>
    %cst_193 = arith.constant dense<0.000000e+00> : vector<8x384xf32>
    %371 = tpu.matmul %369, %370, %cst_193 {dimension_numbers = #tpu.dot_dimension_numbers<[1], [0], [0], [1], [0, 0, 1, 1], [], []>} : vector<8x128xf32>, vector<128x384xf32>, vector<8x384xf32> -> vector<8x384xf32>
    %372 = arith.addf %371, %229 : vector<8x384xf32>
    %373 = vector.extract_strided_slice %372 {offsets = [0, 0], sizes = [8, 128], strides = [1, 1]} : vector<8x384xf32> to vector<8x128xf32>
    %374 = math.tanh %373 : vector<8x128xf32>
    %375 = vector.extract_strided_slice %372 {offsets = [0, 128], sizes = [8, 128], strides = [1, 1]} : vector<8x384xf32> to vector<8x128xf32>
    %376 = math.tanh %375 : vector<8x128xf32>
    %377 = vector.extract_strided_slice %372 {offsets = [0, 256], sizes = [8, 128], strides = [1, 1]} : vector<8x384xf32> to vector<8x128xf32>
    %378 = arith.negf %377 : vector<8x128xf32>
    %379 = math.exp %378 : vector<8x128xf32>
    %cst_194 = arith.constant 1.000000e+00 : f32
    %380 = vector.broadcast %cst_194 : f32 to vector<8x128xf32>
    %381 = arith.addf %380, %379 : vector<8x128xf32>
    %382 = arith.divf %380, %381 : vector<8x128xf32>
    %383 = arith.subf %376, %374 : vector<8x128xf32>
    %384 = arith.mulf %382, %383 : vector<8x128xf32>
    %385 = arith.addf %374, %384 : vector<8x128xf32>
    %c40_195 = arith.constant 40 : index
    %c0_196 = arith.constant 0 : index
    %386 = vector.load %arg12[%c40_195, %c0_196] : memref<64x128xf32, #tpu.memory_space<vmem>>, vector<8x128xf32>
    tpu.vector_store %arg12[%c40_195, %c0_196], %385 {strides = array<i32>} : memref<64x128xf32, #tpu.memory_space<vmem>>, vector<8x128xf32>,
    %c48_197 = arith.constant 48 : index
    %c0_198 = arith.constant 0 : index
    %387 = vector.load %arg11[%c48_197, %c0_198] : memref<64x128xf32, #tpu.memory_space<vmem>>, vector<8x128xf32>
    %c128_199 = arith.constant 128 : index
    %c0_200 = arith.constant 0 : index
    %388 = vector.load %arg5[%c128_199, %c0_200] : memref<256x128xf32, #tpu.memory_space<vmem>>, vector<128x128xf32>
    %cst_201 = arith.constant dense<0.000000e+00> : vector<8x128xf32>
    %389 = tpu.matmul %385, %388, %cst_201 {dimension_numbers = #tpu.dot_dimension_numbers<[1], [0], [0], [1], [0, 0, 1, 1], [], []>} : vector<8x128xf32>, vector<128x128xf32>, vector<8x128xf32> -> vector<8x128xf32>
    %390 = arith.addf %387, %389 : vector<8x128xf32>
    %cst_202 = arith.constant 6.660000e-01 : f32
    %391 = vector.broadcast %cst_202 : f32 to vector<8x128xf32>
    %392 = arith.mulf %391, %390 : vector<8x128xf32>
    %393 = math.tanh %392 : vector<8x128xf32>
    %cst_203 = arith.constant 1.715900e+00 : f32
    %394 = vector.broadcast %cst_203 : f32 to vector<8x128xf32>
    %395 = arith.mulf %394, %393 : vector<8x128xf32>
    %c0_204 = arith.constant 0 : index
    %c0_205 = arith.constant 0 : index
    %396 = vector.load %arg6[%c0_204, %c0_205] : memref<128x384xf32, #tpu.memory_space<vmem>>, vector<128x384xf32>
    %cst_206 = arith.constant dense<0.000000e+00> : vector<8x384xf32>
    %397 = tpu.matmul %395, %396, %cst_206 {dimension_numbers = #tpu.dot_dimension_numbers<[1], [0], [0], [1], [0, 0, 1, 1], [], []>} : vector<8x128xf32>, vector<128x384xf32>, vector<8x384xf32> -> vector<8x384xf32>
    %398 = arith.addf %397, %229 : vector<8x384xf32>
    %399 = vector.extract_strided_slice %398 {offsets = [0, 0], sizes = [8, 128], strides = [1, 1]} : vector<8x384xf32> to vector<8x128xf32>
    %400 = math.tanh %399 : vector<8x128xf32>
    %401 = vector.extract_strided_slice %398 {offsets = [0, 128], sizes = [8, 128], strides = [1, 1]} : vector<8x384xf32> to vector<8x128xf32>
    %402 = math.tanh %401 : vector<8x128xf32>
    %403 = vector.extract_strided_slice %398 {offsets = [0, 256], sizes = [8, 128], strides = [1, 1]} : vector<8x384xf32> to vector<8x128xf32>
    %404 = arith.negf %403 : vector<8x128xf32>
    %405 = math.exp %404 : vector<8x128xf32>
    %cst_207 = arith.constant 1.000000e+00 : f32
    %406 = vector.broadcast %cst_207 : f32 to vector<8x128xf32>
    %407 = arith.addf %406, %405 : vector<8x128xf32>
    %408 = arith.divf %406, %407 : vector<8x128xf32>
    %409 = arith.subf %402, %400 : vector<8x128xf32>
    %410 = arith.mulf %408, %409 : vector<8x128xf32>
    %411 = arith.addf %400, %410 : vector<8x128xf32>
    %c48_208 = arith.constant 48 : index
    %c0_209 = arith.constant 0 : index
    %412 = vector.load %arg12[%c48_208, %c0_209] : memref<64x128xf32, #tpu.memory_space<vmem>>, vector<8x128xf32>
    tpu.vector_store %arg12[%c48_208, %c0_209], %411 {strides = array<i32>} : memref<64x128xf32, #tpu.memory_space<vmem>>, vector<8x128xf32>,
    %c56_210 = arith.constant 56 : index
    %c0_211 = arith.constant 0 : index
    %413 = vector.load %arg11[%c56_210, %c0_211] : memref<64x128xf32, #tpu.memory_space<vmem>>, vector<8x128xf32>
    %c128_212 = arith.constant 128 : index
    %c0_213 = arith.constant 0 : index
    %414 = vector.load %arg5[%c128_212, %c0_213] : memref<256x128xf32, #tpu.memory_space<vmem>>, vector<128x128xf32>
    %cst_214 = arith.constant dense<0.000000e+00> : vector<8x128xf32>
    %415 = tpu.matmul %411, %414, %cst_214 {dimension_numbers = #tpu.dot_dimension_numbers<[1], [0], [0], [1], [0, 0, 1, 1], [], []>} : vector<8x128xf32>, vector<128x128xf32>, vector<8x128xf32> -> vector<8x128xf32>
    %416 = arith.addf %413, %415 : vector<8x128xf32>
    %cst_215 = arith.constant 6.660000e-01 : f32
    %417 = vector.broadcast %cst_215 : f32 to vector<8x128xf32>
    %418 = arith.mulf %417, %416 : vector<8x128xf32>
    %419 = math.tanh %418 : vector<8x128xf32>
    %cst_216 = arith.constant 1.715900e+00 : f32
    %420 = vector.broadcast %cst_216 : f32 to vector<8x128xf32>
    %421 = arith.mulf %420, %419 : vector<8x128xf32>
    %c0_217 = arith.constant 0 : index
    %c0_218 = arith.constant 0 : index
    %422 = vector.load %arg6[%c0_217, %c0_218] : memref<128x384xf32, #tpu.memory_space<vmem>>, vector<128x384xf32>
    %cst_219 = arith.constant dense<0.000000e+00> : vector<8x384xf32>
    %423 = tpu.matmul %421, %422, %cst_219 {dimension_numbers = #tpu.dot_dimension_numbers<[1], [0], [0], [1], [0, 0, 1, 1], [], []>} : vector<8x128xf32>, vector<128x384xf32>, vector<8x384xf32> -> vector<8x384xf32>
    %424 = arith.addf %423, %229 : vector<8x384xf32>
    %425 = vector.extract_strided_slice %424 {offsets = [0, 0], sizes = [8, 128], strides = [1, 1]} : vector<8x384xf32> to vector<8x128xf32>
    %426 = math.tanh %425 : vector<8x128xf32>
    %427 = vector.extract_strided_slice %424 {offsets = [0, 128], sizes = [8, 128], strides = [1, 1]} : vector<8x384xf32> to vector<8x128xf32>
    %428 = math.tanh %427 : vector<8x128xf32>
    %429 = vector.extract_strided_slice %424 {offsets = [0, 256], sizes = [8, 128], strides = [1, 1]} : vector<8x384xf32> to vector<8x128xf32>
    %430 = arith.negf %429 : vector<8x128xf32>
    %431 = math.exp %430 : vector<8x128xf32>
    %cst_220 = arith.constant 1.000000e+00 : f32
    %432 = vector.broadcast %cst_220 : f32 to vector<8x128xf32>
    %433 = arith.addf %432, %431 : vector<8x128xf32>
    %434 = arith.divf %432, %433 : vector<8x128xf32>
    %435 = arith.subf %428, %426 : vector<8x128xf32>
    %436 = arith.mulf %434, %435 : vector<8x128xf32>
    %437 = arith.addf %426, %436 : vector<8x128xf32>
    %c56_221 = arith.constant 56 : index
    %c0_222 = arith.constant 0 : index
    %438 = vector.load %arg12[%c56_221, %c0_222] : memref<64x128xf32, #tpu.memory_space<vmem>>, vector<8x128xf32>
    tpu.vector_store %arg12[%c56_221, %c0_222], %437 {strides = array<i32>} : memref<64x128xf32, #tpu.memory_space<vmem>>, vector<8x128xf32>,
    %c0_223 = arith.constant 0 : index
    %c0_224 = arith.constant 0 : index
    %439 = vector.load %arg12[%c0_223, %c0_224] : memref<64x128xf32, #tpu.memory_space<vmem>>, vector<64x128xf32>
    %c0_225 = arith.constant 0 : index
    %c0_226 = arith.constant 0 : index
    %440 = vector.load %arg8[%c0_225, %c0_226] : memref<128x7xf32, #tpu.memory_space<vmem>>, vector<128x7xf32>
    %cst_227 = arith.constant dense<0.000000e+00> : vector<64x7xf32>
    %441 = tpu.matmul %439, %440, %cst_227 {dimension_numbers = #tpu.dot_dimension_numbers<[1], [0], [0], [1], [0, 0, 1, 1], [], []>} : vector<64x128xf32>, vector<128x7xf32>, vector<64x7xf32> -> vector<64x7xf32>
    %c0_228 = arith.constant 0 : index
    %c0_229 = arith.constant 0 : index
    %442 = vector.load %arg9[%c0_228, %c0_229] : memref<1x7xf32, #tpu.memory_space<vmem>>, vector<1x7xf32>
    %443 = vector.broadcast %442 : vector<1x7xf32> to vector<64x7xf32>
    %444 = arith.addf %441, %443 : vector<64x7xf32>
    %c0_230 = arith.constant 0 : index
    %c0_231 = arith.constant 0 : index
    %c0_232 = arith.constant 0 : index
    %445 = vector.load %arg10[%c0_230, %c0_231, %c0_232] : memref<1x64x7xf32, #tpu.memory_space<vmem>>, vector<1x64x7xf32>
    %446 = vector.shape_cast %445 : vector<1x64x7xf32> to vector<64x7xf32>
    %447 = vector.shape_cast %444 : vector<64x7xf32> to vector<1x64x7xf32>
    tpu.vector_store %arg10[%c0_230, %c0_231, %c0_232], %447 {strides = array<i32>} : memref<1x64x7xf32, #tpu.memory_space<vmem>>, vector<1x64x7xf32>,
    return
  }
  func.func @transform_0(%arg0: i32) -> (i32, i32, i32) {
    %c0_i32 = arith.constant 0 : i32
    %c0_i32_0 = arith.constant 0 : i32
    %c0_i32_1 = arith.constant 0 : i32
    return %arg0, %c0_i32, %c0_i32_0 : i32, i32, i32
  }
  func.func @transform_1(%arg0: i32) -> (i32, i32) {
    %c0_i32 = arith.constant 0 : i32
    %c0_i32_0 = arith.constant 0 : i32
    %c0_i32_1 = arith.constant 0 : i32
    return %c0_i32, %c0_i32_0 : i32, i32
  }
  func.func @transform_2(%arg0: i32) -> (i32, i32) {
    %c0_i32 = arith.constant 0 : i32
    %c0_i32_0 = arith.constant 0 : i32
    %c0_i32_1 = arith.constant 0 : i32
    return %c0_i32, %c0_i32_0 : i32, i32
  }
  func.func @transform_3(%arg0: i32) -> (i32, i32) {
    %c0_i32 = arith.constant 0 : i32
    %c0_i32_0 = arith.constant 0 : i32
    %c0_i32_1 = arith.constant 0 : i32
    return %c0_i32, %c0_i32_0 : i32, i32
  }
  func.func @transform_4(%arg0: i32) -> (i32, i32) {
    %c0_i32 = arith.constant 0 : i32
    %c0_i32_0 = arith.constant 0 : i32
    %c0_i32_1 = arith.constant 0 : i32
    return %c0_i32, %c0_i32_0 : i32, i32
  }
  func.func @transform_5(%arg0: i32) -> (i32, i32) {
    %c0_i32 = arith.constant 0 : i32
    %c0_i32_0 = arith.constant 0 : i32
    %c0_i32_1 = arith.constant 0 : i32
    return %c0_i32, %c0_i32_0 : i32, i32
  }
  func.func @transform_6(%arg0: i32) -> (i32, i32) {
    %c0_i32 = arith.constant 0 : i32
    %c0_i32_0 = arith.constant 0 : i32
    %c0_i32_1 = arith.constant 0 : i32
    return %c0_i32, %c0_i32_0 : i32, i32
  }
  func.func @transform_7(%arg0: i32) -> (i32, i32) {
    %c0_i32 = arith.constant 0 : i32
    %c0_i32_0 = arith.constant 0 : i32
    %c0_i32_1 = arith.constant 0 : i32
    return %c0_i32, %c0_i32_0 : i32, i32
  }
  func.func @transform_8(%arg0: i32) -> (i32, i32) {
    %c0_i32 = arith.constant 0 : i32
    %c0_i32_0 = arith.constant 0 : i32
    %c0_i32_1 = arith.constant 0 : i32
    return %c0_i32, %c0_i32_0 : i32, i32
  }
  func.func @transform_9(%arg0: i32) -> (i32, i32, i32) {
    %c0_i32 = arith.constant 0 : i32
    %c0_i32_0 = arith.constant 0 : i32
    %c0_i32_1 = arith.constant 0 : i32
    return %arg0, %c0_i32, %c0_i32_0 : i32, i32, i32
  }
}

</mosaic_0001>

<bundles_post_ra>
// kernel: tpu_custom_call.1
= control target key start
LH: loop header
LB: loop body
LE: loop exit
PB: predicated region body
PF: predicated region fallthrough
CT: control target
= control target key end

     0   :  { %14 = vsyncpa [#allocation5], 0  ;;  %s10436_s0 = inlined_call_operand.vmem [shape: f32[1,64,16], index: 0, kind: input, shape index: {}]   ;;  %s10437_s1 = inlined_call_operand.vmem [shape: f32[144,128], index: 1, kind: input, shape index: {}]   ;;  %s10438_s2 = inlined_call_operand.hbm [shape: f32[128,384], index: 2, kind: input, shape index: {}]   ;;  %s10439_s3 = inlined_call_operand.vmem [shape: f32[1,512], index: 3, kind: input, shape index: {}]   ;;  %s10440_s4 = inlined_call_operand.hbm [shape: f32[256,128], index: 4, kind: input, shape index: {}]   ;;  %s10441_s5 = inlined_call_operand.hbm [shape: f32[128,384], index: 5, kind: input, shape index: {}]   ;;  %s10442_s6 = inlined_call_operand.vmem [shape: f32[1,512], index: 6, kind: input, shape index: {}]   ;;  %s10443_s7 = inlined_call_operand.vmem [shape: f32[128,7], index: 7, kind: input, shape index: {}]   ;;  %s10444_s8 = inlined_call_operand.vmem [shape: f32[1,7], index: 8, kind: input, shape index: {}]   ;;  %s10445_s9 = inlined_call_operand.vmem [shape: f32[1,64,7], index: 9, kind: output, shape index: {}]  }
   0x1   :  { %15 = vsyncpa [#allocation7], 0  ;;  %s8671_s30 = smov [#allocation6]   ;;  %s8601_s13 = scalar_lea.hbm %s10440_s4, 4096 }
   0x2   :  { %s39_s10 = sshll.u32 %s8671_s30, 4  ;;  %p8602_p0 = scmp.ne.s32.totalorder %s10440_s4, %s8601_s13  ;;  %s40_s10 = int_to_ptr.vmem [resolvable:$true] %s39_s10 }
   0x3   :  { %p8605_p1 = scmp.lt.u32.totalorder %s8601_s13, %s10440_s4 }
   0x5   :  { %p8607_p2 = pnand %p8605_p1, %p8602_p0 }
   0x7   :  { %8610 = shalt.err (!%p8607_p2)
}
   0x8   :  { %s8611_s18 = scalar_lea.vmem %s40_s10, 4096  ;;  %p8616_p4 = scmp.lt.s32.totalorder %s40_s10, %s40_s10 }
   0x9   :  { %p8612_p3 = scmp.ne.s32.totalorder %s40_s10, %s8611_s18  ;;  %p8617_p5 = scmp.lt.s32.totalorder %s8611_s18, %s8611_s18 }
   0xb   :  { %p8618_p6 = por %p8617_p5, %p8616_p4 }
   0xd   :  { %p8619_p7 = pnand %p8618_p6, %p8612_p3 }
   0xf   :  { %8622 = shalt.err (!%p8619_p7)
}
  0x10   :  { %s8672_s19 = smov 128   ;;  %s8673_s20 = smov 8  }
  0x11   :  { %45 = dma.hbm_to_vmem [thread:$0]  %s10440_s4, 4096, %s40_s10, [#allocation7], %s8672_s19, %s8672_s19, %s8673_s20  }
  0x12   :  { %s8674_s23 = smov [#allocation4]   ;;  %s8623_s27 = scalar_lea.hbm %s10438_s2, 6144 }
  0x13   :  { %s25_s24 = sshll.u32 %s8674_s23, 4  ;;  %p8624_p8 = scmp.ne.s32.totalorder %s10438_s2, %s8623_s27  ;;  %s26_s24 = int_to_ptr.vmem [resolvable:$true] %s25_s24 }
  0x14   :  { %p8627_p9 = scmp.lt.u32.totalorder %s8623_s27, %s10438_s2 }
  0x16   :  { %p8629_p10 = pnand %p8627_p9, %p8624_p8 }
  0x18   :  { %8632 = shalt.err (!%p8629_p10)
}
  0x19   :  { %s8633_s12 = scalar_lea.vmem %s26_s24, 6144  ;;  %p8638_p12 = scmp.lt.s32.totalorder %s26_s24, %s26_s24 }
  0x1a   :  { %p8634_p11 = scmp.ne.s32.totalorder %s26_s24, %s8633_s12  ;;  %p8639_p13 = scmp.lt.s32.totalorder %s8633_s12, %s8633_s12 }
  0x1c   :  { %p8640_p0 = por %p8639_p13, %p8638_p12 }
  0x1e   :  { %p8641_p1 = pnand %p8640_p0, %p8634_p11 }
  0x20   :  { %8644 = shalt.err (!%p8641_p1)
}
  0x21   :  { %s8675_s4 = smov 384   ;;  %s8676_s10 = smov 24  }
  0x22   :  { %31 = dma.hbm_to_vmem [thread:$0]  %s10438_s2, 6144, %s26_s24, [#allocation5], %s8675_s4, %s8675_s4, %s8676_s10  }
  0x23   :  { %s8677_s15 = smov [#allocation8]   ;;  %s8645_s19 = scalar_lea.hbm %s10441_s5, 6144 }
  0x24   :  { %s51_s16 = sshll.u32 %s8677_s15, 4  ;;  %p8646_p2 = scmp.ne.s32.totalorder %s10441_s5, %s8645_s19  ;;  %s52_s16 = int_to_ptr.vmem [resolvable:$true] %s51_s16 }
  0x25   :  { %p8649_p3 = scmp.lt.u32.totalorder %s8645_s19, %s10441_s5 }
  0x27   :  { %p8651_p4 = pnand %p8649_p3, %p8646_p2 }
  0x29   :  { %8654 = shalt.err (!%p8651_p4)
}
  0x2a   :  { %s8655_s25 = scalar_lea.vmem %s52_s16, 6144  ;;  %p8660_p6 = scmp.lt.s32.totalorder %s52_s16, %s52_s16 }
  0x2b   :  { %p8656_p5 = scmp.ne.s32.totalorder %s52_s16, %s8655_s25  ;;  %p8661_p7 = scmp.lt.s32.totalorder %s8655_s25, %s8655_s25 }
  0x2d   :  { %p8662_p8 = por %p8661_p7, %p8660_p6 }
  0x2f   :  { %p8663_p9 = pnand %p8662_p8, %p8656_p5 }
  0x31   :  { %8666 = shalt.err (!%p8663_p9)
}
  0x32   :  { %57 = dma.hbm_to_vmem [thread:$0]  %s10441_s5, 6144, %s52_s16, [#allocation7], %s8675_s4, %s8675_s4, %s8676_s10  }
  0x33   :  { %8667 = dma.done.wait [#allocation5], 6144  }
  0x34   :  { %8668 = vsyncadd [#allocation5], 4294961152 }
  0x35   :  { %8669 = dma.done.wait [#allocation7], 10240  }
  0x36   :  { %8670 = vsyncadd [#allocation7], 4294957056  ;;  %v8678_v0 = vmov 0.0   ;;  %vm90_vm0 = vcmask 130048   ;;  %v81_v1 = vld [vmem:[%s10437_s1] sm:$0xff]  ;;  %v82_v2 = vld [vmem:[%s10437_s1 + $0x8] sm:$0xff] }
  0x37   :  { %448 = vmatprep.mubr.f32.mxu0 %v8678_v0  ;;  %v73_v3 = vld [vmem:[%s10436_s0] sm:$0xff]  ;;  %v7082_v4 = vpack.c.bf16 %v82_v2, %v81_v1  ;;  %v246_v5 = vld [vmem:[%s10437_s1 + $0x10] sm:$0xff]  ;;  %v247_v6 = vld [vmem:[%s10437_s1 + $0x18] sm:$0xff]  ;;  %v8679_v9 = vmov 0.0|0.0   ;;  %vm8680_vm1 = vmmov 0   ;;  %vm5214_vm2 = vcmask 56320  }
  0x38   :  { %5862 = vmatprep.mubr.msk.f32.mxu1 %vm90_vm0, %v73_v3  ;;  %v74_v7 = vld [vmem:[%s10436_s0 + $0x8] sm:$0xff]  ;;  %v8787_v8 = vpack.c.bf16 %v247_v6, %v246_v5  ;;  %v248_v10 = vld [vmem:[%s10437_s1 + $0x20] sm:$0xff]  ;;  %v75_v12 = vld [vmem:[%s10436_s0 + $0x10] sm:$0xff] }
  0x39   :  { %7083 = vmatprep.subr.bf16.mxu1 %v7082_v4  ;;  %v249_v11 = vld [vmem:[%s10437_s1 + $0x28] sm:$0xff]  ;;  %v76_v14 = vld [vmem:[%s10436_s0 + $0x18] sm:$0xff]  ;;  %v250_v15 = vld [vmem:[%s10437_s1 + $0x30] sm:$0xff] }
  0x3a   :  { %7085 = vmatpush3.bf16.msra.mxu1 %v7082_v4  ;;  %v8801_v13 = vpack.c.bf16 %v249_v11, %v248_v10  ;;  %v251_v16 = vld [vmem:[%s10437_s1 + $0x38] sm:$0xff]  ;;  %v77_v17 = vld [vmem:[%s10436_s0 + $0x20] sm:$0xff]  ;;  %v78_v19 = vld [vmem:[%s10436_s0 + $0x28] sm:$0xff] }
  0x3b   :  { %7086 = vmatprep.subr.bf16.mxu1 %v8679_v9  ;;  %v8819_v18 = vpack.c.bf16 %v251_v16, %v250_v15  ;;  %v252_v20 = vld [vmem:[%s10437_s1 + $0x40] sm:$0xff]  ;;  %v253_v21 = vld [vmem:[%s10437_s1 + $0x48] sm:$0xff]  ;;  %v79_v22 = vld [vmem:[%s10436_s0 + $0x30] sm:$0xff] }
  0x3c   :  { %v8837_v23 = vpack.c.bf16 %v253_v21, %v252_v20  ;;  %v80_v24 = vld [vmem:[%s10436_s0 + $0x38] sm:$0xff]  ;;  %v254_v25 = vld [vmem:[%s10437_s1 + $0x50] sm:$0xff]  ;;  %v256_v28 = vld [vmem:[%s10437_s1 + $0x60] sm:$0xff] }
  0x3d   :  { %5863 = vmatmul.mubr.msk.f32.vlgmr.msra.gmra.mrb[0].mxu1 %vm90_vm0, %v74_v7  ;;  %v255_v26 = vld [vmem:[%s10437_s1 + $0x58] sm:$0xff]  ;;  %v257_v29 = vld [vmem:[%s10437_s1 + $0x68] sm:$0xff]  ;;  %v258_v31 = vld [vmem:[%s10437_s1 + $0x70] sm:$0xff] }
  0x3e   :  { %7088 = vmatpush3.bf16.msra.mxu1 %v8787_v8  ;;  %5865 = vmatprep.mubr.msk.f32.mxu1 %vm90_vm0, %v75_v12  ;;  %v8852_v27 = vpack.c.bf16 %v255_v26, %v254_v25  ;;  %v8864_v30 = vpack.c.bf16 %v257_v29, %v256_v28  ;;  %v259_v32 = vld [vmem:[%s10437_s1 + $0x78] sm:$0xff]  ;;  %v260_v34 = vld [vmem:[%s10437_s1 + $0x80] sm:$0xff]  ;;  %v261_v35 = vld [vmem:[%s10437_s1 + $0x88] sm:$0xff] }
  0x3f   :  { %7089 = vmatprep.subr.bf16.mxu1 %v8679_v9  ;;  %v8874_v33 = vpack.c.bf16 %v259_v32, %v258_v31  ;;  %v8884_v36 = vpack.c.bf16 %v261_v35, %v260_v34  ;;  %v337_v37 = vld [vmem:[#allocation4 + $0x8] sm:$0xff]  ;;  %v340_v38 = vld [vmem:[#allocation4 + $0x20] sm:$0xff]  ;;  %v339_v41 = vld [vmem:[#allocation4 + $0x18] sm:$0xff] }
  0x40   :  { %v8892_v39 = vpack.c.bf16 %v340_v38, %v337_v37  ;;  %v336_v40 = vld [vmem:[#allocation4] sm:$0xff]  ;;  %v338_v42 = vld [vmem:[#allocation4 + $0x10] sm:$0xff]  ;;  %v341_v44 = vld [vmem:[#allocation4 + $0x28] sm:$0xff] }
  0x41   :  { %5866 = vmatmul.mubr.msk.f32.gmra.mrb[2].mxu1 %vm90_vm0, %v76_v14  ;;  %v8895_v43 = vpack.c.bf16 %v339_v41, %v336_v40  ;;  %v343_v45 = vld [vmem:[#allocation4 + $0x38] sm:$0xff]  ;;  %v346_v46 = vld [vmem:[#allocation4 + $0x50] sm:$0xff]  ;;  %v8897_v47 = vpack.c.bf16 %v341_v44, %v338_v42  ;;  %v345_v50 = vld [vmem:[#allocation4 + $0x48] sm:$0xff] }
  0x42   :  { %7091 = vmatpush3.bf16.msra.mxu1 %v8801_v13  ;;  %5868 = vmatprep.mubr.msk.f32.mxu1 %vm90_vm0, %v77_v17  ;;  %v8899_v48 = vpack.c.bf16 %v346_v46, %v343_v45  ;;  %v342_v49 = vld [vmem:[#allocation4 + $0x30] sm:$0xff]  ;;  %v344_v51 = vld [vmem:[#allocation4 + $0x40] sm:$0xff]  ;;  %v347_v53 = vld [vmem:[#allocation4 + $0x58] sm:$0xff] }
  0x43   :  { %7092 = vmatprep.subr.bf16.mxu1 %v8679_v9  ;;  %7111 = vmatprep.subr.bf16.mxu0 %v8892_v39  ;;  %v8905_v52 = vpack.c.bf16 %v345_v50, %v342_v49  ;;  %v349_v54 = vld [vmem:[#allocation4 + $0x68] sm:$0xff]  ;;  %v352_v55 = vld [vmem:[#allocation4 + $0x80] sm:$0xff]  ;;  %v8907_v56 = vpack.c.bf16 %v347_v53, %v344_v51  ;;  %v351_v59 = vld [vmem:[#allocation4 + $0x78] sm:$0xff] }
  0x44   :  { %7113 = vmatpush1.bf16.msra.mxu0 %v8895_v43  ;;  %v8909_v57 = vpack.c.bf16 %v352_v55, %v349_v54  ;;  %v348_v58 = vld [vmem:[#allocation4 + $0x60] sm:$0xff]  ;;  %v350_v60 = vld [vmem:[#allocation4 + $0x70] sm:$0xff]  ;;  %v353_v62 = vld [vmem:[#allocation4 + $0x88] sm:$0xff] }
  0x45   :  { %5869 = vmatmul.mubr.msk.f32.gmra.mrb[4].mxu1 %vm90_vm0, %v78_v19  ;;  %7115 = vmatprep.subr.bf16.mxu0 %v8899_v48  ;;  %v8915_v61 = vpack.c.bf16 %v351_v59, %v348_v58  ;;  %v355_v63 = vld [vmem:[#allocation4 + $0x98] sm:$0xff]  ;;  %v358_v1 = vld [vmem:[#allocation4 + $0xb0] sm:$0xff]  ;;  %v8917_v2 = vpack.c.bf16 %v353_v62, %v350_v60  ;;  %v357_v5 = vld [vmem:[#allocation4 + $0xa8] sm:$0xff] }
  0x46   :  { %7094 = vmatpush3.bf16.msra.mxu1 %v8819_v18  ;;  %5871 = vmatprep.mubr.msk.f32.mxu1 %vm90_vm0, %v79_v22  ;;  %v8919_v3 = vpack.c.bf16 %v358_v1, %v355_v63  ;;  %v354_v4 = vld [vmem:[#allocation4 + $0x90] sm:$0xff]  ;;  %v356_v6 = vld [vmem:[#allocation4 + $0xa0] sm:$0xff]  ;;  %v359_v10 = vld [vmem:[#allocation4 + $0xb8] sm:$0xff] }
  0x47   :  { %7095 = vmatprep.subr.bf16.mxu1 %v8679_v9  ;;  %v8922_v7 = vpack.c.bf16 %v357_v5, %v354_v4  ;;  %v8926_v11 = vpack.c.bf16 %v359_v10, %v356_v6  ;;  %v361_v12 = vld [vmem:[#allocation4 + $0xc8] sm:$0xff]  ;;  %v364_v14 = vld [vmem:[#allocation4 + $0xe0] sm:$0xff]  ;;  %v363_v17 = vld [vmem:[#allocation4 + $0xd8] sm:$0xff] }
  0x48   :  { %7117 = vmatpush1.bf16.msra.mxu0 %v8905_v52  ;;  %v8932_v15 = vpack.c.bf16 %v364_v14, %v361_v12  ;;  %v360_v16 = vld [vmem:[#allocation4 + $0xc0] sm:$0xff]  ;;  %v362_v19 = vld [vmem:[#allocation4 + $0xd0] sm:$0xff]  ;;  %v365_v21 = vld [vmem:[#allocation4 + $0xe8] sm:$0xff] }
  0x49   :  { %5872 = vmatmul.mubr.msk.f32.gmra.mrb[6].mxu1 %vm90_vm0, %v80_v24  ;;  %7119 = vmatprep.subr.bf16.mxu0 %v8909_v57  ;;  %v8934_v20 = vpack.c.bf16 %v363_v17, %v360_v16  ;;  %v8937_v22 = vpack.c.bf16 %v365_v21, %v362_v19  ;;  %v367_v24 = vld [vmem:[#allocation4 + $0xf8] sm:$0xff]  ;;  %v370_v25 = vld [vmem:[#allocation4 + $0x110] sm:$0xff]  ;;  %v369_v29 = vld [vmem:[#allocation4 + $0x108] sm:$0xff] }
  0x4a   :  { %7097 = vmatpush3.bf16.msra.mxu1 %v8837_v23  ;;  %5906 = vmatprep.mubr.msk.f32.mxu1 %vm8680_vm1, %v8678_v0  ;;  %v8941_v26 = vpack.c.bf16 %v370_v25, %v367_v24  ;;  %v366_v28 = vld [vmem:[#allocation4 + $0xf0] sm:$0xff]  ;;  %v368_v31 = vld [vmem:[#allocation4 + $0x100] sm:$0xff]  ;;  %v371_v34 = vld [vmem:[#allocation4 + $0x118] sm:$0xff] }
  0x4b   :  { %7098 = vmatprep.subr.bf16.mxu1 %v8679_v9  ;;  %v8944_v32 = vpack.c.bf16 %v369_v29, %v366_v28  ;;  %v373_v35 = vld [vmem:[#allocation4 + $0x128] sm:$0xff]  ;;  %v376_v37 = vld [vmem:[#allocation4 + $0x140] sm:$0xff]  ;;  %v8947_v38 = vpack.c.bf16 %v371_v34, %v368_v31  ;;  %v375_v42 = vld [vmem:[#allocation4 + $0x138] sm:$0xff] }
  0x4c   :  { %7121 = vmatpush1.bf16.msra.mxu0 %v8915_v61  ;;  %v8949_v40 = vpack.c.bf16 %v376_v37, %v373_v35  ;;  %v372_v41 = vld [vmem:[#allocation4 + $0x120] sm:$0xff]  ;;  %v374_v44 = vld [vmem:[#allocation4 + $0x130] sm:$0xff]  ;;  %v377_v46 = vld [vmem:[#allocation4 + $0x148] sm:$0xff] }
  0x4d   :  { %7123 = vmatprep.subr.bf16.mxu0 %v8919_v3  ;;  %v8952_v45 = vpack.c.bf16 %v375_v42, %v372_v41  ;;  %v379_v49 = vld [vmem:[#allocation4 + $0x158] sm:$0xff]  ;;  %v382_v50 = vld [vmem:[#allocation4 + $0x170] sm:$0xff]  ;;  %v8956_v51 = vpack.c.bf16 %v377_v46, %v374_v44  ;;  %v381_v55 = vld [vmem:[#allocation4 + $0x168] sm:$0xff]  ;;  %v230_v46 = vlaneseq }
  0x4e   :  { %7100 = vmatpush3.bf16.msra.mxu1 %v8852_v27  ;;  %v8958_v53 = vpack.c.bf16 %v382_v50, %v379_v49  ;;  %v378_v54 = vld [vmem:[#allocation4 + $0x150] sm:$0xff]  ;;  %v380_v58 = vld [vmem:[#allocation4 + $0x160] sm:$0xff]  ;;  %v383_v59 = vld [vmem:[#allocation4 + $0x178] sm:$0xff] }
  0x4f   :  { %7101 = vmatprep.subr.bf16.mxu1 %v8679_v9  ;;  %v8962_v60 = vpack.c.bf16 %v381_v55, %v378_v54  ;;  %v8966_v62 = vpack.c.bf16 %v383_v59, %v380_v58  ;;  %v5229_v63 = vld [vmem:[%s10439_s3] ss:$0 sm:$0xff]  ;;  %v9025_v49 = vshrl.u32 %v230_v46, 7  ;;  %v228_v55 = vld [vmem:[%s10439_s3 + $0x1] sm:$0x7] }
  0x50   :  { %7125 = vmatpush1.bf16.msra.mxu0 %v8922_v7 }
  0x51   :  { %7127 = vmatprep.subr.bf16.mxu0 %v8932_v15  ;;  %v232_v50 = vsub.s32 0, %v9025_v49  ;;  %v240_v54 = vsub.s32 2, %v9025_v49  ;;  %v236_v58 = vsub.s32 1, %v9025_v49 }
  0x52   :  { %7103 = vmatpush3.bf16.msra.mxu1 %v8864_v30 }
  0x53   :  { %7104 = vmatprep.subr.bf16.mxu1 %v8679_v9  ;;  %v9035_v59 = vrot.slane %v228_v55, %v232_v50 }
  0x54   :  { %7129 = vmatpush1.bf16.msra.mxu0 %v8934_v20 }
  0x55   :  { %7131 = vmatprep.subr.bf16.mxu0 %v8941_v26 }
  0x56   :  { %7106 = vmatpush3.bf16.msra.mxu1 %v8874_v33 }
  0x57   :  { %7107 = vmatprep.subr.bf16.mxu1 %v8679_v9 }
  0x58   :  { %7133 = vmatpush1.bf16.msra.mxu0 %v8944_v32 }
  0x59   :  { %7135 = vmatprep.subr.bf16.mxu0 %v8949_v40 }
  0x5a   :  { %7109 = vmatpush3.bf16.msra.mxu1 %v8884_v36 }
  0x5b   :  { %7142 = vmatprep.subr.bf16.mxu1 %v8679_v9 }
  0x5c   :  { %7137 = vmatpush1.bf16.msra.mxu0 %v8952_v45 }
  0x5d   :  { %5907 = vmatmul.mubr.f32.vlgmr.msra.gmra.mrb[8].mxu1 %v8678_v0  ;;  %7139 = vmatprep.subr.bf16.mxu0 %v8958_v53 }
  0x5e   :  { %5941 = vmatprep.mubr.msk.f32.mxu1 %vm8680_vm1, %v8678_v0  ;;  %7144 = vmatpush3.bf16.msra.mxu1 %v8897_v47 }
  0x5f   :  { %7145 = vmatprep.subr.bf16.mxu1 %v8679_v9 }
  0x60   :  { %7141 = vmatpush1.bf16.msra.mxu0 %v8962_v60 }
  0x61   :  { %7166 = vmatprep.subr.bf16.mxu0 %v8679_v9 }
  0x62   :  { %7147 = vmatpush3.bf16.msra.mxu1 %v8907_v56 }
  0x63   :  { %7148 = vmatprep.subr.bf16.mxu1 %v8679_v9 }
  0x66   :  { %7150 = vmatpush3.bf16.msra.mxu1 %v8917_v2 }
  0x67   :  { %7151 = vmatprep.subr.bf16.mxu1 %v8679_v9 }
  0x6a   :  { %7153 = vmatpush3.bf16.msra.mxu1 %v8926_v11 }
  0x6b   :  { %7154 = vmatprep.subr.bf16.mxu1 %v8679_v9 }
  0x6e   :  { %7156 = vmatpush3.bf16.msra.mxu1 %v8937_v22 }
  0x6f   :  { %7157 = vmatprep.subr.bf16.mxu1 %v8679_v9 }
  0x72   :  { %7159 = vmatpush3.bf16.msra.mxu1 %v8947_v38 }
  0x73   :  { %7160 = vmatprep.subr.bf16.mxu1 %v8679_v9 }
  0x76   :  { %7162 = vmatpush3.bf16.msra.mxu1 %v8956_v51 }
  0x77   :  { %7163 = vmatprep.subr.bf16.mxu1 %v8679_v9 }
  0x7a   :  { %7165 = vmatpush3.bf16.msra.mxu1 %v8966_v62 }
  0x7b   :  { %7191 = vmatprep.subr.bf16.mxu1 %v8892_v39 }
 0x110   :  { %v5864_v1 = vpop.f32.mrb[0].mxu1 }
 0x111   :  { %v8976_v4 = vadd.f32 %v5864_v1, %v5229_v63  ;;  %v181_v5 = vpop.f32.mrb[1].mxu1  ;;  %v9043_v1 = vrot.slane %v228_v55, %v236_v58 }
 0x112   :  { %v182_v31 = vadd.f32 %v5229_v63, %v181_v5 }
 0x114   :  { %v5867_v6 = vpop.f32.mrb[2].mxu1 }
 0x115   :  { %v8978_v10 = vadd.f32 %v5867_v6, %v5229_v63  ;;  %v191_v12 = vpop.f32.mrb[3].mxu1 }
 0x116   :  { %v8980_v14 = vadd.f32 %v5229_v63, %v191_v12 }
 0x118   :  { %v5870_v16 = vpop.f32.mrb[4].mxu1 }
 0x119   :  { %v8982_v17 = vadd.f32 %v5870_v16, %v5229_v63  ;;  %v201_v19 = vpop.f32.mrb[5].mxu1 }
 0x11a   :  { %v8984_v21 = vadd.f32 %v5229_v63, %v201_v19 }
 0x11c   :  { %v5873_v24 = vpop.f32.mrb[6].mxu1 }
 0x11d   :  { %v8986_v25 = vadd.f32 %v5873_v24, %v5229_v63  ;;  %v211_v28 = vpop.f32.mrb[7].mxu1 }
 0x11e   :  { %v8988_v29 = vadd.f32 %v5229_v63, %v211_v28  ;;  %v9039_v63 = vrot.slane %v228_v55, %v240_v54 }
 0x130   :  { %v328_v34 = vpop.f32.mrb[8].mxu1 }
 0x131   :  { %v332_v35 = vadd.f32 %v328_v34, %v182_v31  ;;  %v5908_v37 = vpop.f32.mrb[9].mxu1 }
 0x133   :  { %v333_v41 = vmul.f32 0.666, %v332_v35 }
 0x135   :  { %8440 = vtanh.f32 %v333_v41 }
 0x13f   :  { %v8441_v42 = vpop.eup %8440 }
 0x140   :  { %v335_v44 = vmul.f32 1.7159, %v8441_v42 }
 0x142   :  { %449 = vmatmul.mubr.f32.vlgmr.msra.gmra.mrb[0].mxu0 %v335_v44  ;;  %5942 = vmatmul.mubr.f32.vlgmr.msra.gmra.mrb[10].mxu1 %v335_v44 }
 0x143   :  { %7168 = vmatpush3.bf16.msra.mxu0 %v8787_v8  ;;  %5976 = vmatprep.mubr.msk.f32.mxu0 %vm8680_vm1, %v8678_v0 }
 0x144   :  { %7169 = vmatprep.subr.bf16.mxu0 %v8679_v9  ;;  %7193 = vmatpush1.bf16.msra.mxu1 %v8895_v43 }
 0x145   :  { %7195 = vmatprep.subr.bf16.mxu1 %v8899_v48  ;;  %740 = vmatprep.mubr.f32.mxu1 %v8678_v0 }
 0x147   :  { %7171 = vmatpush3.bf16.msra.mxu0 %v8801_v13 }
 0x148   :  { %7172 = vmatprep.subr.bf16.mxu0 %v8679_v9  ;;  %7197 = vmatpush1.bf16.msra.mxu1 %v8905_v52 }
 0x149   :  { %7199 = vmatprep.subr.bf16.mxu1 %v8909_v57 }
 0x14b   :  { %7174 = vmatpush3.bf16.msra.mxu0 %v8819_v18 }
 0x14c   :  { %7175 = vmatprep.subr.bf16.mxu0 %v8679_v9  ;;  %7201 = vmatpush1.bf16.msra.mxu1 %v8915_v61 }
 0x14d   :  { %7203 = vmatprep.subr.bf16.mxu1 %v8919_v3 }
 0x14f   :  { %7177 = vmatpush3.bf16.msra.mxu0 %v8837_v23 }
 0x150   :  { %7178 = vmatprep.subr.bf16.mxu0 %v8679_v9  ;;  %7205 = vmatpush1.bf16.msra.mxu1 %v8922_v7 }
 0x151   :  { %7207 = vmatprep.subr.bf16.mxu1 %v8932_v15 }
 0x153   :  { %7180 = vmatpush3.bf16.msra.mxu0 %v8852_v27 }
 0x154   :  { %7181 = vmatprep.subr.bf16.mxu0 %v8679_v9  ;;  %7209 = vmatpush1.bf16.msra.mxu1 %v8934_v20 }
 0x155   :  { %7211 = vmatprep.subr.bf16.mxu1 %v8941_v26 }
 0x157   :  { %7183 = vmatpush3.bf16.msra.mxu0 %v8864_v30 }
 0x158   :  { %7184 = vmatprep.subr.bf16.mxu0 %v8679_v9  ;;  %7213 = vmatpush1.bf16.msra.mxu1 %v8944_v32 }
 0x159   :  { %7215 = vmatprep.subr.bf16.mxu1 %v8949_v40 }
 0x15b   :  { %7186 = vmatpush3.bf16.msra.mxu0 %v8874_v33 }
 0x15c   :  { %7187 = vmatprep.subr.bf16.mxu0 %v8679_v9  ;;  %7217 = vmatpush1.bf16.msra.mxu1 %v8952_v45 }
 0x15d   :  { %7219 = vmatprep.subr.bf16.mxu1 %v8958_v53 }
 0x15f   :  { %7189 = vmatpush3.bf16.msra.mxu0 %v8884_v36 }
 0x160   :  { %7222 = vmatprep.subr.bf16.mxu0 %v8679_v9  ;;  %7221 = vmatpush1.bf16.msra.mxu1 %v8962_v60 }
 0x161   :  { %7246 = vmatprep.subr.bf16.mxu1 %v8679_v9 }
 0x215   :  { %v450_v5 = vpop.f32.mrb[0].mxu0  ;;  %v521_v6 = vpop.f32.mrb[10].mxu1 }
 0x216   :  { %v451_v12 = vadd.f32 %v450_v5, %v9035_v59  ;;  %v522_v16 = vadd.f32 %v521_v6, %v9039_v63  ;;  %v452_v19 = vpop.f32.mrb[1].mxu0  ;;  %v5943_v24 = vpop.f32.mrb[11].mxu1 }
 0x217   :  { %v453_v28 = vadd.f32 %v452_v19, %v9043_v1 }
 0x218   :  { %8442 = vtanh.f32 %v451_v12  ;;  %v5238_v31 = vmul.f32 -1.442695, %v522_v16 }
 0x219   :  { %8444 = vtanh.f32 %v453_v28  ;;  %v1130_v28 = vld [vmem:[%s10437_s1 + $0x50] sm:$0xff] }
 0x21a   :  { %8446 = vpow2.f32 %v5238_v31  ;;  %v1131_v31 = vld [vmem:[%s10437_s1 + $0x58] sm:$0xff] }
 0x222   :  { %v8443_v34 = vpop.eup %8442 }
 0x223   :  { %v8445_v35 = vpop.eup %8444 }
 0x224   :  { %v8447_v37 = vpop.eup %8446  ;;  %v533_v41 = vsub.f32 %v8445_v35, %v8443_v34  ;;  %v1132_v35 = vld [vmem:[%s10437_s1 + $0x60] sm:$0xff] }
 0x225   :  { %v530_v42 = vadd.f32 1.0, %v8447_v37  ;;  %v1133_v37 = vld [vmem:[%s10437_s1 + $0x68] sm:$0xff] }
 0x227   :  { %8448 = vrcp.f32 %v530_v42  ;;  %v1134_v42 = vld [vmem:[%s10437_s1 + $0x70] sm:$0xff] }
 0x231   :  { %v8449_v44 = vpop.eup %8448 }
 0x232   :  { %v534_v46 = vmul.f32 %v8449_v44, %v533_v41  ;;  %v9188_v41 = vpack.c.bf16 %v1133_v37, %v1132_v35  ;;  %v1135_v44 = vld [vmem:[%s10437_s1 + $0x78] sm:$0xff] }
 0x234   :  { %v9048_v55 = vadd.f32 %v8443_v34, %v534_v46  ;;  %v9178_v34 = vpack.c.bf16 %v1131_v31, %v1130_v28  ;;  %v9197_v46 = vpack.c.bf16 %v1135_v44, %v1134_v42  ;;  %v1214_v44 = vld [vmem:[#allocation4 + $0x10] sm:$0xff] }
 0x236   :  { %5977 = vmatmul.mubr.f32.vlgmr.msra.gmra.mrb[2].mxu0 %v9048_v55 }
 0x237   :  { %7224 = vmatpush3.bf16.msra.mxu0 %v8897_v47  ;;  %6011 = vmatprep.mubr.msk.f32.mxu0 %vm8680_vm1, %v8678_v0 }
 0x238   :  { %7225 = vmatprep.subr.bf16.mxu0 %v8679_v9 }
 0x23b   :  { %7227 = vmatpush3.bf16.msra.mxu0 %v8907_v56 }
 0x23c   :  { %7228 = vmatprep.subr.bf16.mxu0 %v8679_v9 }
 0x23f   :  { %7230 = vmatpush3.bf16.msra.mxu0 %v8917_v2 }
 0x240   :  { %7231 = vmatprep.subr.bf16.mxu0 %v8679_v9 }
 0x243   :  { %7233 = vmatpush3.bf16.msra.mxu0 %v8926_v11 }
 0x244   :  { %7234 = vmatprep.subr.bf16.mxu0 %v8679_v9 }
 0x247   :  { %7236 = vmatpush3.bf16.msra.mxu0 %v8937_v22 }
 0x248   :  { %7237 = vmatprep.subr.bf16.mxu0 %v8679_v9 }
 0x24b   :  { %7239 = vmatpush3.bf16.msra.mxu0 %v8947_v38 }
 0x24c   :  { %7240 = vmatprep.subr.bf16.mxu0 %v8679_v9 }
 0x24f   :  { %7242 = vmatpush3.bf16.msra.mxu0 %v8956_v51 }
 0x250   :  { %7243 = vmatprep.subr.bf16.mxu0 %v8679_v9 }
 0x253   :  { %7245 = vmatpush3.bf16.msra.mxu0 %v8966_v62 }
 0x254   :  { %7271 = vmatprep.subr.bf16.mxu0 %v8892_v39 }
 0x309   :  { %v620_v5 = vpop.f32.mrb[2].mxu0 }
 0x30a   :  { %v624_v6 = vadd.f32 %v620_v5, %v8976_v4  ;;  %v5978_v12 = vpop.f32.mrb[3].mxu0  ;;  %v1129_v4 = vld [vmem:[%s10437_s1 + $0x48] sm:$0xff]  ;;  %v1136_v5 = vld [vmem:[%s10437_s1 + $0x80] sm:$0xff] }
 0x30c   :  { %v625_v16 = vmul.f32 0.666, %v624_v6  ;;  %v1137_v6 = vld [vmem:[%s10437_s1 + $0x88] sm:$0xff] }
 0x30d   :  { %v9207_v12 = vpack.c.bf16 %v1137_v6, %v1136_v5  ;;  %v1217_v5 = vld [vmem:[#allocation4 + $0x28] sm:$0xff] }
 0x30e   :  { %8450 = vtanh.f32 %v625_v16  ;;  %v1213_v16 = vld [vmem:[#allocation4 + $0x8] sm:$0xff] }
 0x318   :  { %v8451_v19 = vpop.eup %8450 }
 0x319   :  { %v627_v24 = vmul.f32 1.7159, %v8451_v19  ;;  %v1216_v19 = vld [vmem:[#allocation4 + $0x20] sm:$0xff] }
 0x31b   :  { %741 = vmatmul.mubr.f32.vlgmr.msra.gmra.mrb[12].mxu1 %v627_v24  ;;  %6012 = vmatmul.mubr.f32.vlgmr.msra.gmra.mrb[4].mxu0 %v627_v24  ;;  %v1212_v24 = vld [vmem:[#allocation4] sm:$0xff] }
 0x31c   :  { %7248 = vmatpush3.bf16.msra.mxu1 %v8787_v8  ;;  %6046 = vmatprep.mubr.msk.f32.mxu1 %vm8680_vm1, %v8678_v0 }
 0x31d   :  { %7249 = vmatprep.subr.bf16.mxu1 %v8679_v9  ;;  %7273 = vmatpush1.bf16.msra.mxu0 %v8895_v43 }
 0x31e   :  { %7275 = vmatprep.subr.bf16.mxu0 %v8899_v48  ;;  %1032 = vmatprep.mubr.f32.mxu0 %v8678_v0 }
 0x320   :  { %7251 = vmatpush3.bf16.msra.mxu1 %v8801_v13 }
 0x321   :  { %7252 = vmatprep.subr.bf16.mxu1 %v8679_v9  ;;  %7277 = vmatpush1.bf16.msra.mxu0 %v8905_v52 }
 0x322   :  { %7279 = vmatprep.subr.bf16.mxu0 %v8909_v57 }
 0x324   :  { %7254 = vmatpush3.bf16.msra.mxu1 %v8819_v18 }
 0x325   :  { %7255 = vmatprep.subr.bf16.mxu1 %v8679_v9  ;;  %7281 = vmatpush1.bf16.msra.mxu0 %v8915_v61 }
 0x326   :  { %7283 = vmatprep.subr.bf16.mxu0 %v8919_v3 }
 0x328   :  { %7257 = vmatpush3.bf16.msra.mxu1 %v8837_v23 }
 0x329   :  { %7258 = vmatprep.subr.bf16.mxu1 %v8679_v9  ;;  %7285 = vmatpush1.bf16.msra.mxu0 %v8922_v7 }
 0x32a   :  { %7287 = vmatprep.subr.bf16.mxu0 %v8932_v15 }
 0x32c   :  { %7260 = vmatpush3.bf16.msra.mxu1 %v8852_v27 }
 0x32d   :  { %7261 = vmatprep.subr.bf16.mxu1 %v8679_v9  ;;  %7289 = vmatpush1.bf16.msra.mxu0 %v8934_v20 }
 0x32e   :  { %7291 = vmatprep.subr.bf16.mxu0 %v8941_v26  ;;  %v1123_v26 = vld [vmem:[%s10437_s1 + $0x18] sm:$0xff] }
 0x330   :  { %7263 = vmatpush3.bf16.msra.mxu1 %v8864_v30 }
 0x331   :  { %7264 = vmatprep.subr.bf16.mxu1 %v8679_v9  ;;  %7293 = vmatpush1.bf16.msra.mxu0 %v8944_v32 }
 0x332   :  { %7295 = vmatprep.subr.bf16.mxu0 %v8949_v40  ;;  %v1125_v40 = vld [vmem:[%s10437_s1 + $0x28] sm:$0xff] }
 0x334   :  { %7266 = vmatpush3.bf16.msra.mxu1 %v8874_v33 }
 0x335   :  { %7267 = vmatprep.subr.bf16.mxu1 %v8679_v9  ;;  %7297 = vmatpush1.bf16.msra.mxu0 %v8952_v45 }
 0x336   :  { %7299 = vmatprep.subr.bf16.mxu0 %v8958_v53  ;;  %v1127_v53 = vld [vmem:[%s10437_s1 + $0x38] sm:$0xff] }
 0x338   :  { %7269 = vmatpush3.bf16.msra.mxu1 %v8884_v36 }
 0x339   :  { %7302 = vmatprep.subr.bf16.mxu1 %v8679_v9  ;;  %7301 = vmatpush1.bf16.msra.mxu0 %v8962_v60 }
 0x33a   :  { %7326 = vmatprep.subr.bf16.mxu0 %v8679_v9 }
 0x3ee   :  { %v742_v8 = vpop.f32.mrb[12].mxu1  ;;  %v813_v13 = vpop.f32.mrb[4].mxu0 }
 0x3ef   :  { %v743_v18 = vadd.f32 %v742_v8, %v9035_v59  ;;  %v814_v23 = vadd.f32 %v813_v13, %v9039_v63  ;;  %v744_v27 = vpop.f32.mrb[13].mxu1  ;;  %v6013_v30 = vpop.f32.mrb[5].mxu0  ;;  %v9212_v8 = vpack.c.bf16 %v1216_v19, %v1213_v16  ;;  %v1215_v13 = vld [vmem:[#allocation4 + $0x18] sm:$0xff]  ;;  %v9239_v19 = vpack.c.bf16 %v1217_v5, %v1214_v44  ;;  %v1249_v5 = vld [vmem:[#allocation4 + $0x128] sm:$0xff] }
 0x3f0   :  { %v745_v33 = vadd.f32 %v744_v27, %v9043_v1  ;;  %v1222_v27 = vld [vmem:[#allocation4 + $0x50] sm:$0xff] }
 0x3f1   :  { %8452 = vtanh.f32 %v743_v18  ;;  %v5239_v39 = vmul.f32 -1.442695, %v814_v23  ;;  %v9214_v18 = vpack.c.bf16 %v1215_v13, %v1212_v24  ;;  %v1219_v23 = vld [vmem:[#allocation4 + $0x38] sm:$0xff]  ;;  %v1218_v30 = vld [vmem:[#allocation4 + $0x30] sm:$0xff]  ;;  %v1220_v13 = vld [vmem:[#allocation4 + $0x40] sm:$0xff] }
 0x3f2   :  { %8454 = vtanh.f32 %v745_v33  ;;  %v9217_v33 = vpack.c.bf16 %v1222_v27, %v1219_v23  ;;  %v1223_v23 = vld [vmem:[#allocation4 + $0x58] sm:$0xff] }
 0x3f3   :  { %8456 = vpow2.f32 %v5239_v39  ;;  %v1221_v39 = vld [vmem:[#allocation4 + $0x48] sm:$0xff]  ;;  %v9245_v27 = vpack.c.bf16 %v1223_v23, %v1220_v13  ;;  %v1248_v13 = vld [vmem:[#allocation4 + $0x120] sm:$0xff]  ;;  %v1251_v23 = vld [vmem:[#allocation4 + $0x138] sm:$0xff] }
 0x3fb   :  { %v8453_v36 = vpop.eup %8452 }
 0x3fc   :  { %v8455_v43 = vpop.eup %8454 }
 0x3fd   :  { %v8457_v48 = vpop.eup %8456  ;;  %v825_v52 = vsub.f32 %v8455_v43, %v8453_v36  ;;  %v1225_v43 = vld [vmem:[#allocation4 + $0x68] sm:$0xff] }
 0x3fe   :  { %v822_v57 = vadd.f32 1.0, %v8457_v48  ;;  %v1228_v48 = vld [vmem:[#allocation4 + $0x80] sm:$0xff] }
 0x400   :  { %8458 = vrcp.f32 %v822_v57  ;;  %v1224_v57 = vld [vmem:[#allocation4 + $0x60] sm:$0xff] }
 0x40a   :  { %v8459_v61 = vpop.eup %8458 }
 0x40b   :  { %v826_v3 = vmul.f32 %v8459_v61, %v825_v52  ;;  %v9223_v52 = vpack.c.bf16 %v1228_v48, %v1225_v43  ;;  %v1227_v61 = vld [vmem:[#allocation4 + $0x78] sm:$0xff]  ;;  %v1232_v48 = vld [vmem:[#allocation4 + $0xa0] sm:$0xff] }
 0x40d   :  { %v9108_v7 = vadd.f32 %v8453_v36, %v826_v3  ;;  %v9220_v36 = vpack.c.bf16 %v1221_v39, %v1218_v30  ;;  %v9226_v3 = vpack.c.bf16 %v1227_v61, %v1224_v57  ;;  %v1226_v30 = vld [vmem:[#allocation4 + $0x70] sm:$0xff]  ;;  %v1229_v39 = vld [vmem:[#allocation4 + $0x88] sm:$0xff]  ;;  %v1235_v57 = vld [vmem:[#allocation4 + $0xb8] sm:$0xff] }
 0x40e   :  { %v9251_v43 = vpack.c.bf16 %v1229_v39, %v1226_v30  ;;  %v9255_v61 = vpack.c.bf16 %v1235_v57, %v1232_v48  ;;  %v1250_v30 = vld [vmem:[#allocation4 + $0x130] sm:$0xff]  ;;  %v9282_v39 = vpack.c.bf16 %v1251_v23, %v1248_v13  ;;  %v1253_v48 = vld [vmem:[#allocation4 + $0x148] sm:$0xff] }
 0x40f   :  { %6047 = vmatmul.mubr.f32.vlgmr.msra.gmra.mrb[14].mxu1 %v9108_v7  ;;  %v9285_v57 = vpack.c.bf16 %v1253_v48, %v1250_v30 }
 0x410   :  { %7304 = vmatpush3.bf16.msra.mxu1 %v8897_v47  ;;  %6081 = vmatprep.mubr.msk.f32.mxu1 %vm8680_vm1, %v8678_v0 }
 0x411   :  { %7305 = vmatprep.subr.bf16.mxu1 %v8679_v9 }
 0x414   :  { %7307 = vmatpush3.bf16.msra.mxu1 %v8907_v56 }
 0x415   :  { %7308 = vmatprep.subr.bf16.mxu1 %v8679_v9 }
 0x418   :  { %7310 = vmatpush3.bf16.msra.mxu1 %v8917_v2 }
 0x419   :  { %7311 = vmatprep.subr.bf16.mxu1 %v8679_v9 }
 0x41c   :  { %7313 = vmatpush3.bf16.msra.mxu1 %v8926_v11 }
 0x41d   :  { %7314 = vmatprep.subr.bf16.mxu1 %v8679_v9 }
 0x420   :  { %7316 = vmatpush3.bf16.msra.mxu1 %v8937_v22  ;;  %v1122_v22 = vld [vmem:[%s10437_s1 + $0x10] sm:$0xff] }
 0x421   :  { %7317 = vmatprep.subr.bf16.mxu1 %v8679_v9  ;;  %v9138_v32 = vpack.c.bf16 %v1123_v26, %v1122_v22 }
 0x424   :  { %7319 = vmatpush3.bf16.msra.mxu1 %v8947_v38  ;;  %v1124_v38 = vld [vmem:[%s10437_s1 + $0x20] sm:$0xff] }
 0x425   :  { %7320 = vmatprep.subr.bf16.mxu1 %v8679_v9  ;;  %v9148_v45 = vpack.c.bf16 %v1125_v40, %v1124_v38 }
 0x428   :  { %7322 = vmatpush3.bf16.msra.mxu1 %v8956_v51  ;;  %v1126_v51 = vld [vmem:[%s10437_s1 + $0x30] sm:$0xff] }
 0x429   :  { %7323 = vmatprep.subr.bf16.mxu1 %v8679_v9  ;;  %v9158_v60 = vpack.c.bf16 %v1127_v53, %v1126_v51 }
 0x42c   :  { %7325 = vmatpush3.bf16.msra.mxu1 %v8966_v62  ;;  %v1128_v62 = vld [vmem:[%s10437_s1 + $0x40] sm:$0xff] }
 0x42d   :  { %7351 = vmatprep.subr.bf16.mxu1 %v9212_v8 }
 0x4e2   :  { %v912_v47 = vpop.f32.mrb[14].mxu1 }
 0x4e3   :  { %v916_v56 = vadd.f32 %v912_v47, %v8980_v14  ;;  %v6048_v2 = vpop.f32.mrb[15].mxu1  ;;  %v9168_v14 = vpack.c.bf16 %v1129_v4, %v1128_v62  ;;  %v1231_v47 = vld [vmem:[#allocation4 + $0x98] sm:$0xff] }
 0x4e5   :  { %v917_v11 = vmul.f32 0.666, %v916_v56  ;;  %v1234_v56 = vld [vmem:[#allocation4 + $0xb0] sm:$0xff] }
 0x4e6   :  { %v9229_v2 = vpack.c.bf16 %v1234_v56, %v1231_v47  ;;  %v1237_v47 = vld [vmem:[#allocation4 + $0xc8] sm:$0xff]  ;;  %v1240_v56 = vld [vmem:[#allocation4 + $0xe0] sm:$0xff] }
 0x4e7   :  { %8460 = vtanh.f32 %v917_v11  ;;  %v1230_v11 = vld [vmem:[#allocation4 + $0x90] sm:$0xff] }
 0x4f1   :  { %v8461_v15 = vpop.eup %8460 }
 0x4f2   :  { %v919_v20 = vmul.f32 1.7159, %v8461_v15  ;;  %v1233_v15 = vld [vmem:[#allocation4 + $0xa8] sm:$0xff] }
 0x4f4   :  { %1033 = vmatmul.mubr.f32.vlgmr.msra.gmra.mrb[6].mxu0 %v919_v20  ;;  %6082 = vmatmul.mubr.f32.vlgmr.msra.gmra.mrb[16].mxu1 %v919_v20  ;;  %v9232_v20 = vpack.c.bf16 %v1233_v15, %v1230_v11  ;;  %v9260_v11 = vpack.c.bf16 %v1240_v56, %v1237_v47  ;;  %v1236_v15 = vld [vmem:[#allocation4 + $0xc0] sm:$0xff]  ;;  %v1255_v47 = vld [vmem:[#allocation4 + $0x158] sm:$0xff]  ;;  %v1258_v56 = vld [vmem:[#allocation4 + $0x170] sm:$0xff] }
 0x4f5   :  { %6116 = vmatprep.mubr.msk.f32.mxu0 %vm8680_vm1, %v8678_v0  ;;  %1324 = vmatprep.mubr.f32.mxu1 %v8678_v0 }
 0x4f6   :  { %7328 = vmatpush3.bf16.msra.mxu0 %v9138_v32  ;;  %7353 = vmatpush1.bf16.msra.mxu1 %v9214_v18 }
 0x4f7   :  { %7329 = vmatprep.subr.bf16.mxu0 %v8679_v9  ;;  %7355 = vmatprep.subr.bf16.mxu1 %v9217_v33 }
 0x4fa   :  { %7331 = vmatpush3.bf16.msra.mxu0 %v9148_v45  ;;  %7357 = vmatpush1.bf16.msra.mxu1 %v9220_v36 }
 0x4fb   :  { %7332 = vmatprep.subr.bf16.mxu0 %v8679_v9  ;;  %7359 = vmatprep.subr.bf16.mxu1 %v9223_v52 }
 0x4fe   :  { %7334 = vmatpush3.bf16.msra.mxu0 %v9158_v60  ;;  %7361 = vmatpush1.bf16.msra.mxu1 %v9226_v3 }
 0x4ff   :  { %7335 = vmatprep.subr.bf16.mxu0 %v8679_v9  ;;  %7363 = vmatprep.subr.bf16.mxu1 %v9229_v2 }
 0x502   :  { %7337 = vmatpush3.bf16.msra.mxu0 %v9168_v14  ;;  %7365 = vmatpush1.bf16.msra.mxu1 %v9232_v20 }
 0x503   :  { %7338 = vmatprep.subr.bf16.mxu0 %v8679_v9  ;;  %7367 = vmatprep.subr.bf16.mxu1 %v9260_v11 }
 0x506   :  { %7340 = vmatpush3.bf16.msra.mxu0 %v9178_v34 }
 0x507   :  { %7341 = vmatprep.subr.bf16.mxu0 %v8679_v9 }
 0x50a   :  { %7343 = vmatpush3.bf16.msra.mxu0 %v9188_v41 }
 0x50b   :  { %7344 = vmatprep.subr.bf16.mxu0 %v8679_v9 }
 0x50e   :  { %7346 = vmatpush3.bf16.msra.mxu0 %v9197_v46 }
 0x50f   :  { %7347 = vmatprep.subr.bf16.mxu0 %v8679_v9 }
 0x512   :  { %7349 = vmatpush3.bf16.msra.mxu0 %v9207_v12 }
 0x513   :  { %7382 = vmatprep.subr.bf16.mxu0 %v8679_v9 }
 0x5c7   :  { %v1034_v22 = vpop.f32.mrb[6].mxu0  ;;  %v1105_v26 = vpop.f32.mrb[16].mxu1 }
 0x5c8   :  { %v1035_v38 = vadd.f32 %v1034_v22, %v9035_v59  ;;  %v1106_v40 = vadd.f32 %v1105_v26, %v9039_v63  ;;  %v1036_v51 = vpop.f32.mrb[7].mxu0  ;;  %v6083_v53 = vpop.f32.mrb[17].mxu1  ;;  %v1239_v22 = vld [vmem:[#allocation4 + $0xd8] sm:$0xff]  ;;  %v1238_v26 = vld [vmem:[#allocation4 + $0xd0] sm:$0xff] }
 0x5c9   :  { %v1037_v62 = vadd.f32 %v1036_v51, %v9043_v1  ;;  %v1243_v53 = vld [vmem:[#allocation4 + $0xf8] sm:$0xff] }
 0x5ca   :  { %8462 = vtanh.f32 %v1035_v38  ;;  %v5240_v4 = vmul.f32 -1.442695, %v1106_v40  ;;  %v9262_v38 = vpack.c.bf16 %v1239_v22, %v1236_v15  ;;  %v1241_v40 = vld [vmem:[#allocation4 + $0xe8] sm:$0xff]  ;;  %v9289_v15 = vpack.c.bf16 %v1258_v56, %v1255_v47  ;;  %v1254_v22 = vld [vmem:[#allocation4 + $0x150] sm:$0xff] }
 0x5cb   :  { %8464 = vtanh.f32 %v1037_v62  ;;  %v9265_v51 = vpack.c.bf16 %v1241_v40, %v1238_v26  ;;  %v1246_v62 = vld [vmem:[#allocation4 + $0x110] sm:$0xff]  ;;  %v1257_v26 = vld [vmem:[#allocation4 + $0x168] sm:$0xff]  ;;  %v1256_v40 = vld [vmem:[#allocation4 + $0x160] sm:$0xff] }
 0x5cc   :  { %8466 = vpow2.f32 %v5240_v4  ;;  %7369 = vmatpush1.bf16.msra.mxu1 %v9262_v38  ;;  %v9269_v4 = vpack.c.bf16 %v1246_v62, %v1243_v53  ;;  %v9292_v53 = vpack.c.bf16 %v1257_v26, %v1254_v22  ;;  %v1259_v62 = vld [vmem:[#allocation4 + $0x178] sm:$0xff] }
 0x5ce   :  { %7371 = vmatprep.subr.bf16.mxu1 %v9269_v4 }
 0x5d4   :  { %v8463_v28 = vpop.eup %8462 }
 0x5d5   :  { %v8465_v31 = vpop.eup %8464 }
 0x5d6   :  { %v8467_v35 = vpop.eup %8466  ;;  %v1117_v37 = vsub.f32 %v8465_v31, %v8463_v28  ;;  %v1245_v31 = vld [vmem:[#allocation4 + $0x108] sm:$0xff] }
 0x5d7   :  { %v1114_v42 = vadd.f32 1.0, %v8467_v35  ;;  %v1244_v35 = vld [vmem:[#allocation4 + $0x100] sm:$0xff] }
 0x5d9   :  { %8468 = vrcp.f32 %v1114_v42  ;;  %v1247_v42 = vld [vmem:[#allocation4 + $0x118] sm:$0xff] }
 0x5da   :  { %v9275_v44 = vpack.c.bf16 %v1247_v42, %v1244_v35 }
 0x5e3   :  { %v8469_v6 = vpop.eup %8468 }
 0x5e4   :  { %v1118_v16 = vmul.f32 %v8469_v6, %v1117_v37  ;;  %v1252_v6 = vld [vmem:[#allocation4 + $0x140] sm:$0xff] }
 0x5e6   :  { %v9241_v24 = vadd.f32 %v8463_v28, %v1118_v16  ;;  %v1242_v28 = vld [vmem:[#allocation4 + $0xf0] sm:$0xff]  ;;  %v9279_v16 = vpack.c.bf16 %v1252_v6, %v1249_v5 }
 0x5e7   :  { %v9272_v37 = vpack.c.bf16 %v1245_v31, %v1242_v28  ;;  %v9295_v28 = vpack.c.bf16 %v1259_v62, %v1256_v40 }
 0x5e8   :  { %6117 = vmatmul.mubr.f32.vlgmr.msra.gmra.mrb[8].mxu0 %v9241_v24 }
 0x5e9   :  { %7384 = vmatpush3.bf16.msra.mxu0 %v9239_v19  ;;  %6151 = vmatprep.mubr.msk.f32.mxu0 %vm8680_vm1, %v8678_v0 }
 0x5ea   :  { %7385 = vmatprep.subr.bf16.mxu0 %v8679_v9  ;;  %7373 = vmatpush1.bf16.msra.mxu1 %v9272_v37 }
 0x5eb   :  { %7375 = vmatprep.subr.bf16.mxu1 %v9279_v16 }
 0x5ed   :  { %7387 = vmatpush3.bf16.msra.mxu0 %v9245_v27 }
 0x5ee   :  { %7388 = vmatprep.subr.bf16.mxu0 %v8679_v9  ;;  %7377 = vmatpush1.bf16.msra.mxu1 %v9282_v39 }
 0x5ef   :  { %7379 = vmatprep.subr.bf16.mxu1 %v9289_v15 }
 0x5f1   :  { %7390 = vmatpush3.bf16.msra.mxu0 %v9251_v43 }
 0x5f2   :  { %7391 = vmatprep.subr.bf16.mxu0 %v8679_v9  ;;  %7381 = vmatpush1.bf16.msra.mxu1 %v9292_v53 }
 0x5f3   :  { %7406 = vmatprep.subr.bf16.mxu1 %v8679_v9 }
 0x5f5   :  { %7393 = vmatpush3.bf16.msra.mxu0 %v9255_v61 }
 0x5f6   :  { %7394 = vmatprep.subr.bf16.mxu0 %v8679_v9 }
 0x5f9   :  { %7396 = vmatpush3.bf16.msra.mxu0 %v9265_v51 }
 0x5fa   :  { %7397 = vmatprep.subr.bf16.mxu0 %v8679_v9 }
 0x5fd   :  { %7399 = vmatpush3.bf16.msra.mxu0 %v9275_v44 }
 0x5fe   :  { %7400 = vmatprep.subr.bf16.mxu0 %v8679_v9 }
 0x601   :  { %7402 = vmatpush3.bf16.msra.mxu0 %v9285_v57 }
 0x602   :  { %7403 = vmatprep.subr.bf16.mxu0 %v8679_v9 }
 0x605   :  { %7405 = vmatpush3.bf16.msra.mxu0 %v9295_v28 }
 0x606   :  { %7431 = vmatprep.subr.bf16.mxu0 %v9212_v8 }
 0x6bb   :  { %v1204_v31 = vpop.f32.mrb[8].mxu0 }
 0x6bc   :  { %v1208_v35 = vadd.f32 %v1204_v31, %v8978_v10  ;;  %v6118_v42 = vpop.f32.mrb[9].mxu0 }
 0x6be   :  { %v1209_v5 = vmul.f32 0.666, %v1208_v35 }
 0x6c0   :  { %8470 = vtanh.f32 %v1209_v5 }
 0x6ca   :  { %v8471_v6 = vpop.eup %8470 }
 0x6cb   :  { %v1211_v13 = vmul.f32 1.7159, %v8471_v6 }
 0x6cd   :  { %1325 = vmatmul.mubr.f32.vlgmr.msra.gmra.mrb[18].mxu1 %v1211_v13  ;;  %6152 = vmatmul.mubr.f32.vlgmr.msra.gmra.mrb[10].mxu0 %v1211_v13 }
 0x6ce   :  { %7408 = vmatpush3.bf16.msra.mxu1 %v9138_v32  ;;  %6186 = vmatprep.mubr.msk.f32.mxu1 %vm8680_vm1, %v8678_v0 }
 0x6cf   :  { %7409 = vmatprep.subr.bf16.mxu1 %v8679_v9  ;;  %7433 = vmatpush1.bf16.msra.mxu0 %v9214_v18 }
 0x6d0   :  { %7435 = vmatprep.subr.bf16.mxu0 %v9217_v33  ;;  %1616 = vmatprep.mubr.f32.mxu0 %v8678_v0 }
 0x6d2   :  { %7411 = vmatpush3.bf16.msra.mxu1 %v9148_v45 }
 0x6d3   :  { %7412 = vmatprep.subr.bf16.mxu1 %v8679_v9  ;;  %7437 = vmatpush1.bf16.msra.mxu0 %v9220_v36 }
 0x6d4   :  { %7439 = vmatprep.subr.bf16.mxu0 %v9223_v52 }
 0x6d6   :  { %7414 = vmatpush3.bf16.msra.mxu1 %v9158_v60 }
 0x6d7   :  { %7415 = vmatprep.subr.bf16.mxu1 %v8679_v9  ;;  %7441 = vmatpush1.bf16.msra.mxu0 %v9226_v3 }
 0x6d8   :  { %7443 = vmatprep.subr.bf16.mxu0 %v9229_v2 }
 0x6da   :  { %7417 = vmatpush3.bf16.msra.mxu1 %v9168_v14 }
 0x6db   :  { %7418 = vmatprep.subr.bf16.mxu1 %v8679_v9  ;;  %7445 = vmatpush1.bf16.msra.mxu0 %v9232_v20 }
 0x6dc   :  { %7447 = vmatprep.subr.bf16.mxu0 %v9260_v11 }
 0x6de   :  { %7420 = vmatpush3.bf16.msra.mxu1 %v9178_v34 }
 0x6df   :  { %7421 = vmatprep.subr.bf16.mxu1 %v8679_v9  ;;  %7449 = vmatpush1.bf16.msra.mxu0 %v9262_v38 }
 0x6e0   :  { %7451 = vmatprep.subr.bf16.mxu0 %v9269_v4 }
 0x6e2   :  { %7423 = vmatpush3.bf16.msra.mxu1 %v9188_v41 }
 0x6e3   :  { %7424 = vmatprep.subr.bf16.mxu1 %v8679_v9  ;;  %7453 = vmatpush1.bf16.msra.mxu0 %v9272_v37 }
 0x6e4   :  { %7455 = vmatprep.subr.bf16.mxu0 %v9279_v16 }
 0x6e6   :  { %7426 = vmatpush3.bf16.msra.mxu1 %v9197_v46 }
 0x6e7   :  { %7427 = vmatprep.subr.bf16.mxu1 %v8679_v9  ;;  %7457 = vmatpush1.bf16.msra.mxu0 %v9282_v39 }
 0x6e8   :  { %7459 = vmatprep.subr.bf16.mxu0 %v9289_v15 }
 0x6ea   :  { %7429 = vmatpush3.bf16.msra.mxu1 %v9207_v12 }
 0x6eb   :  { %7462 = vmatprep.subr.bf16.mxu1 %v8679_v9  ;;  %7461 = vmatpush1.bf16.msra.mxu0 %v9292_v53 }
 0x6ec   :  { %7486 = vmatprep.subr.bf16.mxu0 %v8679_v9 }
 0x7a0   :  { %v1326_v10 = vpop.f32.mrb[18].mxu1  ;;  %v1397_v23 = vpop.f32.mrb[10].mxu0 }
 0x7a1   :  { %v1327_v30 = vadd.f32 %v1326_v10, %v9035_v59  ;;  %v1398_v48 = vadd.f32 %v1397_v23, %v9039_v63  ;;  %v1328_v47 = vpop.f32.mrb[19].mxu1  ;;  %v6153_v56 = vpop.f32.mrb[11].mxu0 }
 0x7a2   :  { %v1329_v22 = vadd.f32 %v1328_v47, %v9043_v1 }
 0x7a3   :  { %8472 = vtanh.f32 %v1327_v30  ;;  %v5241_v26 = vmul.f32 -1.442695, %v1398_v48 }
 0x7a4   :  { %8474 = vtanh.f32 %v1329_v22  ;;  %v2006_v22 = vld [vmem:[%s10437_s1 + $0x50] sm:$0xff] }
 0x7a5   :  { %8476 = vpow2.f32 %v5241_v26  ;;  %v2007_v26 = vld [vmem:[%s10437_s1 + $0x58] sm:$0xff] }
 0x7ad   :  { %v8473_v40 = vpop.eup %8472 }
 0x7ae   :  { %v8475_v62 = vpop.eup %8474 }
 0x7af   :  { %v8477_v31 = vpop.eup %8476  ;;  %v1409_v35 = vsub.f32 %v8475_v62, %v8473_v40  ;;  %v2008_v62 = vld [vmem:[%s10437_s1 + $0x60] sm:$0xff] }
 0x7b0   :  { %v1406_v42 = vadd.f32 1.0, %v8477_v31  ;;  %v2009_v31 = vld [vmem:[%s10437_s1 + $0x68] sm:$0xff] }
 0x7b2   :  { %8478 = vrcp.f32 %v1406_v42  ;;  %v2010_v42 = vld [vmem:[%s10437_s1 + $0x70] sm:$0xff] }
 0x7bc   :  { %v8479_v5 = vpop.eup %8478 }
 0x7bd   :  { %v1410_v6 = vmul.f32 %v8479_v5, %v1409_v35  ;;  %v9480_v35 = vpack.c.bf16 %v2009_v31, %v2008_v62  ;;  %v2011_v5 = vld [vmem:[%s10437_s1 + $0x78] sm:$0xff] }
 0x7bf   :  { %v9340_v13 = vadd.f32 %v8473_v40, %v1410_v6  ;;  %v9470_v40 = vpack.c.bf16 %v2007_v26, %v2006_v22  ;;  %v9489_v6 = vpack.c.bf16 %v2011_v5, %v2010_v42  ;;  %v2090_v5 = vld [vmem:[#allocation4 + $0x10] sm:$0xff] }
 0x7c1   :  { %6187 = vmatmul.mubr.f32.vlgmr.msra.gmra.mrb[20].mxu1 %v9340_v13 }
 0x7c2   :  { %7464 = vmatpush3.bf16.msra.mxu1 %v9239_v19  ;;  %6221 = vmatprep.mubr.msk.f32.mxu1 %vm8680_vm1, %v8678_v0 }
 0x7c3   :  { %7465 = vmatprep.subr.bf16.mxu1 %v8679_v9 }
 0x7c6   :  { %7467 = vmatpush3.bf16.msra.mxu1 %v9245_v27 }
 0x7c7   :  { %7468 = vmatprep.subr.bf16.mxu1 %v8679_v9 }
 0x7ca   :  { %7470 = vmatpush3.bf16.msra.mxu1 %v9251_v43 }
 0x7cb   :  { %7471 = vmatprep.subr.bf16.mxu1 %v8679_v9 }
 0x7ce   :  { %7473 = vmatpush3.bf16.msra.mxu1 %v9255_v61 }
 0x7cf   :  { %7474 = vmatprep.subr.bf16.mxu1 %v8679_v9 }
 0x7d2   :  { %7476 = vmatpush3.bf16.msra.mxu1 %v9265_v51 }
 0x7d3   :  { %7477 = vmatprep.subr.bf16.mxu1 %v8679_v9 }
 0x7d6   :  { %7479 = vmatpush3.bf16.msra.mxu1 %v9275_v44 }
 0x7d7   :  { %7480 = vmatprep.subr.bf16.mxu1 %v8679_v9 }
 0x7da   :  { %7482 = vmatpush3.bf16.msra.mxu1 %v9285_v57 }
 0x7db   :  { %7483 = vmatprep.subr.bf16.mxu1 %v8679_v9 }
 0x7de   :  { %7485 = vmatpush3.bf16.msra.mxu1 %v9295_v28 }
 0x7df   :  { %7511 = vmatprep.subr.bf16.mxu1 %v9212_v8 }
 0x894   :  { %v1496_v10 = vpop.f32.mrb[20].mxu1 }
 0x895   :  { %v1500_v23 = vadd.f32 %v1496_v10, %v8984_v21  ;;  %v6188_v30 = vpop.f32.mrb[21].mxu1  ;;  %v2012_v10 = vld [vmem:[%s10437_s1 + $0x80] sm:$0xff] }
 0x897   :  { %v1501_v48 = vmul.f32 0.666, %v1500_v23  ;;  %v2013_v23 = vld [vmem:[%s10437_s1 + $0x88] sm:$0xff] }
 0x898   :  { %v9499_v30 = vpack.c.bf16 %v2013_v23, %v2012_v10  ;;  %v2093_v10 = vld [vmem:[#allocation4 + $0x28] sm:$0xff] }
 0x899   :  { %8480 = vtanh.f32 %v1501_v48  ;;  %v2089_v48 = vld [vmem:[#allocation4 + $0x8] sm:$0xff] }
 0x8a3   :  { %v8481_v47 = vpop.eup %8480 }
 0x8a4   :  { %v1503_v56 = vmul.f32 1.7159, %v8481_v47  ;;  %v2092_v47 = vld [vmem:[#allocation4 + $0x20] sm:$0xff] }
 0x8a6   :  { %1617 = vmatmul.mubr.f32.vlgmr.msra.gmra.mrb[12].mxu0 %v1503_v56  ;;  %6222 = vmatmul.mubr.f32.vlgmr.msra.gmra.mrb[22].mxu1 %v1503_v56  ;;  %v2088_v56 = vld [vmem:[#allocation4] sm:$0xff] }
 0x8a7   :  { %7488 = vmatpush3.bf16.msra.mxu0 %v9138_v32  ;;  %6256 = vmatprep.mubr.msk.f32.mxu0 %vm8680_vm1, %v8678_v0 }
 0x8a8   :  { %7489 = vmatprep.subr.bf16.mxu0 %v8679_v9  ;;  %7513 = vmatpush1.bf16.msra.mxu1 %v9214_v18 }
 0x8a9   :  { %7515 = vmatprep.subr.bf16.mxu1 %v9217_v33  ;;  %1908 = vmatprep.mubr.f32.mxu1 %v8678_v0 }
 0x8ab   :  { %7491 = vmatpush3.bf16.msra.mxu0 %v9148_v45 }
 0x8ac   :  { %7492 = vmatprep.subr.bf16.mxu0 %v8679_v9  ;;  %7517 = vmatpush1.bf16.msra.mxu1 %v9220_v36 }
 0x8ad   :  { %7519 = vmatprep.subr.bf16.mxu1 %v9223_v52 }
 0x8af   :  { %7494 = vmatpush3.bf16.msra.mxu0 %v9158_v60 }
 0x8b0   :  { %7495 = vmatprep.subr.bf16.mxu0 %v8679_v9  ;;  %7521 = vmatpush1.bf16.msra.mxu1 %v9226_v3 }
 0x8b1   :  { %7523 = vmatprep.subr.bf16.mxu1 %v9229_v2 }
 0x8b3   :  { %7497 = vmatpush3.bf16.msra.mxu0 %v9168_v14 }
 0x8b4   :  { %7498 = vmatprep.subr.bf16.mxu0 %v8679_v9  ;;  %7525 = vmatpush1.bf16.msra.mxu1 %v9232_v20 }
 0x8b5   :  { %7527 = vmatprep.subr.bf16.mxu1 %v9260_v11 }
 0x8b7   :  { %7500 = vmatpush3.bf16.msra.mxu0 %v9178_v34 }
 0x8b8   :  { %7501 = vmatprep.subr.bf16.mxu0 %v8679_v9  ;;  %7529 = vmatpush1.bf16.msra.mxu1 %v9262_v38  ;;  %v1998_v38 = vld [vmem:[%s10437_s1 + $0x10] sm:$0xff] }
 0x8b9   :  { %7531 = vmatprep.subr.bf16.mxu1 %v9269_v4  ;;  %v2000_v4 = vld [vmem:[%s10437_s1 + $0x20] sm:$0xff] }
 0x8bb   :  { %7503 = vmatpush3.bf16.msra.mxu0 %v9188_v41 }
 0x8bc   :  { %7504 = vmatprep.subr.bf16.mxu0 %v8679_v9  ;;  %7533 = vmatpush1.bf16.msra.mxu1 %v9272_v37  ;;  %v2001_v37 = vld [vmem:[%s10437_s1 + $0x28] sm:$0xff] }
 0x8bd   :  { %7535 = vmatprep.subr.bf16.mxu1 %v9279_v16  ;;  %v2002_v16 = vld [vmem:[%s10437_s1 + $0x30] sm:$0xff] }
 0x8bf   :  { %7506 = vmatpush3.bf16.msra.mxu0 %v9197_v46 }
 0x8c0   :  { %7507 = vmatprep.subr.bf16.mxu0 %v8679_v9  ;;  %7537 = vmatpush1.bf16.msra.mxu1 %v9282_v39  ;;  %v2003_v39 = vld [vmem:[%s10437_s1 + $0x38] sm:$0xff] }
 0x8c1   :  { %7539 = vmatprep.subr.bf16.mxu1 %v9289_v15  ;;  %v2004_v15 = vld [vmem:[%s10437_s1 + $0x40] sm:$0xff] }
 0x8c3   :  { %7509 = vmatpush3.bf16.msra.mxu0 %v9207_v12 }
 0x8c4   :  { %7542 = vmatprep.subr.bf16.mxu0 %v8679_v9  ;;  %7541 = vmatpush1.bf16.msra.mxu1 %v9292_v53  ;;  %v2005_v53 = vld [vmem:[%s10437_s1 + $0x48] sm:$0xff] }
 0x8c5   :  { %7566 = vmatprep.subr.bf16.mxu1 %v8679_v9 }
 0x979   :  { %v1618_v21 = vpop.f32.mrb[12].mxu0  ;;  %v1689_v32 = vpop.f32.mrb[22].mxu1 }
 0x97a   :  { %v1619_v45 = vadd.f32 %v1618_v21, %v9035_v59  ;;  %v1690_v60 = vadd.f32 %v1689_v32, %v9039_v63  ;;  %v1620_v14 = vpop.f32.mrb[13].mxu0  ;;  %v6223_v34 = vpop.f32.mrb[23].mxu1  ;;  %v9504_v21 = vpack.c.bf16 %v2092_v47, %v2089_v48  ;;  %v2091_v32 = vld [vmem:[#allocation4 + $0x18] sm:$0xff]  ;;  %v9531_v47 = vpack.c.bf16 %v2093_v10, %v2090_v5  ;;  %v2125_v10 = vld [vmem:[#allocation4 + $0x128] sm:$0xff] }
 0x97b   :  { %v1621_v41 = vadd.f32 %v1620_v14, %v9043_v1  ;;  %v2098_v14 = vld [vmem:[#allocation4 + $0x50] sm:$0xff] }
 0x97c   :  { %8482 = vtanh.f32 %v1619_v45  ;;  %v5242_v46 = vmul.f32 -1.442695, %v1690_v60  ;;  %v9506_v45 = vpack.c.bf16 %v2091_v32, %v2088_v56  ;;  %v2095_v60 = vld [vmem:[#allocation4 + $0x38] sm:$0xff]  ;;  %v2094_v34 = vld [vmem:[#allocation4 + $0x30] sm:$0xff]  ;;  %v2096_v32 = vld [vmem:[#allocation4 + $0x40] sm:$0xff] }
 0x97d   :  { %8484 = vtanh.f32 %v1621_v41  ;;  %v9509_v41 = vpack.c.bf16 %v2098_v14, %v2095_v60  ;;  %v2099_v60 = vld [vmem:[#allocation4 + $0x58] sm:$0xff] }
 0x97e   :  { %8486 = vpow2.f32 %v5242_v46  ;;  %v2097_v46 = vld [vmem:[#allocation4 + $0x48] sm:$0xff]  ;;  %v9537_v14 = vpack.c.bf16 %v2099_v60, %v2096_v32  ;;  %v2124_v32 = vld [vmem:[#allocation4 + $0x120] sm:$0xff]  ;;  %v2127_v60 = vld [vmem:[#allocation4 + $0x138] sm:$0xff] }
 0x986   :  { %v8483_v12 = vpop.eup %8482 }
 0x987   :  { %v8485_v8 = vpop.eup %8484 }
 0x988   :  { %v8487_v18 = vpop.eup %8486  ;;  %v1701_v33 = vsub.f32 %v8485_v8, %v8483_v12  ;;  %v2101_v8 = vld [vmem:[#allocation4 + $0x68] sm:$0xff] }
 0x989   :  { %v1698_v36 = vadd.f32 1.0, %v8487_v18  ;;  %v2104_v18 = vld [vmem:[#allocation4 + $0x80] sm:$0xff] }
 0x98b   :  { %8488 = vrcp.f32 %v1698_v36  ;;  %v2100_v36 = vld [vmem:[#allocation4 + $0x60] sm:$0xff] }
 0x995   :  { %v8489_v52 = vpop.eup %8488 }
 0x996   :  { %v1702_v3 = vmul.f32 %v8489_v52, %v1701_v33  ;;  %v9515_v33 = vpack.c.bf16 %v2104_v18, %v2101_v8  ;;  %v2103_v52 = vld [vmem:[#allocation4 + $0x78] sm:$0xff]  ;;  %v2108_v18 = vld [vmem:[#allocation4 + $0xa0] sm:$0xff] }
 0x998   :  { %v9400_v2 = vadd.f32 %v8483_v12, %v1702_v3  ;;  %v9512_v12 = vpack.c.bf16 %v2097_v46, %v2094_v34  ;;  %v9518_v3 = vpack.c.bf16 %v2103_v52, %v2100_v36  ;;  %v2102_v34 = vld [vmem:[#allocation4 + $0x70] sm:$0xff]  ;;  %v2105_v46 = vld [vmem:[#allocation4 + $0x88] sm:$0xff]  ;;  %v2111_v36 = vld [vmem:[#allocation4 + $0xb8] sm:$0xff] }
 0x999   :  { %v9543_v8 = vpack.c.bf16 %v2105_v46, %v2102_v34  ;;  %v9547_v52 = vpack.c.bf16 %v2111_v36, %v2108_v18  ;;  %v2126_v34 = vld [vmem:[#allocation4 + $0x130] sm:$0xff]  ;;  %v7616_v46 = vpack.c.bf16 %v2127_v60, %v2124_v32  ;;  %v2129_v18 = vld [vmem:[#allocation4 + $0x148] sm:$0xff] }
 0x99a   :  { %6257 = vmatmul.mubr.f32.vlgmr.msra.gmra.mrb[14].mxu0 %v9400_v2  ;;  %v9572_v36 = vpack.c.bf16 %v2129_v18, %v2126_v34  ;;  %v2745_v18 = vld [vmem:[#allocation6 + $0x90] sm:$0xff] }
 0x99b   :  { %7544 = vmatpush3.bf16.msra.mxu0 %v9239_v19  ;;  %6291 = vmatprep.mubr.msk.f32.mxu0 %vm8680_vm1, %v8678_v0 }
 0x99c   :  { %7545 = vmatprep.subr.bf16.mxu0 %v8679_v9 }
 0x99f   :  { %7547 = vmatpush3.bf16.msra.mxu0 %v9245_v27 }
 0x9a0   :  { %7548 = vmatprep.subr.bf16.mxu0 %v8679_v9 }
 0x9a3   :  { %7550 = vmatpush3.bf16.msra.mxu0 %v9251_v43 }
 0x9a4   :  { %7551 = vmatprep.subr.bf16.mxu0 %v8679_v9 }
 0x9a7   :  { %7553 = vmatpush3.bf16.msra.mxu0 %v9255_v61 }
 0x9a8   :  { %7554 = vmatprep.subr.bf16.mxu0 %v8679_v9 }
 0x9ab   :  { %7556 = vmatpush3.bf16.msra.mxu0 %v9265_v51 }
 0x9ac   :  { %7557 = vmatprep.subr.bf16.mxu0 %v8679_v9 }
 0x9af   :  { %7559 = vmatpush3.bf16.msra.mxu0 %v9275_v44  ;;  %v9440_v44 = vpack.c.bf16 %v2001_v37, %v2000_v4 }
 0x9b0   :  { %7560 = vmatprep.subr.bf16.mxu0 %v8679_v9 }
 0x9b3   :  { %7562 = vmatpush3.bf16.msra.mxu0 %v9285_v57  ;;  %v9450_v57 = vpack.c.bf16 %v2003_v39, %v2002_v16 }
 0x9b4   :  { %7563 = vmatprep.subr.bf16.mxu0 %v8679_v9 }
 0x9b7   :  { %7565 = vmatpush3.bf16.msra.mxu0 %v9295_v28  ;;  %v9460_v28 = vpack.c.bf16 %v2005_v53, %v2004_v15 }
 0x9b8   :  { %7591 = vmatprep.subr.bf16.mxu0 %v9504_v21 }
 0xa6d   :  { %v1788_v20 = vpop.f32.mrb[14].mxu0 }
 0xa6e   :  { %v1792_v19 = vadd.f32 %v1788_v20, %v8982_v17  ;;  %v6258_v27 = vpop.f32.mrb[15].mxu0  ;;  %v1999_v17 = vld [vmem:[%s10437_s1 + $0x18] sm:$0xff]  ;;  %v2107_v20 = vld [vmem:[#allocation4 + $0x98] sm:$0xff] }
 0xa6f   :  { %v9430_v51 = vpack.c.bf16 %v1999_v17, %v1998_v38 }
 0xa70   :  { %v1793_v43 = vmul.f32 0.666, %v1792_v19  ;;  %v2110_v19 = vld [vmem:[#allocation4 + $0xb0] sm:$0xff] }
 0xa71   :  { %v9521_v27 = vpack.c.bf16 %v2110_v19, %v2107_v20  ;;  %v2113_v20 = vld [vmem:[#allocation4 + $0xc8] sm:$0xff]  ;;  %v2116_v19 = vld [vmem:[#allocation4 + $0xe0] sm:$0xff] }
 0xa72   :  { %8490 = vtanh.f32 %v1793_v43  ;;  %v2106_v43 = vld [vmem:[#allocation4 + $0x90] sm:$0xff] }
 0xa7c   :  { %v8491_v61 = vpop.eup %8490 }
 0xa7d   :  { %v1795_v11 = vmul.f32 1.7159, %v8491_v61  ;;  %v2109_v61 = vld [vmem:[#allocation4 + $0xa8] sm:$0xff] }
 0xa7f   :  { %1909 = vmatmul.mubr.f32.vlgmr.msra.gmra.mrb[24].mxu1 %v1795_v11  ;;  %6292 = vmatmul.mubr.f32.vlgmr.msra.gmra.mrb[16].mxu0 %v1795_v11  ;;  %v9524_v11 = vpack.c.bf16 %v2109_v61, %v2106_v43  ;;  %v9552_v43 = vpack.c.bf16 %v2116_v19, %v2113_v20  ;;  %v2112_v61 = vld [vmem:[#allocation4 + $0xc0] sm:$0xff]  ;;  %v2131_v20 = vld [vmem:[#allocation4 + $0x158] sm:$0xff]  ;;  %v2134_v19 = vld [vmem:[#allocation4 + $0x170] sm:$0xff] }
 0xa80   :  { %6326 = vmatprep.mubr.msk.f32.mxu1 %vm8680_vm1, %v8678_v0  ;;  %2200 = vmatprep.mubr.f32.mxu0 %v8678_v0 }
 0xa81   :  { %7568 = vmatpush3.bf16.msra.mxu1 %v9430_v51  ;;  %7593 = vmatpush1.bf16.msra.mxu0 %v9506_v45 }
 0xa82   :  { %7569 = vmatprep.subr.bf16.mxu1 %v8679_v9  ;;  %7595 = vmatprep.subr.bf16.mxu0 %v9509_v41 }
 0xa85   :  { %7571 = vmatpush3.bf16.msra.mxu1 %v9440_v44  ;;  %7597 = vmatpush1.bf16.msra.mxu0 %v9512_v12 }
 0xa86   :  { %7572 = vmatprep.subr.bf16.mxu1 %v8679_v9  ;;  %7599 = vmatprep.subr.bf16.mxu0 %v9515_v33 }
 0xa89   :  { %7574 = vmatpush3.bf16.msra.mxu1 %v9450_v57  ;;  %7601 = vmatpush1.bf16.msra.mxu0 %v9518_v3 }
 0xa8a   :  { %7575 = vmatprep.subr.bf16.mxu1 %v8679_v9  ;;  %7603 = vmatprep.subr.bf16.mxu0 %v9521_v27 }
 0xa8d   :  { %7577 = vmatpush3.bf16.msra.mxu1 %v9460_v28  ;;  %7605 = vmatpush1.bf16.msra.mxu0 %v9524_v11 }
 0xa8e   :  { %7578 = vmatprep.subr.bf16.mxu1 %v8679_v9  ;;  %7607 = vmatprep.subr.bf16.mxu0 %v9552_v43 }
 0xa91   :  { %7580 = vmatpush3.bf16.msra.mxu1 %v9470_v40 }
 0xa92   :  { %7581 = vmatprep.subr.bf16.mxu1 %v8679_v9 }
 0xa95   :  { %7583 = vmatpush3.bf16.msra.mxu1 %v9480_v35 }
 0xa96   :  { %7584 = vmatprep.subr.bf16.mxu1 %v8679_v9 }
 0xa99   :  { %7586 = vmatpush3.bf16.msra.mxu1 %v9489_v6 }
 0xa9a   :  { %7587 = vmatprep.subr.bf16.mxu1 %v8679_v9 }
 0xa9d   :  { %7589 = vmatpush3.bf16.msra.mxu1 %v9499_v30 }
 0xa9e   :  { %7622 = vmatprep.subr.bf16.mxu1 %v8679_v9 }
 0xb52   :  { %v1910_v38 = vpop.f32.mrb[24].mxu1  ;;  %v1981_v17 = vpop.f32.mrb[16].mxu0 }
 0xb53   :  { %v1911_v4 = vadd.f32 %v1910_v38, %v9035_v59  ;;  %v1982_v37 = vadd.f32 %v1981_v17, %v9039_v63  ;;  %v1912_v16 = vpop.f32.mrb[25].mxu1  ;;  %v6293_v39 = vpop.f32.mrb[17].mxu0  ;;  %v2115_v38 = vld [vmem:[#allocation4 + $0xd8] sm:$0xff]  ;;  %v2114_v17 = vld [vmem:[#allocation4 + $0xd0] sm:$0xff] }
 0xb54   :  { %v1913_v15 = vadd.f32 %v1912_v16, %v9043_v1  ;;  %v2119_v39 = vld [vmem:[#allocation4 + $0xf8] sm:$0xff] }
 0xb55   :  { %8492 = vtanh.f32 %v1911_v4  ;;  %v5243_v53 = vmul.f32 -1.442695, %v1982_v37  ;;  %v9554_v4 = vpack.c.bf16 %v2115_v38, %v2112_v61  ;;  %v2117_v37 = vld [vmem:[#allocation4 + $0xe8] sm:$0xff]  ;;  %v7618_v61 = vpack.c.bf16 %v2134_v19, %v2131_v20  ;;  %v2130_v38 = vld [vmem:[#allocation4 + $0x150] sm:$0xff]  ;;  %v2593_v20 = vld [vmem:[#allocation6 + $0x20] sm:$0xff] }
 0xb56   :  { %8494 = vtanh.f32 %v1913_v15  ;;  %v9557_v16 = vpack.c.bf16 %v2117_v37, %v2114_v17  ;;  %v2122_v15 = vld [vmem:[#allocation4 + $0x110] sm:$0xff]  ;;  %v2133_v17 = vld [vmem:[#allocation4 + $0x168] sm:$0xff]  ;;  %v2132_v37 = vld [vmem:[#allocation4 + $0x160] sm:$0xff] }
 0xb57   :  { %8496 = vpow2.f32 %v5243_v53  ;;  %7609 = vmatpush1.bf16.msra.mxu0 %v9554_v4  ;;  %v9561_v53 = vpack.c.bf16 %v2122_v15, %v2119_v39  ;;  %v7620_v39 = vpack.c.bf16 %v2133_v17, %v2130_v38  ;;  %v2135_v15 = vld [vmem:[#allocation4 + $0x178] sm:$0xff]  ;;  %v2594_v19 = vld [vmem:[#allocation6 + $0x28] sm:$0xff]  ;;  %v2747_v38 = vld [vmem:[#allocation6 + $0xa0] sm:$0xff] }
 0xb58   :  { %v2748_v17 = vld [vmem:[#allocation6 + $0xa8] sm:$0xff] }
 0xb59   :  { %7611 = vmatprep.subr.bf16.mxu0 %v9561_v53 }
 0xb5f   :  { %v8493_v22 = vpop.eup %8492 }
 0xb60   :  { %v8495_v26 = vpop.eup %8494 }
 0xb61   :  { %v8497_v62 = vpop.eup %8496  ;;  %v1993_v31 = vsub.f32 %v8495_v26, %v8493_v22  ;;  %v2121_v26 = vld [vmem:[#allocation4 + $0x108] sm:$0xff] }
 0xb62   :  { %v1990_v42 = vadd.f32 1.0, %v8497_v62  ;;  %v2120_v62 = vld [vmem:[#allocation4 + $0x100] sm:$0xff] }
 0xb64   :  { %8498 = vrcp.f32 %v1990_v42  ;;  %v2123_v42 = vld [vmem:[#allocation4 + $0x118] sm:$0xff] }
 0xb65   :  { %v9567_v5 = vpack.c.bf16 %v2123_v42, %v2120_v62 }
 0xb6e   :  { %v8499_v23 = vpop.eup %8498 }
 0xb6f   :  { %v1994_v48 = vmul.f32 %v8499_v23, %v1993_v31  ;;  %v2128_v23 = vld [vmem:[#allocation4 + $0x140] sm:$0xff] }
 0xb71   :  { %v9533_v56 = vadd.f32 %v8493_v22, %v1994_v48  ;;  %v2118_v22 = vld [vmem:[#allocation4 + $0xf0] sm:$0xff]  ;;  %v7614_v48 = vpack.c.bf16 %v2128_v23, %v2125_v10 }
 0xb72   :  { %v9564_v31 = vpack.c.bf16 %v2121_v26, %v2118_v22  ;;  %v9576_v22 = vpack.c.bf16 %v2135_v15, %v2132_v37  ;;  %v2595_v37 = vld [vmem:[#allocation6 + $0x30] sm:$0xff] }
 0xb73   :  { %6327 = vmatmul.mubr.f32.vlgmr.msra.gmra.mrb[26].mxu1 %v9533_v56 }
 0xb74   :  { %7624 = vmatpush3.bf16.msra.mxu1 %v9531_v47  ;;  %6361 = vmatprep.mubr.msk.f32.mxu1 %vm8680_vm1, %v8678_v0 }
 0xb75   :  { %7625 = vmatprep.subr.bf16.mxu1 %v8679_v9  ;;  %7613 = vmatpush1.bf16.msra.mxu0 %v9564_v31 }
 0xb76   :  { %7615 = vmatprep.subr.bf16.mxu0 %v7614_v48 }
 0xb78   :  { %7627 = vmatpush3.bf16.msra.mxu1 %v9537_v14 }
 0xb79   :  { %7628 = vmatprep.subr.bf16.mxu1 %v8679_v9  ;;  %7617 = vmatpush1.bf16.msra.mxu0 %v7616_v46 }
 0xb7a   :  { %7619 = vmatprep.subr.bf16.mxu0 %v7618_v61 }
 0xb7c   :  { %7630 = vmatpush3.bf16.msra.mxu1 %v9543_v8 }
 0xb7d   :  { %7631 = vmatprep.subr.bf16.mxu1 %v8679_v9  ;;  %7621 = vmatpush1.bf16.msra.mxu0 %v7620_v39 }
 0xb7e   :  { %7646 = vmatprep.subr.bf16.mxu0 %v8679_v9 }
 0xb80   :  { %7633 = vmatpush3.bf16.msra.mxu1 %v9547_v52 }
 0xb81   :  { %7634 = vmatprep.subr.bf16.mxu1 %v8679_v9 }
 0xb84   :  { %7636 = vmatpush3.bf16.msra.mxu1 %v9557_v16 }
 0xb85   :  { %7637 = vmatprep.subr.bf16.mxu1 %v8679_v9 }
 0xb88   :  { %7639 = vmatpush3.bf16.msra.mxu1 %v9567_v5 }
 0xb89   :  { %7640 = vmatprep.subr.bf16.mxu1 %v8679_v9 }
 0xb8c   :  { %7642 = vmatpush3.bf16.msra.mxu1 %v9572_v36 }
 0xb8d   :  { %7643 = vmatprep.subr.bf16.mxu1 %v8679_v9 }
 0xb90   :  { %7645 = vmatpush3.bf16.msra.mxu1 %v9576_v22 }
 0xb91   :  { %7671 = vmatprep.subr.bf16.mxu1 %v9504_v21 }
 0xc46   :  { %v2080_v26 = vpop.f32.mrb[26].mxu1 }
 0xc47   :  { %v2084_v62 = vadd.f32 %v2080_v26, %v8988_v29  ;;  %v6328_v42 = vpop.f32.mrb[27].mxu1  ;;  %v2750_v26 = vld [vmem:[#allocation6 + $0xb8] sm:$0xff] }
 0xc48   :  { %v2598_v42 = vld [vmem:[#allocation6 + $0x48] sm:$0xff] }
 0xc49   :  { %v2085_v10 = vmul.f32 0.666, %v2084_v62  ;;  %v2597_v62 = vld [vmem:[#allocation6 + $0x40] sm:$0xff] }
 0xc4b   :  { %8500 = vtanh.f32 %v2085_v10 }
 0xc55   :  { %v8501_v23 = vpop.eup %8500 }
 0xc56   :  { %v2087_v32 = vmul.f32 1.7159, %v8501_v23  ;;  %v7742_v23 = vpack.c.bf16 %v2598_v42, %v2597_v62  ;;  %v2852_v62 = vld [vmem:[#allocation8 + $0x98] sm:$0xff]  ;;  %v2855_v42 = vld [vmem:[#allocation8 + $0xb0] sm:$0xff] }
 0xc58   :  { %2201 = vmatmul.mubr.f32.vlgmr.msra.gmra.mrb[18].mxu0 %v2087_v32  ;;  %6362 = vmatmul.mubr.f32.vlgmr.msra.gmra.mrb[28].mxu1 %v2087_v32  ;;  %v2751_v32 = vld [vmem:[#allocation6 + $0xc0] sm:$0xff] }
 0xc59   :  { %7648 = vmatpush3.bf16.msra.mxu0 %v9430_v51  ;;  %6396 = vmatprep.mubr.msk.f32.mxu0 %vm8680_vm1, %v8678_v0 }
 0xc5a   :  { %7649 = vmatprep.subr.bf16.mxu0 %v8679_v9  ;;  %7673 = vmatpush1.bf16.msra.mxu1 %v9506_v45 }
 0xc5b   :  { %7675 = vmatprep.subr.bf16.mxu1 %v9509_v41  ;;  %2492 = vmatprep.mubr.f32.mxu1 %v8678_v0 }
 0xc5d   :  { %7651 = vmatpush3.bf16.msra.mxu0 %v9440_v44 }
 0xc5e   :  { %7652 = vmatprep.subr.bf16.mxu0 %v8679_v9  ;;  %7677 = vmatpush1.bf16.msra.mxu1 %v9512_v12 }
 0xc5f   :  { %7679 = vmatprep.subr.bf16.mxu1 %v9515_v33 }
 0xc61   :  { %7654 = vmatpush3.bf16.msra.mxu0 %v9450_v57 }
 0xc62   :  { %7655 = vmatprep.subr.bf16.mxu0 %v8679_v9  ;;  %7681 = vmatpush1.bf16.msra.mxu1 %v9518_v3 }
 0xc63   :  { %7683 = vmatprep.subr.bf16.mxu1 %v9521_v27 }
 0xc65   :  { %7657 = vmatpush3.bf16.msra.mxu0 %v9460_v28 }
 0xc66   :  { %7658 = vmatprep.subr.bf16.mxu0 %v8679_v9  ;;  %7685 = vmatpush1.bf16.msra.mxu1 %v9524_v11  ;;  %v2589_v11 = vld [vmem:[#allocation6] sm:$0xff] }
 0xc67   :  { %7687 = vmatprep.subr.bf16.mxu1 %v9552_v43 }
 0xc69   :  { %7660 = vmatpush3.bf16.msra.mxu0 %v9470_v40 }
 0xc6a   :  { %7661 = vmatprep.subr.bf16.mxu0 %v8679_v9  ;;  %7689 = vmatpush1.bf16.msra.mxu1 %v9554_v4 }
 0xc6b   :  { %7691 = vmatprep.subr.bf16.mxu1 %v9561_v53  ;;  %v2744_v53 = vld [vmem:[#allocation6 + $0x88] sm:$0xff] }
 0xc6d   :  { %7663 = vmatpush3.bf16.msra.mxu0 %v9480_v35 }
 0xc6e   :  { %7664 = vmatprep.subr.bf16.mxu0 %v8679_v9  ;;  %7693 = vmatpush1.bf16.msra.mxu1 %v9564_v31  ;;  %v2591_v31 = vld [vmem:[#allocation6 + $0x10] sm:$0xff] }
 0xc6f   :  { %7695 = vmatprep.subr.bf16.mxu1 %v7614_v48 }
 0xc71   :  { %7666 = vmatpush3.bf16.msra.mxu0 %v9489_v6 }
 0xc72   :  { %7667 = vmatprep.subr.bf16.mxu0 %v8679_v9  ;;  %7697 = vmatpush1.bf16.msra.mxu1 %v7616_v46 }
 0xc73   :  { %7699 = vmatprep.subr.bf16.mxu1 %v7618_v61  ;;  %v7734_v61 = vpack.c.bf16 %v2594_v19, %v2593_v20  ;;  %v2846_v19 = vld [vmem:[#allocation8 + $0x68] sm:$0xff] }
 0xc75   :  { %7669 = vmatpush3.bf16.msra.mxu0 %v9499_v30 }
 0xc76   :  { %7702 = vmatprep.subr.bf16.mxu0 %v8679_v9  ;;  %7701 = vmatpush1.bf16.msra.mxu1 %v7620_v39  ;;  %v2596_v39 = vld [vmem:[#allocation6 + $0x38] sm:$0xff] }
 0xc77   :  { %v7738_v15 = vpack.c.bf16 %v2596_v39, %v2595_v37  ;;  %v2848_v37 = vld [vmem:[#allocation8 + $0x78] sm:$0xff]  ;;  %v2847_v39 = vld [vmem:[#allocation8 + $0x70] sm:$0xff] }
 0xd2b   :  { %v2202_v29 = vpop.f32.mrb[18].mxu0  ;;  %v2273_v51 = vpop.f32.mrb[28].mxu1 }
 0xd2c   :  { %v2203_v44 = vadd.f32 %v2202_v29, %v9035_v59  ;;  %v2274_v57 = vadd.f32 %v2273_v51, %v9039_v63  ;;  %v2204_v28 = vpop.f32.mrb[19].mxu0  ;;  %v6363_v40 = vpop.f32.mrb[29].mxu1  ;;  %v2752_v29 = vld [vmem:[#allocation6 + $0xc8] sm:$0xff]  ;;  %v2599_v51 = vld [vmem:[#allocation6 + $0x50] sm:$0xff] }
 0xd2d   :  { %v2205_v35 = vadd.f32 %v2204_v28, %v9043_v1  ;;  %v2753_v40 = vld [vmem:[#allocation6 + $0xd0] sm:$0xff] }
 0xd2e   :  { %8502 = vtanh.f32 %v2203_v44  ;;  %v5244_v6 = vmul.f32 -1.442695, %v2274_v57  ;;  %v2600_v44 = vld [vmem:[#allocation6 + $0x58] sm:$0xff]  ;;  %v9655_v57 = vpack.c.bf16 %v2752_v29, %v2751_v32  ;;  %v2851_v32 = vld [vmem:[#allocation8 + $0x90] sm:$0xff]  ;;  %v2854_v29 = vld [vmem:[#allocation8 + $0xa8] sm:$0xff] }
 0xd2f   :  { %8504 = vtanh.f32 %v2205_v35  ;;  %v7746_v28 = vpack.c.bf16 %v2600_v44, %v2599_v51  ;;  %v2754_v35 = vld [vmem:[#allocation6 + $0xd8] sm:$0xff]  ;;  %v2853_v51 = vld [vmem:[#allocation8 + $0xa0] sm:$0xff]  ;;  %v9713_v44 = vpack.c.bf16 %v2854_v29, %v2851_v32  ;;  %v2878_v32 = vld [vmem:[#allocation8 + $0x168] sm:$0xff] }
 0xd30   :  { %8506 = vpow2.f32 %v5244_v6  ;;  %v2601_v6 = vld [vmem:[#allocation6 + $0x60] sm:$0xff] }
 0xd31   :  { %v2877_v29 = vld [vmem:[#allocation8 + $0x160] sm:$0xff] }
 0xd38   :  { %v8503_v21 = vpop.eup %8502 }
 0xd39   :  { %v8505_v45 = vpop.eup %8504 }
 0xd3a   :  { %v8507_v30 = vpop.eup %8506  ;;  %v2285_v41 = vsub.f32 %v8505_v45, %v8503_v21  ;;  %v9659_v45 = vpack.c.bf16 %v2754_v35, %v2753_v40  ;;  %v2858_v35 = vld [vmem:[#allocation8 + $0xc8] sm:$0xff] }
 0xd3b   :  { %v2282_v12 = vadd.f32 1.0, %v8507_v30 }
 0xd3d   :  { %8508 = vrcp.f32 %v2282_v12  ;;  %v2756_v12 = vld [vmem:[#allocation6 + $0xe8] sm:$0xff] }
 0xd47   :  { %v8509_v33 = vpop.eup %8508 }
 0xd48   :  { %v2286_v3 = vmul.f32 %v8509_v33, %v2285_v41  ;;  %v2755_v41 = vld [vmem:[#allocation6 + $0xe0] sm:$0xff]  ;;  %v2603_v33 = vld [vmem:[#allocation6 + $0x70] sm:$0xff] }
 0xd4a   :  { %v9615_v27 = vadd.f32 %v8503_v21, %v2286_v3  ;;  %v2602_v21 = vld [vmem:[#allocation6 + $0x68] sm:$0xff]  ;;  %v2604_v3 = vld [vmem:[#allocation6 + $0x78] sm:$0xff] }
 0xd4b   :  { %v7750_v30 = vpack.c.bf16 %v2602_v21, %v2601_v6  ;;  %v2861_v6 = vld [vmem:[#allocation8 + $0xe0] sm:$0xff] }
 0xd4c   :  { %6397 = vmatmul.mubr.f32.vlgmr.msra.gmra.mrb[20].mxu0 %v9615_v27  ;;  %v9720_v21 = vpack.c.bf16 %v2861_v6, %v2858_v35 }
 0xd4d   :  { %7704 = vmatpush3.bf16.msra.mxu0 %v9531_v47  ;;  %6431 = vmatprep.mubr.msk.f32.mxu0 %vm8680_vm1, %v8678_v0  ;;  %v2590_v47 = vld [vmem:[#allocation6 + $0x8] sm:$0xff] }
 0xd4e   :  { %7705 = vmatprep.subr.bf16.mxu0 %v8679_v9 }
 0xd51   :  { %7707 = vmatpush3.bf16.msra.mxu0 %v9537_v14  ;;  %v7726_v14 = vpack.c.bf16 %v2590_v47, %v2589_v11  ;;  %v9663_v11 = vpack.c.bf16 %v2756_v12, %v2755_v41  ;;  %v7754_v47 = vpack.c.bf16 %v2604_v3, %v2603_v33  ;;  %v2860_v41 = vld [vmem:[#allocation8 + $0xd8] sm:$0xff]  ;;  %v2859_v12 = vld [vmem:[#allocation8 + $0xd0] sm:$0xff]  ;;  %v2862_v3 = vld [vmem:[#allocation8 + $0xe8] sm:$0xff] }
 0xd52   :  { %7708 = vmatprep.subr.bf16.mxu0 %v8679_v9 }
 0xd53   :  { %7727 = vmatprep.subr.bf16.mxu1 %v7726_v14 }
 0xd55   :  { %7710 = vmatpush3.bf16.msra.mxu0 %v9543_v8 }
 0xd56   :  { %7711 = vmatprep.subr.bf16.mxu0 %v8679_v9 }
 0xd59   :  { %7713 = vmatpush3.bf16.msra.mxu0 %v9547_v52 }
 0xd5a   :  { %7714 = vmatprep.subr.bf16.mxu0 %v8679_v9 }
 0xd5d   :  { %7716 = vmatpush3.bf16.msra.mxu0 %v9557_v16  ;;  %v2743_v16 = vld [vmem:[#allocation6 + $0x80] sm:$0xff] }
 0xd5e   :  { %7717 = vmatprep.subr.bf16.mxu0 %v8679_v9  ;;  %v9637_v34 = vpack.c.bf16 %v2744_v53, %v2743_v16  ;;  %v2833_v16 = vld [vmem:[#allocation8] sm:$0xff] }
 0xd61   :  { %7719 = vmatpush3.bf16.msra.mxu0 %v9567_v5  ;;  %v2592_v5 = vld [vmem:[#allocation6 + $0x18] sm:$0xff] }
 0xd62   :  { %7720 = vmatprep.subr.bf16.mxu0 %v8679_v9  ;;  %v7730_v46 = vpack.c.bf16 %v2592_v5, %v2591_v31  ;;  %v2838_v31 = vld [vmem:[#allocation8 + $0x28] sm:$0xff] }
 0xd65   :  { %7722 = vmatpush3.bf16.msra.mxu0 %v9572_v36  ;;  %v2746_v36 = vld [vmem:[#allocation6 + $0x98] sm:$0xff] }
 0xd66   :  { %7723 = vmatprep.subr.bf16.mxu0 %v8679_v9 }
 0xd69   :  { %7725 = vmatpush3.bf16.msra.mxu0 %v9576_v22  ;;  %v2749_v22 = vld [vmem:[#allocation6 + $0xb0] sm:$0xff] }
 0xd6a   :  { %7758 = vmatprep.subr.bf16.mxu0 %v8679_v9  ;;  %v9651_v10 = vpack.c.bf16 %v2750_v26, %v2749_v22 }
 0xe1f   :  { %v2372_v8 = vpop.f32.mrb[20].mxu0 }
 0xe20   :  { %v2376_v52 = vadd.f32 %v2372_v8, %v8986_v25  ;;  %v6398_v43 = vpop.f32.mrb[21].mxu0  ;;  %v9641_v25 = vpack.c.bf16 %v2746_v36, %v2745_v18  ;;  %v2758_v8 = vld [vmem:[#allocation6 + $0xf8] sm:$0xff] }
 0xe21   :  { %v2834_v43 = vld [vmem:[#allocation8 + $0x8] sm:$0xff]  ;;  %v2844_v18 = vld [vmem:[#allocation8 + $0x58] sm:$0xff] }
 0xe22   :  { %v2377_v4 = vmul.f32 0.666, %v2376_v52 }
 0xe24   :  { %8510 = vtanh.f32 %v2377_v4  ;;  %v2837_v4 = vld [vmem:[#allocation8 + $0x20] sm:$0xff] }
 0xe25   :  { %v9681_v53 = vpack.c.bf16 %v2837_v4, %v2834_v43  ;;  %v2863_v4 = vld [vmem:[#allocation8 + $0xf0] sm:$0xff] }
 0xe2e   :  { %v8511_v48 = vpop.eup %8510 }
 0xe2f   :  { %v2379_v60 = vmul.f32 1.7159, %v8511_v48 }
 0xe31   :  { %2493 = vmatmul.mubr.f32.vlgmr.msra.gmra.mrb[30].mxu1 %v2379_v60  ;;  %6432 = vmatmul.mubr.f32.vlgmr.msra.gmra.mrb[22].mxu0 %v2379_v60  ;;  %v2840_v60 = vld [vmem:[#allocation8 + $0x38] sm:$0xff] }
 0xe32   :  { %7729 = vmatpush3.bf16.msra.mxu1 %v7726_v14  ;;  %6466 = vmatprep.mubr.f32.mxu1 %v9048_v55  ;;  %v9647_v55 = vpack.c.bf16 %v2748_v17, %v2747_v38  ;;  %v2757_v14 = vld [vmem:[#allocation6 + $0xf0] sm:$0xff]  ;;  %v2845_v38 = vld [vmem:[#allocation8 + $0x60] sm:$0xff] }
 0xe33   :  { %7760 = vmatpush3.bf16.msra.mxu0 %v9637_v34  ;;  %7731 = vmatprep.subr.bf16.mxu1 %v7730_v46  ;;  %v9667_v52 = vpack.c.bf16 %v2758_v8, %v2757_v14  ;;  %v9702_v22 = vpack.c.bf16 %v2848_v37, %v2845_v38  ;;  %v2864_v14 = vld [vmem:[#allocation8 + $0xf8] sm:$0xff]  ;;  %v2867_v8 = vld [vmem:[#allocation8 + $0x110] sm:$0xff]  ;;  %v2874_v38 = vld [vmem:[#allocation8 + $0x148] sm:$0xff] }
 0xe34   :  { %7761 = vmatprep.subr.bf16.mxu0 %v8679_v9  ;;  %6510 = vmatprep.mubr.msk.f32.mxu0 %vm8680_vm1, %v8678_v0  ;;  %v9730_v43 = vpack.c.bf16 %v2867_v8, %v2864_v14 }
 0xe36   :  { %7733 = vmatpush3.bf16.msra.mxu1 %v7730_v46  ;;  %v2839_v46 = vld [vmem:[#allocation8 + $0x30] sm:$0xff] }
 0xe37   :  { %7763 = vmatpush3.bf16.msra.mxu0 %v9641_v25  ;;  %7735 = vmatprep.subr.bf16.mxu1 %v7734_v61 }
 0xe38   :  { %7764 = vmatprep.subr.bf16.mxu0 %v8679_v9 }
 0xe3a   :  { %7737 = vmatpush3.bf16.msra.mxu1 %v7734_v61  ;;  %v2849_v61 = vld [vmem:[#allocation8 + $0x80] sm:$0xff] }
 0xe3b   :  { %7766 = vmatpush3.bf16.msra.mxu0 %v9647_v55  ;;  %7739 = vmatprep.subr.bf16.mxu1 %v7738_v15  ;;  %v9698_v17 = vpack.c.bf16 %v2849_v61, %v2846_v19  ;;  %v2871_v19 = vld [vmem:[#allocation8 + $0x130] sm:$0xff] }
 0xe3c   :  { %7767 = vmatprep.subr.bf16.mxu0 %v8679_v9  ;;  %v9746_v37 = vpack.c.bf16 %v2874_v38, %v2871_v19 }
 0xe3e   :  { %7741 = vmatpush3.bf16.msra.mxu1 %v7738_v15  ;;  %v2850_v15 = vld [vmem:[#allocation8 + $0x88] sm:$0xff] }
 0xe3f   :  { %7769 = vmatpush3.bf16.msra.mxu0 %v9651_v10  ;;  %7743 = vmatprep.subr.bf16.mxu1 %v7742_v23  ;;  %v9704_v26 = vpack.c.bf16 %v2850_v15, %v2847_v39  ;;  %v2876_v39 = vld [vmem:[#allocation8 + $0x158] sm:$0xff]  ;;  %v2879_v15 = vld [vmem:[#allocation8 + $0x170] sm:$0xff] }
 0xe40   :  { %7770 = vmatprep.subr.bf16.mxu0 %v8679_v9 }
 0xe42   :  { %7745 = vmatpush3.bf16.msra.mxu1 %v7742_v23  ;;  %v9710_v23 = vpack.c.bf16 %v2855_v42, %v2852_v62  ;;  %v9750_v62 = vpack.c.bf16 %v2879_v15, %v2876_v39  ;;  %v2875_v42 = vld [vmem:[#allocation8 + $0x150] sm:$0xff] }
 0xe43   :  { %7772 = vmatpush3.bf16.msra.mxu0 %v9655_v57  ;;  %7747 = vmatprep.subr.bf16.mxu1 %v7746_v28 }
 0xe44   :  { %7773 = vmatprep.subr.bf16.mxu0 %v8679_v9 }
 0xe46   :  { %7749 = vmatpush3.bf16.msra.mxu1 %v7746_v28  ;;  %v2856_v28 = vld [vmem:[#allocation8 + $0xb8] sm:$0xff] }
 0xe47   :  { %7775 = vmatpush3.bf16.msra.mxu0 %v9659_v45  ;;  %7751 = vmatprep.subr.bf16.mxu1 %v7750_v30  ;;  %v9716_v40 = vpack.c.bf16 %v2856_v28, %v2853_v51  ;;  %v9753_v51 = vpack.c.bf16 %v2878_v32, %v2875_v42  ;;  %v2880_v28 = vld [vmem:[#allocation8 + $0x178] sm:$0xff] }
 0xe48   :  { %7776 = vmatprep.subr.bf16.mxu0 %v8679_v9  ;;  %v9756_v35 = vpack.c.bf16 %v2880_v28, %v2877_v29 }
 0xe4a   :  { %7753 = vmatpush3.bf16.msra.mxu1 %v7750_v30  ;;  %v2857_v30 = vld [vmem:[#allocation8 + $0xc0] sm:$0xff] }
 0xe4b   :  { %7778 = vmatpush3.bf16.msra.mxu0 %v9663_v11  ;;  %7755 = vmatprep.subr.bf16.mxu1 %v7754_v47  ;;  %v9723_v33 = vpack.c.bf16 %v2860_v41, %v2857_v30 }
 0xe4c   :  { %7779 = vmatprep.subr.bf16.mxu0 %v8679_v9 }
 0xe4e   :  { %7757 = vmatpush3.bf16.msra.mxu1 %v7754_v47  ;;  %v9726_v47 = vpack.c.bf16 %v2862_v3, %v2859_v12 }
 0xe4f   :  { %7781 = vmatpush3.bf16.msra.mxu0 %v9667_v52  ;;  %7783 = vmatprep.subr.bf16.mxu1 %v9681_v53 }
 0xe50   :  { %7814 = vmatprep.subr.bf16.mxu0 %v8679_v9 }
 0xe51   :  { %6467 = vmatmul.mubr.f32.vlgmr.msra.gmra.mrb[32].mxu1 %v9108_v7  ;;  %v2836_v7 = vld [vmem:[#allocation8 + $0x18] sm:$0xff] }
 0xe52   :  { %6469 = vmatprep.mubr.f32.mxu1 %v9241_v24  ;;  %6511 = vmatmul.mubr.f32.vlgmr.msra.gmra.mrb[24].mxu0 %v8678_v0  ;;  %v2835_v24 = vld [vmem:[#allocation8 + $0x10] sm:$0xff]  ;;  %v9683_v5 = vpack.c.bf16 %v2836_v7, %v2833_v16  ;;  %v2866_v16 = vld [vmem:[#allocation8 + $0x108] sm:$0xff]  ;;  %v2865_v7 = vld [vmem:[#allocation8 + $0x100] sm:$0xff] }
 0xe53   :  { %6545 = vmatprep.mubr.msk.f32.mxu0 %vm8680_vm1, %v8678_v0  ;;  %v9685_v48 = vpack.c.bf16 %v2838_v31, %v2835_v24  ;;  %v9733_v24 = vpack.c.bf16 %v2866_v16, %v2863_v4  ;;  %v2868_v31 = vld [vmem:[#allocation8 + $0x118] sm:$0xff] }
 0xe54   :  { %7785 = vmatpush1.bf16.msra.mxu1 %v9683_v5 }
 0xe55   :  { %6470 = vmatmul.mubr.f32.gmra.mrb[34].mxu1 %v9340_v13  ;;  %v2843_v13 = vld [vmem:[#allocation8 + $0x50] sm:$0xff]  ;;  %7816 = vmatpush3.bf16.msra.mxu0 %v9685_v48 }
 0xe56   :  { %6472 = vmatprep.mubr.f32.mxu1 %v9400_v2  ;;  %v9688_v2 = vpack.c.bf16 %v2843_v13, %v2840_v60  ;;  %7817 = vmatprep.subr.bf16.mxu0 %v8679_v9  ;;  %v9736_v60 = vpack.c.bf16 %v2868_v31, %v2865_v7  ;;  %v2870_v13 = vld [vmem:[#allocation8 + $0x128] sm:$0xff] }
 0xe58   :  { %7787 = vmatprep.subr.bf16.mxu1 %v9688_v2 }
 0xe59   :  { %6473 = vmatmul.mubr.f32.gmra.mrb[36].mxu1 %v9533_v56  ;;  %v2842_v56 = vld [vmem:[#allocation8 + $0x48] sm:$0xff] }
 0xe5a   :  { %6475 = vmatprep.mubr.f32.mxu1 %v9615_v27  ;;  %v2841_v27 = vld [vmem:[#allocation8 + $0x40] sm:$0xff]  ;;  %v9692_v36 = vpack.c.bf16 %v2842_v56, %v2839_v46 }
 0xe5b   :  { %v9694_v20 = vpack.c.bf16 %v2844_v18, %v2841_v27  ;;  %v2873_v46 = vld [vmem:[#allocation8 + $0x140] sm:$0xff]  ;;  %v2872_v18 = vld [vmem:[#allocation8 + $0x138] sm:$0xff] }
 0xe5c   :  { %7789 = vmatpush1.bf16.msra.mxu1 %v9692_v36  ;;  %v9740_v56 = vpack.c.bf16 %v2873_v46, %v2870_v13  ;;  %v2869_v27 = vld [vmem:[#allocation8 + $0x120] sm:$0xff] }
 0xe5d   :  { %7819 = vmatpush3.bf16.msra.mxu0 %v9694_v20  ;;  %7791 = vmatprep.subr.bf16.mxu1 %v9698_v17  ;;  %v9743_v61 = vpack.c.bf16 %v2872_v18, %v2869_v27 }
 0xe5e   :  { %7820 = vmatprep.subr.bf16.mxu0 %v8679_v9 }
 0xe60   :  { %7793 = vmatpush1.bf16.msra.mxu1 %v9702_v22 }
 0xe61   :  { %7822 = vmatpush3.bf16.msra.mxu0 %v9704_v26  ;;  %7795 = vmatprep.subr.bf16.mxu1 %v9710_v23 }
 0xe62   :  { %7823 = vmatprep.subr.bf16.mxu0 %v8679_v9 }
 0xe64   :  { %7797 = vmatpush1.bf16.msra.mxu1 %v9713_v44 }
 0xe65   :  { %7825 = vmatpush3.bf16.msra.mxu0 %v9716_v40  ;;  %7799 = vmatprep.subr.bf16.mxu1 %v9720_v21 }
 0xe66   :  { %7826 = vmatprep.subr.bf16.mxu0 %v8679_v9 }
 0xe68   :  { %7801 = vmatpush1.bf16.msra.mxu1 %v9723_v33 }
 0xe69   :  { %7828 = vmatpush3.bf16.msra.mxu0 %v9726_v47  ;;  %7803 = vmatprep.subr.bf16.mxu1 %v9730_v43 }
 0xe6a   :  { %7829 = vmatprep.subr.bf16.mxu0 %v8679_v9 }
 0xe6c   :  { %7805 = vmatpush1.bf16.msra.mxu1 %v9733_v24 }
 0xe6d   :  { %7831 = vmatpush3.bf16.msra.mxu0 %v9736_v60  ;;  %7807 = vmatprep.subr.bf16.mxu1 %v9740_v56 }
 0xe6e   :  { %7832 = vmatprep.subr.bf16.mxu0 %v8679_v9 }
 0xe70   :  { %7809 = vmatpush1.bf16.msra.mxu1 %v9743_v61 }
 0xe71   :  { %7834 = vmatpush3.bf16.msra.mxu0 %v9746_v37  ;;  %7811 = vmatprep.subr.bf16.mxu1 %v9750_v62 }
 0xe72   :  { %7835 = vmatprep.subr.bf16.mxu0 %v8679_v9 }
 0xe74   :  { %7813 = vmatpush1.bf16.msra.mxu1 %v9753_v51 }
 0xe75   :  { %7837 = vmatpush3.bf16.msra.mxu0 %v9756_v35  ;;  %7838 = vmatprep.subr.bf16.mxu1 %v8679_v9 }
 0xe76   :  { %7863 = vmatprep.subr.bf16.mxu0 %v9681_v53 }
 0xf04   :  { %v2494_v6 = vpop.f32.mrb[30].mxu1  ;;  %v2565_v30 = vpop.f32.mrb[22].mxu0 }
 0xf05   :  { %v2495_v41 = vadd.f32 %v2494_v6, %v9035_v59  ;;  %v2566_v12 = vadd.f32 %v2565_v30, %v9039_v63  ;;  %v2496_v3 = vpop.f32.mrb[31].mxu1  ;;  %v6433_v14 = vpop.f32.mrb[23].mxu0  ;;  %v9768_v59 = vld [vmem:[%s10442_s6] ss:$0 sm:$0xff] }
 0xf06   :  { %v2497_v8 = vadd.f32 %v2496_v3, %v9043_v1 }
 0xf07   :  { %8512 = vtanh.f32 %v2495_v41  ;;  %v5245_v4 = vmul.f32 -1.442695, %v2566_v12 }
 0xf08   :  { %8514 = vtanh.f32 %v2497_v8  ;;  %v2725_v8 = vld [vmem:[%s10442_s6 + $0x1] sm:$0x7] }
 0xf09   :  { %8516 = vpow2.f32 %v5245_v4  ;;  %v9826_v4 = vrot.slane %v2725_v8, %v232_v50 }
 0xf11   :  { %v8513_v16 = vpop.eup %8512 }
 0xf12   :  { %v8515_v7 = vpop.eup %8514 }
 0xf13   :  { %v8517_v31 = vpop.eup %8516  ;;  %v2577_v13 = vsub.f32 %v8515_v7, %v8513_v16  ;;  %v9834_v7 = vrot.slane %v2725_v8, %v236_v58 }
 0xf14   :  { %v2574_v46 = vadd.f32 1.0, %v8517_v31 }
 0xf16   :  { %8518 = vrcp.f32 %v2574_v46 }
 0xf20   :  { %v8519_v27 = vpop.eup %8518 }
 0xf21   :  { %v2578_v18 = vmul.f32 %v8519_v27, %v2577_v13 }
 0xf23   :  { %v2579_v63 = vadd.f32 %v8513_v16, %v2578_v18  ;;  %v9830_v16 = vrot.slane %v2725_v8, %v240_v54 }
 0xf24   :  { %v9770_v19 = vpop.f32.mrb[32].mxu1 }
 0xf25   :  { %v2678_v1 = vpop.f32.mrb[33].mxu1  ;;  %6476 = vmatmul.mubr.f32.gmra.mrb[38].mxu1 %v2579_v63  ;;  %v2825_v38 = vpop.f32.mrb[24].mxu0 }
 0xf26   :  { %v2679_v39 = vadd.f32 %v9768_v59, %v2678_v1  ;;  %v6512_v15 = vpop.f32.mrb[25].mxu0  ;;  %2945 = vmatprep.mubr.f32.mxu1 %v8678_v0 }
 0xf28   :  { %v2829_v42 = vadd.f32 %v2825_v38, %v2679_v39  ;;  %v9774_v32 = vpop.f32.mrb[34].mxu1 }
 0xf29   :  { %v9776_v29 = vpop.f32.mrb[35].mxu1 }
 0xf2a   :  { %v2830_v28 = vmul.f32 0.666, %v2829_v42 }
 0xf2c   :  { %8520 = vtanh.f32 %v2830_v28  ;;  %v9778_v6 = vpop.f32.mrb[36].mxu1 }
 0xf2d   :  { %v9780_v30 = vpop.f32.mrb[37].mxu1 }
 0xf36   :  { %v8521_v41 = vpop.eup %8520 }
 0xf37   :  { %v2832_v12 = vmul.f32 1.7159, %v8521_v41  ;;  %v2684_v41 = vadd.f32 %v9770_v19, %v9768_v59  ;;  %v3625_v19 = vld [vmem:[#allocation6 + $0xb0] sm:$0xff] }
 0xf39   :  { %2946 = vmatmul.mubr.f32.vlgmr.msra.gmra.mrb[40].mxu1 %v2832_v12  ;;  %6546 = vmatmul.mubr.f32.vlgmr.msra.gmra.mrb[26].mxu0 %v2832_v12 }
 0xf3a   :  { %7840 = vmatpush3.bf16.msra.mxu1 %v9637_v34  ;;  %6580 = vmatprep.mubr.msk.f32.mxu1 %vm8680_vm1, %v8678_v0 }
 0xf3b   :  { %7841 = vmatprep.subr.bf16.mxu1 %v8679_v9  ;;  %7865 = vmatpush1.bf16.msra.mxu0 %v9683_v5 }
 0xf3c   :  { %7867 = vmatprep.subr.bf16.mxu0 %v9688_v2  ;;  %3237 = vmatprep.mubr.f32.mxu0 %v8678_v0 }
 0xf3e   :  { %7843 = vmatpush3.bf16.msra.mxu1 %v9641_v25 }
 0xf3f   :  { %7844 = vmatprep.subr.bf16.mxu1 %v8679_v9  ;;  %7869 = vmatpush1.bf16.msra.mxu0 %v9692_v36 }
 0xf40   :  { %7871 = vmatprep.subr.bf16.mxu0 %v9698_v17 }
 0xf42   :  { %7846 = vmatpush3.bf16.msra.mxu1 %v9647_v55 }
 0xf43   :  { %7847 = vmatprep.subr.bf16.mxu1 %v8679_v9  ;;  %7873 = vmatpush1.bf16.msra.mxu0 %v9702_v22 }
 0xf44   :  { %7875 = vmatprep.subr.bf16.mxu0 %v9710_v23 }
 0xf46   :  { %7849 = vmatpush3.bf16.msra.mxu1 %v9651_v10 }
 0xf47   :  { %7850 = vmatprep.subr.bf16.mxu1 %v8679_v9  ;;  %7877 = vmatpush1.bf16.msra.mxu0 %v9713_v44 }
 0xf48   :  { %7879 = vmatprep.subr.bf16.mxu0 %v9720_v21 }
 0xf4a   :  { %7852 = vmatpush3.bf16.msra.mxu1 %v9655_v57 }
 0xf4b   :  { %7853 = vmatprep.subr.bf16.mxu1 %v8679_v9  ;;  %7881 = vmatpush1.bf16.msra.mxu0 %v9723_v33 }
 0xf4c   :  { %7883 = vmatprep.subr.bf16.mxu0 %v9730_v43 }
 0xf4e   :  { %7855 = vmatpush3.bf16.msra.mxu1 %v9659_v45 }
 0xf4f   :  { %7856 = vmatprep.subr.bf16.mxu1 %v8679_v9  ;;  %7885 = vmatpush1.bf16.msra.mxu0 %v9733_v24 }
 0xf50   :  { %7887 = vmatprep.subr.bf16.mxu0 %v9740_v56 }
 0xf52   :  { %7858 = vmatpush3.bf16.msra.mxu1 %v9663_v11 }
 0xf53   :  { %7859 = vmatprep.subr.bf16.mxu1 %v8679_v9  ;;  %7889 = vmatpush1.bf16.msra.mxu0 %v9743_v61 }
 0xf54   :  { %7891 = vmatprep.subr.bf16.mxu0 %v9750_v62 }
 0xf56   :  { %7861 = vmatpush3.bf16.msra.mxu1 %v9667_v52 }
 0xf57   :  { %7894 = vmatprep.subr.bf16.mxu1 %v8679_v9  ;;  %7893 = vmatpush1.bf16.msra.mxu0 %v9753_v51 }
 0xf58   :  { %7918 = vmatprep.subr.bf16.mxu0 %v8679_v9 }
 0xff8   :  { %v9817_v3 = vpop.f32.mrb[38].mxu1 }
 0xff9   :  { %v9819_v14 = vpop.f32.mrb[39].mxu1 }
0x100c   :  { %v2947_v31 = vpop.f32.mrb[40].mxu1  ;;  %v3018_v13 = vpop.f32.mrb[26].mxu0 }
0x100d   :  { %v2948_v46 = vadd.f32 %v2947_v31, %v9826_v4  ;;  %v3019_v27 = vadd.f32 %v3018_v13, %v9830_v16  ;;  %v2949_v18 = vpop.f32.mrb[41].mxu1  ;;  %v6547_v63 = vpop.f32.mrb[27].mxu0 }
0x100e   :  { %v2950_v1 = vadd.f32 %v2949_v18, %v9834_v7  ;;  %v3627_v63 = vld [vmem:[#allocation6 + $0xc0] sm:$0xff] }
0x100f   :  { %8522 = vtanh.f32 %v2948_v46  ;;  %v5247_v50 = vmul.f32 -1.442695, %v3019_v27 }
0x1010   :  { %8524 = vtanh.f32 %v2950_v1  ;;  %v3628_v1 = vld [vmem:[#allocation6 + $0xc8] sm:$0xff] }
0x1011   :  { %8526 = vpow2.f32 %v5247_v50  ;;  %v9941_v50 = vpack.c.bf16 %v3628_v1, %v3627_v63 }
0x1019   :  { %v8523_v54 = vpop.eup %8522 }
0x101a   :  { %v8525_v38 = vpop.eup %8524 }
0x101b   :  { %v8527_v39 = vpop.eup %8526  ;;  %v3030_v49 = vsub.f32 %v8525_v38, %v8523_v54  ;;  %v3630_v38 = vld [vmem:[#allocation6 + $0xd8] sm:$0xff] }
0x101c   :  { %v3027_v58 = vadd.f32 1.0, %v8527_v39 }
0x101e   :  { %8528 = vrcp.f32 %v3027_v58  ;;  %v3632_v58 = vld [vmem:[#allocation6 + $0xe8] sm:$0xff] }
0x1028   :  { %v8529_v15 = vpop.eup %8528 }
0x1029   :  { %v3031_v42 = vmul.f32 %v8529_v15, %v3030_v49  ;;  %v3631_v49 = vld [vmem:[#allocation6 + $0xe0] sm:$0xff] }
0x102a   :  { %v9948_v15 = vpack.c.bf16 %v3632_v58, %v3631_v49 }
0x102b   :  { %v9839_v28 = vadd.f32 %v8523_v54, %v3031_v42  ;;  %v3629_v54 = vld [vmem:[#allocation6 + $0xd0] sm:$0xff] }
0x102c   :  { %v9945_v39 = vpack.c.bf16 %v3630_v38, %v3629_v54  ;;  %v3633_v42 = vld [vmem:[#allocation6 + $0xf0] sm:$0xff]  ;;  %v3714_v38 = vld [vmem:[#allocation8 + $0x28] sm:$0xff] }
0x102d   :  { %6581 = vmatmul.mubr.f32.vlgmr.msra.gmra.mrb[42].mxu1 %v9839_v28  ;;  %v3711_v54 = vld [vmem:[#allocation8 + $0x10] sm:$0xff] }
0x102e   :  { %7896 = vmatpush3.bf16.msra.mxu1 %v9685_v48  ;;  %6615 = vmatprep.mubr.msk.f32.mxu1 %vm8680_vm1, %v8678_v0 }
0x102f   :  { %7897 = vmatprep.subr.bf16.mxu1 %v8679_v9 }
0x1032   :  { %7899 = vmatpush3.bf16.msra.mxu1 %v9694_v20 }
0x1033   :  { %7900 = vmatprep.subr.bf16.mxu1 %v8679_v9 }
0x1036   :  { %7902 = vmatpush3.bf16.msra.mxu1 %v9704_v26 }
0x1037   :  { %7903 = vmatprep.subr.bf16.mxu1 %v8679_v9 }
0x103a   :  { %7905 = vmatpush3.bf16.msra.mxu1 %v9716_v40 }
0x103b   :  { %7906 = vmatprep.subr.bf16.mxu1 %v8679_v9 }
0x103e   :  { %7908 = vmatpush3.bf16.msra.mxu1 %v9726_v47 }
0x103f   :  { %7909 = vmatprep.subr.bf16.mxu1 %v8679_v9 }
0x1042   :  { %7911 = vmatpush3.bf16.msra.mxu1 %v9736_v60 }
0x1043   :  { %7912 = vmatprep.subr.bf16.mxu1 %v8679_v9 }
0x1046   :  { %7914 = vmatpush3.bf16.msra.mxu1 %v9746_v37 }
0x1047   :  { %7915 = vmatprep.subr.bf16.mxu1 %v8679_v9 }
0x104a   :  { %7917 = vmatpush3.bf16.msra.mxu1 %v9756_v35 }
0x104b   :  { %7943 = vmatprep.subr.bf16.mxu1 %v9681_v53 }
0x1100   :  { %v3117_v12 = vpop.f32.mrb[42].mxu1 }
0x1101   :  { %v3121_v8 = vadd.f32 %v3117_v12, %v2684_v41  ;;  %v6582_v31 = vpop.f32.mrb[43].mxu1  ;;  %v3634_v41 = vld [vmem:[#allocation6 + $0xf8] sm:$0xff] }
0x1102   :  { %v9952_v12 = vpack.c.bf16 %v3634_v41, %v3633_v42  ;;  %v3713_v31 = vld [vmem:[#allocation8 + $0x20] sm:$0xff]  ;;  %v9984_v42 = vpack.c.bf16 %v3714_v38, %v3711_v54 }
0x1103   :  { %v3122_v13 = vmul.f32 0.666, %v3121_v8  ;;  %v3710_v8 = vld [vmem:[#allocation8 + $0x8] sm:$0xff]  ;;  %v3745_v38 = vld [vmem:[#allocation8 + $0x120] sm:$0xff] }
0x1105   :  { %8530 = vtanh.f32 %v3122_v13  ;;  %v3709_v13 = vld [vmem:[#allocation8] sm:$0xff] }
0x110f   :  { %v8531_v46 = vpop.eup %8530 }
0x1110   :  { %v3124_v27 = vmul.f32 1.7159, %v8531_v46  ;;  %v9957_v46 = vpack.c.bf16 %v3713_v31, %v3710_v8  ;;  %v3717_v8 = vld [vmem:[#allocation8 + $0x40] sm:$0xff]  ;;  %v3720_v31 = vld [vmem:[#allocation8 + $0x58] sm:$0xff] }
0x1112   :  { %3238 = vmatmul.mubr.f32.vlgmr.msra.gmra.mrb[28].mxu0 %v3124_v27  ;;  %6616 = vmatmul.mubr.f32.vlgmr.msra.gmra.mrb[44].mxu1 %v3124_v27  ;;  %v3712_v27 = vld [vmem:[#allocation8 + $0x18] sm:$0xff] }
0x1113   :  { %7920 = vmatpush3.bf16.msra.mxu0 %v9637_v34  ;;  %6650 = vmatprep.mubr.msk.f32.mxu0 %vm8680_vm1, %v8678_v0 }
0x1114   :  { %7921 = vmatprep.subr.bf16.mxu0 %v8679_v9  ;;  %7945 = vmatpush1.bf16.msra.mxu1 %v9683_v5 }
0x1115   :  { %7947 = vmatprep.subr.bf16.mxu1 %v9688_v2  ;;  %3529 = vmatprep.mubr.f32.mxu1 %v8678_v0 }
0x1117   :  { %7923 = vmatpush3.bf16.msra.mxu0 %v9641_v25 }
0x1118   :  { %7924 = vmatprep.subr.bf16.mxu0 %v8679_v9  ;;  %7949 = vmatpush1.bf16.msra.mxu1 %v9692_v36 }
0x1119   :  { %7951 = vmatprep.subr.bf16.mxu1 %v9698_v17 }
0x111b   :  { %7926 = vmatpush3.bf16.msra.mxu0 %v9647_v55 }
0x111c   :  { %7927 = vmatprep.subr.bf16.mxu0 %v8679_v9  ;;  %7953 = vmatpush1.bf16.msra.mxu1 %v9702_v22 }
0x111d   :  { %7955 = vmatprep.subr.bf16.mxu1 %v9710_v23 }
0x111f   :  { %7929 = vmatpush3.bf16.msra.mxu0 %v9651_v10 }
0x1120   :  { %7930 = vmatprep.subr.bf16.mxu0 %v8679_v9  ;;  %7957 = vmatpush1.bf16.msra.mxu1 %v9713_v44 }
0x1121   :  { %7959 = vmatprep.subr.bf16.mxu1 %v9720_v21 }
0x1123   :  { %7932 = vmatpush3.bf16.msra.mxu0 %v9655_v57 }
0x1124   :  { %7933 = vmatprep.subr.bf16.mxu0 %v8679_v9  ;;  %7961 = vmatpush1.bf16.msra.mxu1 %v9723_v33 }
0x1125   :  { %7963 = vmatprep.subr.bf16.mxu1 %v9730_v43  ;;  %v3619_v43 = vld [vmem:[#allocation6 + $0x80] sm:$0xff] }
0x1127   :  { %7935 = vmatpush3.bf16.msra.mxu0 %v9659_v45 }
0x1128   :  { %7936 = vmatprep.subr.bf16.mxu0 %v8679_v9  ;;  %7965 = vmatpush1.bf16.msra.mxu1 %v9733_v24  ;;  %v3620_v24 = vld [vmem:[#allocation6 + $0x88] sm:$0xff] }
0x1129   :  { %7967 = vmatprep.subr.bf16.mxu1 %v9740_v56  ;;  %v3621_v56 = vld [vmem:[#allocation6 + $0x90] sm:$0xff] }
0x112b   :  { %7938 = vmatpush3.bf16.msra.mxu0 %v9663_v11 }
0x112c   :  { %7939 = vmatprep.subr.bf16.mxu0 %v8679_v9  ;;  %7969 = vmatpush1.bf16.msra.mxu1 %v9743_v61  ;;  %v3622_v61 = vld [vmem:[#allocation6 + $0x98] sm:$0xff] }
0x112d   :  { %7971 = vmatprep.subr.bf16.mxu1 %v9750_v62  ;;  %v3623_v62 = vld [vmem:[#allocation6 + $0xa0] sm:$0xff] }
0x112f   :  { %7941 = vmatpush3.bf16.msra.mxu0 %v9667_v52 }
0x1130   :  { %7974 = vmatprep.subr.bf16.mxu0 %v8679_v9  ;;  %7973 = vmatpush1.bf16.msra.mxu1 %v9753_v51  ;;  %v3624_v51 = vld [vmem:[#allocation6 + $0xa8] sm:$0xff] }
0x1131   :  { %7998 = vmatprep.subr.bf16.mxu1 %v8679_v9 }
0x11e5   :  { %v3239_v34 = vpop.f32.mrb[28].mxu0  ;;  %v3310_v25 = vpop.f32.mrb[44].mxu1 }
0x11e6   :  { %v3240_v55 = vadd.f32 %v3239_v34, %v9826_v4  ;;  %v3311_v10 = vadd.f32 %v3310_v25, %v9830_v16  ;;  %v3241_v57 = vpop.f32.mrb[29].mxu0  ;;  %v6617_v45 = vpop.f32.mrb[45].mxu1  ;;  %v9959_v34 = vpack.c.bf16 %v3712_v27, %v3709_v13  ;;  %v3716_v25 = vld [vmem:[#allocation8 + $0x38] sm:$0xff]  ;;  %v9990_v13 = vpack.c.bf16 %v3720_v31, %v3717_v8  ;;  %v3723_v27 = vld [vmem:[#allocation8 + $0x70] sm:$0xff]  ;;  %v3750_v31 = vld [vmem:[#allocation8 + $0x148] sm:$0xff] }
0x11e7   :  { %v3242_v11 = vadd.f32 %v3241_v57, %v9834_v7  ;;  %v3718_v45 = vld [vmem:[#allocation8 + $0x48] sm:$0xff] }
0x11e8   :  { %8532 = vtanh.f32 %v3240_v55  ;;  %v5248_v53 = vmul.f32 -1.442695, %v3311_v10  ;;  %v3719_v55 = vld [vmem:[#allocation8 + $0x50] sm:$0xff] }
0x11e9   :  { %8534 = vtanh.f32 %v3242_v11  ;;  %v3715_v10 = vld [vmem:[#allocation8 + $0x30] sm:$0xff]  ;;  %v9962_v57 = vpack.c.bf16 %v3719_v55, %v3716_v25  ;;  %v3726_v25 = vld [vmem:[#allocation8 + $0x88] sm:$0xff] }
0x11ea   :  { %8536 = vpow2.f32 %v5248_v53  ;;  %v9965_v11 = vpack.c.bf16 %v3718_v45, %v3715_v10  ;;  %v3722_v53 = vld [vmem:[#allocation8 + $0x68] sm:$0xff]  ;;  %v9996_v55 = vpack.c.bf16 %v3726_v25, %v3723_v27  ;;  %v3729_v10 = vld [vmem:[#allocation8 + $0xa0] sm:$0xff]  ;;  %v3732_v45 = vld [vmem:[#allocation8 + $0xb8] sm:$0xff] }
0x11eb   :  { %v3752_v25 = vld [vmem:[#allocation8 + $0x158] sm:$0xff] }
0x11f2   :  { %v8533_v52 = vpop.eup %8532 }
0x11f3   :  { %v8535_v5 = vpop.eup %8534 }
0x11f4   :  { %v8537_v2 = vpop.eup %8536  ;;  %v3322_v36 = vsub.f32 %v8535_v5, %v8533_v52 }
0x11f5   :  { %v3319_v17 = vadd.f32 1.0, %v8537_v2  ;;  %v3721_v2 = vld [vmem:[#allocation8 + $0x60] sm:$0xff] }
0x11f7   :  { %8538 = vrcp.f32 %v3319_v17 }
0x1201   :  { %v8539_v22 = vpop.eup %8538 }
0x1202   :  { %v3323_v23 = vmul.f32 %v8539_v22, %v3322_v36  ;;  %v3724_v36 = vld [vmem:[#allocation8 + $0x78] sm:$0xff] }
0x1203   :  { %v9971_v17 = vpack.c.bf16 %v3724_v36, %v3721_v2  ;;  %v3728_v22 = vld [vmem:[#allocation8 + $0x98] sm:$0xff]  ;;  %v3737_v2 = vld [vmem:[#allocation8 + $0xe0] sm:$0xff] }
0x1204   :  { %v9900_v44 = vadd.f32 %v8533_v52, %v3323_v23  ;;  %v3725_v52 = vld [vmem:[#allocation8 + $0x80] sm:$0xff]  ;;  %v3731_v23 = vld [vmem:[#allocation8 + $0xb0] sm:$0xff] }
0x1205   :  { %v9968_v5 = vpack.c.bf16 %v3725_v52, %v3722_v53  ;;  %v10000_v53 = vpack.c.bf16 %v3732_v45, %v3729_v10  ;;  %v3734_v52 = vld [vmem:[#allocation8 + $0xc8] sm:$0xff]  ;;  %v3755_v10 = vld [vmem:[#allocation8 + $0x170] sm:$0xff] }
0x1206   :  { %6651 = vmatmul.mubr.f32.vlgmr.msra.gmra.mrb[30].mxu0 %v9900_v44  ;;  %v10005_v36 = vpack.c.bf16 %v3737_v2, %v3734_v52  ;;  %v10034_v45 = vpack.c.bf16 %v3755_v10, %v3752_v25  ;;  %v3751_v52 = vld [vmem:[#allocation8 + $0x150] sm:$0xff]  ;;  %v3754_v2 = vld [vmem:[#allocation8 + $0x168] sm:$0xff] }
0x1207   :  { %7976 = vmatpush3.bf16.msra.mxu0 %v9685_v48  ;;  %6685 = vmatprep.mubr.msk.f32.mxu0 %vm8680_vm1, %v8678_v0  ;;  %v2689_v48 = vadd.f32 %v9768_v59, %v9776_v29  ;;  %v3626_v29 = vld [vmem:[#allocation6 + $0xb8] sm:$0xff] }
0x1208   :  { %7977 = vmatprep.subr.bf16.mxu0 %v8679_v9  ;;  %v9937_v18 = vpack.c.bf16 %v3626_v29, %v3625_v19 }
0x120b   :  { %7979 = vmatpush3.bf16.msra.mxu0 %v9694_v20 }
0x120c   :  { %7980 = vmatprep.subr.bf16.mxu0 %v8679_v9 }
0x120f   :  { %7982 = vmatpush3.bf16.msra.mxu0 %v9704_v26 }
0x1210   :  { %7983 = vmatprep.subr.bf16.mxu0 %v8679_v9 }
0x1213   :  { %7985 = vmatpush3.bf16.msra.mxu0 %v9716_v40 }
0x1214   :  { %7986 = vmatprep.subr.bf16.mxu0 %v8679_v9 }
0x1217   :  { %7988 = vmatpush3.bf16.msra.mxu0 %v9726_v47 }
0x1218   :  { %7989 = vmatprep.subr.bf16.mxu0 %v8679_v9 }
0x121b   :  { %7991 = vmatpush3.bf16.msra.mxu0 %v9736_v60  ;;  %v9925_v60 = vpack.c.bf16 %v3620_v24, %v3619_v43 }
0x121c   :  { %7992 = vmatprep.subr.bf16.mxu0 %v8679_v9 }
0x121f   :  { %7994 = vmatpush3.bf16.msra.mxu0 %v9746_v37  ;;  %v9929_v37 = vpack.c.bf16 %v3622_v61, %v3621_v56 }
0x1220   :  { %7995 = vmatprep.subr.bf16.mxu0 %v8679_v9 }
0x1223   :  { %7997 = vmatpush3.bf16.msra.mxu0 %v9756_v35  ;;  %v9933_v35 = vpack.c.bf16 %v3624_v51, %v3623_v62 }
0x1224   :  { %8023 = vmatprep.subr.bf16.mxu0 %v9957_v46 }
0x12d9   :  { %v3409_v20 = vpop.f32.mrb[30].mxu0 }
0x12da   :  { %v3413_v26 = vadd.f32 %v3409_v20, %v2689_v48  ;;  %v6652_v40 = vpop.f32.mrb[31].mxu0  ;;  %v9974_v48 = vpack.c.bf16 %v3731_v23, %v3728_v22  ;;  %v3727_v20 = vld [vmem:[#allocation8 + $0x90] sm:$0xff]  ;;  %v3733_v22 = vld [vmem:[#allocation8 + $0xc0] sm:$0xff]  ;;  %v3736_v23 = vld [vmem:[#allocation8 + $0xd8] sm:$0xff] }
0x12dc   :  { %v3414_v21 = vmul.f32 0.666, %v3413_v26  ;;  %v3730_v26 = vld [vmem:[#allocation8 + $0xa8] sm:$0xff] }
0x12dd   :  { %v9977_v40 = vpack.c.bf16 %v3730_v26, %v3727_v20  ;;  %v3735_v20 = vld [vmem:[#allocation8 + $0xd0] sm:$0xff]  ;;  %v10007_v26 = vpack.c.bf16 %v3736_v23, %v3733_v22  ;;  %v3753_v22 = vld [vmem:[#allocation8 + $0x160] sm:$0xff]  ;;  %v10037_v23 = vpack.c.bf16 %v3754_v2, %v3751_v52 }
0x12de   :  { %8540 = vtanh.f32 %v3414_v21 }
0x12e8   :  { %v8541_v33 = vpop.eup %8540 }
0x12e9   :  { %v3416_v47 = vmul.f32 1.7159, %v8541_v33 }
0x12eb   :  { %3530 = vmatmul.mubr.f32.vlgmr.msra.gmra.mrb[46].mxu1 %v3416_v47  ;;  %6686 = vmatmul.mubr.f32.vlgmr.msra.gmra.mrb[32].mxu0 %v3416_v47 }
0x12ec   :  { %6720 = vmatprep.mubr.msk.f32.mxu1 %vm8680_vm1, %v8678_v0  ;;  %3821 = vmatprep.mubr.f32.mxu0 %v8678_v0 }
0x12ed   :  { %8000 = vmatpush3.bf16.msra.mxu1 %v9925_v60  ;;  %8025 = vmatpush1.bf16.msra.mxu0 %v9959_v34 }
0x12ee   :  { %8001 = vmatprep.subr.bf16.mxu1 %v8679_v9  ;;  %8027 = vmatprep.subr.bf16.mxu0 %v9962_v57 }
0x12f1   :  { %8003 = vmatpush3.bf16.msra.mxu1 %v9929_v37  ;;  %8029 = vmatpush1.bf16.msra.mxu0 %v9965_v11 }
0x12f2   :  { %8004 = vmatprep.subr.bf16.mxu1 %v8679_v9  ;;  %8031 = vmatprep.subr.bf16.mxu0 %v9968_v5 }
0x12f5   :  { %8006 = vmatpush3.bf16.msra.mxu1 %v9933_v35  ;;  %8033 = vmatpush1.bf16.msra.mxu0 %v9971_v17 }
0x12f6   :  { %8007 = vmatprep.subr.bf16.mxu1 %v8679_v9  ;;  %8035 = vmatprep.subr.bf16.mxu0 %v9974_v48 }
0x12f9   :  { %8009 = vmatpush3.bf16.msra.mxu1 %v9937_v18  ;;  %8037 = vmatpush1.bf16.msra.mxu0 %v9977_v40 }
0x12fa   :  { %8010 = vmatprep.subr.bf16.mxu1 %v8679_v9  ;;  %8039 = vmatprep.subr.bf16.mxu0 %v10005_v36 }
0x12fd   :  { %8012 = vmatpush3.bf16.msra.mxu1 %v9941_v50  ;;  %8041 = vmatpush1.bf16.msra.mxu0 %v10007_v26 }
0x12fe   :  { %8013 = vmatprep.subr.bf16.mxu1 %v8679_v9 }
0x1301   :  { %8015 = vmatpush3.bf16.msra.mxu1 %v9945_v39 }
0x1302   :  { %8016 = vmatprep.subr.bf16.mxu1 %v8679_v9 }
0x1305   :  { %8018 = vmatpush3.bf16.msra.mxu1 %v9948_v15 }
0x1306   :  { %8019 = vmatprep.subr.bf16.mxu1 %v8679_v9 }
0x1309   :  { %8021 = vmatpush3.bf16.msra.mxu1 %v9952_v12 }
0x130a   :  { %8054 = vmatprep.subr.bf16.mxu1 %v8679_v9 }
0x13be   :  { %v3531_v21 = vpop.f32.mrb[46].mxu1  ;;  %v3602_v33 = vpop.f32.mrb[32].mxu0 }
0x13bf   :  { %v3532_v47 = vadd.f32 %v3531_v21, %v9826_v4  ;;  %v3603_v43 = vadd.f32 %v3602_v33, %v9830_v16  ;;  %v3533_v24 = vpop.f32.mrb[47].mxu1  ;;  %v6687_v56 = vpop.f32.mrb[33].mxu0  ;;  %v3738_v21 = vld [vmem:[#allocation8 + $0xe8] sm:$0xff] }
0x13c0   :  { %v3534_v61 = vadd.f32 %v3533_v24, %v9834_v7  ;;  %v10010_v33 = vpack.c.bf16 %v3738_v21, %v3735_v20  ;;  %v3739_v56 = vld [vmem:[#allocation8 + $0xf0] sm:$0xff]  ;;  %v3756_v20 = vld [vmem:[#allocation8 + $0x178] sm:$0xff] }
0x13c1   :  { %8542 = vtanh.f32 %v3532_v47  ;;  %v5249_v62 = vmul.f32 -1.442695, %v3603_v43  ;;  %v3740_v47 = vld [vmem:[#allocation8 + $0xf8] sm:$0xff]  ;;  %v3743_v43 = vld [vmem:[#allocation8 + $0x110] sm:$0xff]  ;;  %v10040_v21 = vpack.c.bf16 %v3756_v20, %v3753_v22 }
0x13c2   :  { %8544 = vtanh.f32 %v3534_v61  ;;  %v10014_v24 = vpack.c.bf16 %v3743_v43, %v3740_v47  ;;  %v3742_v61 = vld [vmem:[#allocation8 + $0x108] sm:$0xff]  ;;  %v2694_v47 = vadd.f32 %v9774_v32, %v9768_v59 }
0x13c3   :  { %8546 = vpow2.f32 %v5249_v62  ;;  %v3741_v62 = vld [vmem:[#allocation8 + $0x100] sm:$0xff] }
0x13c4   :  { %8043 = vmatprep.subr.bf16.mxu0 %v10014_v24 }
0x13cb   :  { %v8543_v51 = vpop.eup %8542 }
0x13cc   :  { %v8545_v19 = vpop.eup %8544 }
0x13cd   :  { %v8547_v29 = vpop.eup %8546  ;;  %v3614_v63 = vsub.f32 %v8545_v19, %v8543_v51  ;;  %v3744_v19 = vld [vmem:[#allocation8 + $0x118] sm:$0xff] }
0x13ce   :  { %v3611_v1 = vadd.f32 1.0, %v8547_v29  ;;  %v10020_v29 = vpack.c.bf16 %v3744_v19, %v3741_v62 }
0x13d0   :  { %8548 = vrcp.f32 %v3611_v1  ;;  %v3749_v1 = vld [vmem:[#allocation8 + $0x140] sm:$0xff] }
0x13da   :  { %v8549_v49 = vpop.eup %8548 }
0x13db   :  { %v3615_v58 = vmul.f32 %v8549_v49, %v3614_v63  ;;  %v3746_v63 = vld [vmem:[#allocation8 + $0x128] sm:$0xff]  ;;  %v3748_v49 = vld [vmem:[#allocation8 + $0x138] sm:$0xff] }
0x13dc   :  { %v10024_v54 = vpack.c.bf16 %v3749_v1, %v3746_v63  ;;  %v10027_v8 = vpack.c.bf16 %v3748_v49, %v3745_v38 }
0x13dd   :  { %v9986_v41 = vadd.f32 %v8543_v51, %v3615_v58  ;;  %v10017_v51 = vpack.c.bf16 %v3742_v61, %v3739_v56  ;;  %v3747_v58 = vld [vmem:[#allocation8 + $0x130] sm:$0xff] }
0x13de   :  { %v10030_v27 = vpack.c.bf16 %v3750_v31, %v3747_v58 }
0x13df   :  { %6721 = vmatmul.mubr.f32.vlgmr.msra.gmra.mrb[48].mxu1 %v9986_v41  ;;  %8045 = vmatpush1.bf16.msra.mxu0 %v10017_v51 }
0x13e0   :  { %8056 = vmatpush3.bf16.msra.mxu1 %v9984_v42  ;;  %6755 = vmatprep.mubr.msk.f32.mxu1 %vm8680_vm1, %v8678_v0 }
0x13e1   :  { %8057 = vmatprep.subr.bf16.mxu1 %v8679_v9  ;;  %8047 = vmatprep.subr.bf16.mxu0 %v10024_v54 }
0x13e3   :  { %8049 = vmatpush1.bf16.msra.mxu0 %v10027_v8 }
0x13e4   :  { %8059 = vmatpush3.bf16.msra.mxu1 %v9990_v13  ;;  %8051 = vmatprep.subr.bf16.mxu0 %v10034_v45 }
0x13e5   :  { %8060 = vmatprep.subr.bf16.mxu1 %v8679_v9 }
0x13e7   :  { %8053 = vmatpush1.bf16.msra.mxu0 %v10037_v23 }
0x13e8   :  { %8062 = vmatpush3.bf16.msra.mxu1 %v9996_v55  ;;  %8078 = vmatprep.subr.bf16.mxu0 %v8679_v9 }
0x13e9   :  { %8063 = vmatprep.subr.bf16.mxu1 %v8679_v9 }
0x13ec   :  { %8065 = vmatpush3.bf16.msra.mxu1 %v10000_v53 }
0x13ed   :  { %8066 = vmatprep.subr.bf16.mxu1 %v8679_v9 }
0x13f0   :  { %8068 = vmatpush3.bf16.msra.mxu1 %v10010_v33 }
0x13f1   :  { %8069 = vmatprep.subr.bf16.mxu1 %v8679_v9 }
0x13f4   :  { %8071 = vmatpush3.bf16.msra.mxu1 %v10020_v29 }
0x13f5   :  { %8072 = vmatprep.subr.bf16.mxu1 %v8679_v9 }
0x13f8   :  { %8074 = vmatpush3.bf16.msra.mxu1 %v10030_v27 }
0x13f9   :  { %8075 = vmatprep.subr.bf16.mxu1 %v8679_v9 }
0x13fc   :  { %8077 = vmatpush3.bf16.msra.mxu1 %v10040_v21 }
0x13fd   :  { %8103 = vmatprep.subr.bf16.mxu1 %v9957_v46 }
0x14b2   :  { %v3701_v43 = vpop.f32.mrb[48].mxu1 }
0x14b3   :  { %v3705_v56 = vadd.f32 %v3701_v43, %v2694_v47  ;;  %v6722_v61 = vpop.f32.mrb[49].mxu1 }
0x14b5   :  { %v3706_v62 = vmul.f32 0.666, %v3705_v56 }
0x14b7   :  { %8550 = vtanh.f32 %v3706_v62  ;;  %v2699_v62 = vadd.f32 %v9768_v59, %v9780_v30 }
0x14c1   :  { %v8551_v19 = vpop.eup %8550 }
0x14c2   :  { %v3708_v63 = vmul.f32 1.7159, %v8551_v19 }
0x14c4   :  { %3822 = vmatmul.mubr.f32.vlgmr.msra.gmra.mrb[34].mxu0 %v3708_v63  ;;  %6756 = vmatmul.mubr.f32.vlgmr.msra.gmra.mrb[50].mxu1 %v3708_v63 }
0x14c5   :  { %8080 = vmatpush3.bf16.msra.mxu0 %v9925_v60  ;;  %6790 = vmatprep.mubr.msk.f32.mxu0 %vm8680_vm1, %v8678_v0 }
0x14c6   :  { %8081 = vmatprep.subr.bf16.mxu0 %v8679_v9  ;;  %8105 = vmatpush1.bf16.msra.mxu1 %v9959_v34 }
0x14c7   :  { %8107 = vmatprep.subr.bf16.mxu1 %v9962_v57  ;;  %4113 = vmatprep.mubr.f32.mxu1 %v8678_v0 }
0x14c9   :  { %8083 = vmatpush3.bf16.msra.mxu0 %v9929_v37 }
0x14ca   :  { %8084 = vmatprep.subr.bf16.mxu0 %v8679_v9  ;;  %8109 = vmatpush1.bf16.msra.mxu1 %v9965_v11 }
0x14cb   :  { %8111 = vmatprep.subr.bf16.mxu1 %v9968_v5 }
0x14cd   :  { %8086 = vmatpush3.bf16.msra.mxu0 %v9933_v35 }
0x14ce   :  { %8087 = vmatprep.subr.bf16.mxu0 %v8679_v9  ;;  %8113 = vmatpush1.bf16.msra.mxu1 %v9971_v17 }
0x14cf   :  { %8115 = vmatprep.subr.bf16.mxu1 %v9974_v48 }
0x14d1   :  { %8089 = vmatpush3.bf16.msra.mxu0 %v9937_v18 }
0x14d2   :  { %8090 = vmatprep.subr.bf16.mxu0 %v8679_v9  ;;  %8117 = vmatpush1.bf16.msra.mxu1 %v9977_v40 }
0x14d3   :  { %8119 = vmatprep.subr.bf16.mxu1 %v10005_v36 }
0x14d5   :  { %8092 = vmatpush3.bf16.msra.mxu0 %v9941_v50 }
0x14d6   :  { %8093 = vmatprep.subr.bf16.mxu0 %v8679_v9  ;;  %8121 = vmatpush1.bf16.msra.mxu1 %v10007_v26 }
0x14d7   :  { %8123 = vmatprep.subr.bf16.mxu1 %v10014_v24 }
0x14d9   :  { %8095 = vmatpush3.bf16.msra.mxu0 %v9945_v39 }
0x14da   :  { %8096 = vmatprep.subr.bf16.mxu0 %v8679_v9  ;;  %8125 = vmatpush1.bf16.msra.mxu1 %v10017_v51 }
0x14db   :  { %8127 = vmatprep.subr.bf16.mxu1 %v10024_v54 }
0x14dd   :  { %8098 = vmatpush3.bf16.msra.mxu0 %v9948_v15 }
0x14de   :  { %8099 = vmatprep.subr.bf16.mxu0 %v8679_v9  ;;  %8129 = vmatpush1.bf16.msra.mxu1 %v10027_v8 }
0x14df   :  { %8131 = vmatprep.subr.bf16.mxu1 %v10034_v45 }
0x14e1   :  { %8101 = vmatpush3.bf16.msra.mxu0 %v9952_v12 }
0x14e2   :  { %8134 = vmatprep.subr.bf16.mxu0 %v8679_v9  ;;  %8133 = vmatpush1.bf16.msra.mxu1 %v10037_v23 }
0x14e3   :  { %8158 = vmatprep.subr.bf16.mxu1 %v8679_v9 }
0x1597   :  { %v3823_v32 = vpop.f32.mrb[34].mxu0  ;;  %v3894_v1 = vpop.f32.mrb[50].mxu1 }
0x1598   :  { %v3824_v38 = vadd.f32 %v3823_v32, %v9826_v4  ;;  %v3895_v49 = vadd.f32 %v3894_v1, %v9830_v16  ;;  %v3825_v58 = vpop.f32.mrb[35].mxu0  ;;  %v6757_v31 = vpop.f32.mrb[51].mxu1 }
0x1599   :  { %v3826_v25 = vadd.f32 %v3825_v58, %v9834_v7  ;;  %v4503_v31 = vld [vmem:[#allocation6 + $0xc0] sm:$0xff] }
0x159a   :  { %8552 = vtanh.f32 %v3824_v38  ;;  %v5250_v10 = vmul.f32 -1.442695, %v3895_v49 }
0x159b   :  { %8554 = vtanh.f32 %v3826_v25  ;;  %v4504_v25 = vld [vmem:[#allocation6 + $0xc8] sm:$0xff] }
0x159c   :  { %8556 = vpow2.f32 %v5250_v10  ;;  %v10193_v10 = vpack.c.bf16 %v4504_v25, %v4503_v31 }
0x15a4   :  { %v8553_v52 = vpop.eup %8552 }
0x15a5   :  { %v8555_v2 = vpop.eup %8554 }
0x15a6   :  { %v8557_v22 = vpop.eup %8556  ;;  %v3906_v20 = vsub.f32 %v8555_v2, %v8553_v52  ;;  %v4506_v2 = vld [vmem:[#allocation6 + $0xd8] sm:$0xff] }
0x15a7   :  { %v3903_v47 = vadd.f32 1.0, %v8557_v22 }
0x15a9   :  { %8558 = vrcp.f32 %v3903_v47  ;;  %v4508_v47 = vld [vmem:[#allocation6 + $0xe8] sm:$0xff] }
0x15b3   :  { %v8559_v43 = vpop.eup %8558 }
0x15b4   :  { %v3907_v56 = vmul.f32 %v8559_v43, %v3906_v20  ;;  %v4507_v20 = vld [vmem:[#allocation6 + $0xe0] sm:$0xff] }
0x15b5   :  { %v10200_v43 = vpack.c.bf16 %v4508_v47, %v4507_v20 }
0x15b6   :  { %v10086_v61 = vadd.f32 %v8553_v52, %v3907_v56  ;;  %v4505_v52 = vld [vmem:[#allocation6 + $0xd0] sm:$0xff] }
0x15b7   :  { %v10197_v22 = vpack.c.bf16 %v4506_v2, %v4505_v52  ;;  %v4509_v56 = vld [vmem:[#allocation6 + $0xf0] sm:$0xff]  ;;  %v4590_v2 = vld [vmem:[#allocation8 + $0x28] sm:$0xff] }
0x15b8   :  { %6791 = vmatmul.mubr.f32.vlgmr.msra.gmra.mrb[36].mxu0 %v10086_v61  ;;  %v4587_v52 = vld [vmem:[#allocation8 + $0x10] sm:$0xff] }
0x15b9   :  { %8136 = vmatpush3.bf16.msra.mxu0 %v9984_v42  ;;  %6825 = vmatprep.mubr.msk.f32.mxu0 %vm8680_vm1, %v8678_v0 }
0x15ba   :  { %8137 = vmatprep.subr.bf16.mxu0 %v8679_v9 }
0x15bd   :  { %8139 = vmatpush3.bf16.msra.mxu0 %v9990_v13 }
0x15be   :  { %8140 = vmatprep.subr.bf16.mxu0 %v8679_v9 }
0x15c1   :  { %8142 = vmatpush3.bf16.msra.mxu0 %v9996_v55 }
0x15c2   :  { %8143 = vmatprep.subr.bf16.mxu0 %v8679_v9 }
0x15c5   :  { %8145 = vmatpush3.bf16.msra.mxu0 %v10000_v53 }
0x15c6   :  { %8146 = vmatprep.subr.bf16.mxu0 %v8679_v9 }
0x15c9   :  { %8148 = vmatpush3.bf16.msra.mxu0 %v10010_v33 }
0x15ca   :  { %8149 = vmatprep.subr.bf16.mxu0 %v8679_v9 }
0x15cd   :  { %8151 = vmatpush3.bf16.msra.mxu0 %v10020_v29 }
0x15ce   :  { %8152 = vmatprep.subr.bf16.mxu0 %v8679_v9 }
0x15d1   :  { %8154 = vmatpush3.bf16.msra.mxu0 %v10030_v27 }
0x15d2   :  { %8155 = vmatprep.subr.bf16.mxu0 %v8679_v9 }
0x15d5   :  { %8157 = vmatpush3.bf16.msra.mxu0 %v10040_v21 }
0x15d6   :  { %8183 = vmatprep.subr.bf16.mxu0 %v9957_v46 }
0x168b   :  { %v3993_v19 = vpop.f32.mrb[36].mxu0 }
0x168c   :  { %v3997_v63 = vadd.f32 %v3993_v19, %v2699_v62  ;;  %v6792_v32 = vpop.f32.mrb[37].mxu0  ;;  %v4510_v62 = vld [vmem:[#allocation6 + $0xf8] sm:$0xff] }
0x168d   :  { %v10204_v19 = vpack.c.bf16 %v4510_v62, %v4509_v56  ;;  %v4589_v32 = vld [vmem:[#allocation8 + $0x20] sm:$0xff]  ;;  %v10236_v56 = vpack.c.bf16 %v4590_v2, %v4587_v52 }
0x168e   :  { %v3998_v1 = vmul.f32 0.666, %v3997_v63  ;;  %v4586_v63 = vld [vmem:[#allocation8 + $0x8] sm:$0xff]  ;;  %v4621_v2 = vld [vmem:[#allocation8 + $0x120] sm:$0xff] }
0x1690   :  { %8560 = vtanh.f32 %v3998_v1  ;;  %v4585_v1 = vld [vmem:[#allocation8] sm:$0xff] }
0x169a   :  { %v8561_v38 = vpop.eup %8560 }
0x169b   :  { %v4000_v49 = vmul.f32 1.7159, %v8561_v38  ;;  %v10209_v38 = vpack.c.bf16 %v4589_v32, %v4586_v63  ;;  %v4593_v63 = vld [vmem:[#allocation8 + $0x40] sm:$0xff]  ;;  %v4596_v32 = vld [vmem:[#allocation8 + $0x58] sm:$0xff] }
0x169d   :  { %4114 = vmatmul.mubr.f32.vlgmr.msra.gmra.mrb[52].mxu1 %v4000_v49  ;;  %6826 = vmatmul.mubr.f32.vlgmr.msra.gmra.mrb[38].mxu0 %v4000_v49  ;;  %v4588_v49 = vld [vmem:[#allocation8 + $0x18] sm:$0xff] }
0x169e   :  { %8160 = vmatpush3.bf16.msra.mxu1 %v9925_v60  ;;  %6860 = vmatprep.mubr.msk.f32.mxu1 %vm8680_vm1, %v8678_v0 }
0x169f   :  { %8161 = vmatprep.subr.bf16.mxu1 %v8679_v9  ;;  %8185 = vmatpush1.bf16.msra.mxu0 %v9959_v34 }
0x16a0   :  { %8187 = vmatprep.subr.bf16.mxu0 %v9962_v57  ;;  %4405 = vmatprep.mubr.f32.mxu0 %v8678_v0 }
0x16a2   :  { %8163 = vmatpush3.bf16.msra.mxu1 %v9929_v37 }
0x16a3   :  { %8164 = vmatprep.subr.bf16.mxu1 %v8679_v9  ;;  %8189 = vmatpush1.bf16.msra.mxu0 %v9965_v11 }
0x16a4   :  { %8191 = vmatprep.subr.bf16.mxu0 %v9968_v5 }
0x16a6   :  { %8166 = vmatpush3.bf16.msra.mxu1 %v9933_v35 }
0x16a7   :  { %8167 = vmatprep.subr.bf16.mxu1 %v8679_v9  ;;  %8193 = vmatpush1.bf16.msra.mxu0 %v9971_v17 }
0x16a8   :  { %8195 = vmatprep.subr.bf16.mxu0 %v9974_v48  ;;  %v10170_v48 = vld [vmem:[%s10442_s6] ss:$0 sm:$0xff] }
0x16aa   :  { %8169 = vmatpush3.bf16.msra.mxu1 %v9937_v18 }
0x16ab   :  { %8170 = vmatprep.subr.bf16.mxu1 %v8679_v9  ;;  %8197 = vmatpush1.bf16.msra.mxu0 %v9977_v40  ;;  %v2704_v40 = vadd.f32 %v10170_v48, %v9778_v6  ;;  %v4497_v6 = vld [vmem:[#allocation6 + $0x90] sm:$0xff] }
0x16ac   :  { %8199 = vmatprep.subr.bf16.mxu0 %v10005_v36 }
0x16ae   :  { %8172 = vmatpush3.bf16.msra.mxu1 %v9941_v50 }
0x16af   :  { %8173 = vmatprep.subr.bf16.mxu1 %v8679_v9  ;;  %8201 = vmatpush1.bf16.msra.mxu0 %v10007_v26 }
0x16b0   :  { %8203 = vmatprep.subr.bf16.mxu0 %v10014_v24  ;;  %v4496_v24 = vld [vmem:[#allocation6 + $0x88] sm:$0xff] }
0x16b2   :  { %8175 = vmatpush3.bf16.msra.mxu1 %v9945_v39 }
0x16b3   :  { %8176 = vmatprep.subr.bf16.mxu1 %v8679_v9  ;;  %8205 = vmatpush1.bf16.msra.mxu0 %v10017_v51 }
0x16b4   :  { %8207 = vmatprep.subr.bf16.mxu0 %v10024_v54 }
0x16b6   :  { %8178 = vmatpush3.bf16.msra.mxu1 %v9948_v15 }
0x16b7   :  { %8179 = vmatprep.subr.bf16.mxu1 %v8679_v9  ;;  %8209 = vmatpush1.bf16.msra.mxu0 %v10027_v8  ;;  %v4499_v8 = vld [vmem:[#allocation6 + $0xa0] sm:$0xff] }
0x16b8   :  { %8211 = vmatprep.subr.bf16.mxu0 %v10034_v45 }
0x16ba   :  { %8181 = vmatpush3.bf16.msra.mxu1 %v9952_v12 }
0x16bb   :  { %8214 = vmatprep.subr.bf16.mxu1 %v8679_v9  ;;  %8213 = vmatpush1.bf16.msra.mxu0 %v10037_v23  ;;  %v4501_v23 = vld [vmem:[#allocation6 + $0xb0] sm:$0xff] }
0x16bc   :  { %8238 = vmatprep.subr.bf16.mxu0 %v8679_v9 }
0x1770   :  { %v4115_v59 = vpop.f32.mrb[52].mxu1  ;;  %v4186_v30 = vpop.f32.mrb[38].mxu0 }
0x1771   :  { %v4116_v60 = vadd.f32 %v4115_v59, %v9826_v4  ;;  %v4187_v37 = vadd.f32 %v4186_v30, %v9830_v16  ;;  %v4117_v35 = vpop.f32.mrb[53].mxu1  ;;  %v6827_v18 = vpop.f32.mrb[39].mxu0  ;;  %v10211_v59 = vpack.c.bf16 %v4588_v49, %v4585_v1  ;;  %v4592_v30 = vld [vmem:[#allocation8 + $0x38] sm:$0xff]  ;;  %v10242_v1 = vpack.c.bf16 %v4596_v32, %v4593_v63  ;;  %v4599_v49 = vld [vmem:[#allocation8 + $0x70] sm:$0xff]  ;;  %v4626_v32 = vld [vmem:[#allocation8 + $0x148] sm:$0xff] }
0x1772   :  { %v4118_v50 = vadd.f32 %v4117_v35, %v9834_v7  ;;  %v4594_v18 = vld [vmem:[#allocation8 + $0x48] sm:$0xff] }
0x1773   :  { %8562 = vtanh.f32 %v4116_v60  ;;  %v5251_v39 = vmul.f32 -1.442695, %v4187_v37  ;;  %v4595_v60 = vld [vmem:[#allocation8 + $0x50] sm:$0xff] }
0x1774   :  { %8564 = vtanh.f32 %v4118_v50  ;;  %v4591_v37 = vld [vmem:[#allocation8 + $0x30] sm:$0xff]  ;;  %v10214_v35 = vpack.c.bf16 %v4595_v60, %v4592_v30  ;;  %v4602_v30 = vld [vmem:[#allocation8 + $0x88] sm:$0xff] }
0x1775   :  { %8566 = vpow2.f32 %v5251_v39  ;;  %v10217_v50 = vpack.c.bf16 %v4594_v18, %v4591_v37  ;;  %v4598_v39 = vld [vmem:[#allocation8 + $0x68] sm:$0xff]  ;;  %v10248_v60 = vpack.c.bf16 %v4602_v30, %v4599_v49  ;;  %v4605_v37 = vld [vmem:[#allocation8 + $0xa0] sm:$0xff]  ;;  %v4608_v18 = vld [vmem:[#allocation8 + $0xb8] sm:$0xff] }
0x1776   :  { %v4628_v30 = vld [vmem:[#allocation8 + $0x158] sm:$0xff] }
0x177d   :  { %v8563_v15 = vpop.eup %8562 }
0x177e   :  { %v8565_v12 = vpop.eup %8564 }
0x177f   :  { %v8567_v46 = vpop.eup %8566  ;;  %v4198_v34 = vsub.f32 %v8565_v12, %v8563_v15 }
0x1780   :  { %v4195_v57 = vadd.f32 1.0, %v8567_v46  ;;  %v4597_v46 = vld [vmem:[#allocation8 + $0x60] sm:$0xff] }
0x1782   :  { %8568 = vrcp.f32 %v4195_v57 }
0x178c   :  { %v8569_v11 = vpop.eup %8568 }
0x178d   :  { %v4199_v5 = vmul.f32 %v8569_v11, %v4198_v34  ;;  %v4600_v34 = vld [vmem:[#allocation8 + $0x78] sm:$0xff] }
0x178e   :  { %v10223_v57 = vpack.c.bf16 %v4600_v34, %v4597_v46  ;;  %v4604_v11 = vld [vmem:[#allocation8 + $0x98] sm:$0xff]  ;;  %v4613_v46 = vld [vmem:[#allocation8 + $0xe0] sm:$0xff] }
0x178f   :  { %v10147_v17 = vadd.f32 %v8563_v15, %v4199_v5  ;;  %v4601_v15 = vld [vmem:[#allocation8 + $0x80] sm:$0xff]  ;;  %v4607_v5 = vld [vmem:[#allocation8 + $0xb0] sm:$0xff] }
0x1790   :  { %v10220_v12 = vpack.c.bf16 %v4601_v15, %v4598_v39  ;;  %v10252_v39 = vpack.c.bf16 %v4608_v18, %v4605_v37  ;;  %v4610_v15 = vld [vmem:[#allocation8 + $0xc8] sm:$0xff]  ;;  %v4631_v37 = vld [vmem:[#allocation8 + $0x170] sm:$0xff] }
0x1791   :  { %6861 = vmatmul.mubr.f32.vlgmr.msra.gmra.mrb[54].mxu1 %v10147_v17  ;;  %v10257_v34 = vpack.c.bf16 %v4613_v46, %v4610_v15  ;;  %v8290_v18 = vpack.c.bf16 %v4631_v37, %v4628_v30  ;;  %v4627_v15 = vld [vmem:[#allocation8 + $0x150] sm:$0xff]  ;;  %v4630_v46 = vld [vmem:[#allocation8 + $0x168] sm:$0xff] }
0x1792   :  { %8216 = vmatpush3.bf16.msra.mxu1 %v9984_v42  ;;  %6895 = vmatprep.mubr.msk.f32.mxu1 %vm8680_vm1, %v8678_v0  ;;  %v5098_v37 = vld [vmem:[%s10443_s7 + $0x60] sm:$0xff] }
0x1793   :  { %8217 = vmatprep.subr.bf16.mxu1 %v8679_v9 }
0x1796   :  { %8219 = vmatpush3.bf16.msra.mxu1 %v9990_v13 }
0x1797   :  { %8220 = vmatprep.subr.bf16.mxu1 %v8679_v9 }
0x179a   :  { %8222 = vmatpush3.bf16.msra.mxu1 %v9996_v55 }
0x179b   :  { %8223 = vmatprep.subr.bf16.mxu1 %v8679_v9 }
0x179e   :  { %8225 = vmatpush3.bf16.msra.mxu1 %v10000_v53 }
0x179f   :  { %8226 = vmatprep.subr.bf16.mxu1 %v8679_v9 }
0x17a2   :  { %8228 = vmatpush3.bf16.msra.mxu1 %v10010_v33  ;;  %v4495_v33 = vld [vmem:[#allocation6 + $0x80] sm:$0xff] }
0x17a3   :  { %8229 = vmatprep.subr.bf16.mxu1 %v8679_v9  ;;  %v10177_v51 = vpack.c.bf16 %v4496_v24, %v4495_v33 }
0x17a6   :  { %8231 = vmatpush3.bf16.msra.mxu1 %v10020_v29  ;;  %v4498_v29 = vld [vmem:[#allocation6 + $0x98] sm:$0xff] }
0x17a7   :  { %8232 = vmatprep.subr.bf16.mxu1 %v8679_v9  ;;  %v10181_v54 = vpack.c.bf16 %v4498_v29, %v4497_v6 }
0x17aa   :  { %8234 = vmatpush3.bf16.msra.mxu1 %v10030_v27  ;;  %v4500_v27 = vld [vmem:[#allocation6 + $0xa8] sm:$0xff] }
0x17ab   :  { %8235 = vmatprep.subr.bf16.mxu1 %v8679_v9  ;;  %v10185_v45 = vpack.c.bf16 %v4500_v27, %v4499_v8 }
0x17ae   :  { %8237 = vmatpush3.bf16.msra.mxu1 %v10040_v21  ;;  %v4502_v21 = vld [vmem:[#allocation6 + $0xb8] sm:$0xff] }
0x17af   :  { %v10189_v58 = vpack.c.bf16 %v4502_v21, %v4501_v23  ;;  %8263 = vmatprep.subr.bf16.mxu1 %v10209_v38 }
0x1864   :  { %v4285_v42 = vpop.f32.mrb[54].mxu1 }
0x1865   :  { %v4289_v13 = vadd.f32 %v4285_v42, %v2704_v40  ;;  %v6862_v55 = vpop.f32.mrb[55].mxu1  ;;  %v10226_v40 = vpack.c.bf16 %v4607_v5, %v4604_v11  ;;  %v4603_v42 = vld [vmem:[#allocation8 + $0x90] sm:$0xff]  ;;  %v4609_v11 = vld [vmem:[#allocation8 + $0xc0] sm:$0xff]  ;;  %v4612_v5 = vld [vmem:[#allocation8 + $0xd8] sm:$0xff] }
0x1867   :  { %v4290_v53 = vmul.f32 0.666, %v4289_v13  ;;  %v4606_v13 = vld [vmem:[#allocation8 + $0xa8] sm:$0xff] }
0x1868   :  { %v10229_v55 = vpack.c.bf16 %v4606_v13, %v4603_v42  ;;  %v4611_v42 = vld [vmem:[#allocation8 + $0xd0] sm:$0xff]  ;;  %v10259_v13 = vpack.c.bf16 %v4612_v5, %v4609_v11  ;;  %v4629_v11 = vld [vmem:[#allocation8 + $0x160] sm:$0xff]  ;;  %v8292_v5 = vpack.c.bf16 %v4630_v46, %v4627_v15 }
0x1869   :  { %8570 = vtanh.f32 %v4290_v53  ;;  %v5100_v46 = vld [vmem:[%s10443_s7 + $0x70] sm:$0xff] }
0x1873   :  { %v8571_v36 = vpop.eup %8570 }
0x1874   :  { %v4292_v26 = vmul.f32 1.7159, %v8571_v36 }
0x1876   :  { %4406 = vmatmul.mubr.f32.vlgmr.msra.gmra.mrb[40].mxu0 %v4292_v26  ;;  %6896 = vmatmul.mubr.f32.vlgmr.msra.gmra.mrb[56].mxu1 %v4292_v26 }
0x1877   :  { %6930 = vmatprep.mubr.msk.f32.mxu0 %vm8680_vm1, %v8678_v0  ;;  %4697 = vmatprep.mubr.f32.mxu1 %v8678_v0 }
0x1878   :  { %8240 = vmatpush3.bf16.msra.mxu0 %v10177_v51  ;;  %8265 = vmatpush1.bf16.msra.mxu1 %v10211_v59 }
0x1879   :  { %8241 = vmatprep.subr.bf16.mxu0 %v8679_v9  ;;  %8267 = vmatprep.subr.bf16.mxu1 %v10214_v35 }
0x187c   :  { %8243 = vmatpush3.bf16.msra.mxu0 %v10181_v54  ;;  %8269 = vmatpush1.bf16.msra.mxu1 %v10217_v50 }
0x187d   :  { %8244 = vmatprep.subr.bf16.mxu0 %v8679_v9  ;;  %8271 = vmatprep.subr.bf16.mxu1 %v10220_v12 }
0x1880   :  { %8246 = vmatpush3.bf16.msra.mxu0 %v10185_v45  ;;  %8273 = vmatpush1.bf16.msra.mxu1 %v10223_v57 }
0x1881   :  { %8247 = vmatprep.subr.bf16.mxu0 %v8679_v9  ;;  %8275 = vmatprep.subr.bf16.mxu1 %v10226_v40 }
0x1884   :  { %8249 = vmatpush3.bf16.msra.mxu0 %v10189_v58  ;;  %8277 = vmatpush1.bf16.msra.mxu1 %v10229_v55 }
0x1885   :  { %8250 = vmatprep.subr.bf16.mxu0 %v8679_v9  ;;  %8279 = vmatprep.subr.bf16.mxu1 %v10257_v34 }
0x1888   :  { %8252 = vmatpush3.bf16.msra.mxu0 %v10193_v10  ;;  %8281 = vmatpush1.bf16.msra.mxu1 %v10259_v13 }
0x1889   :  { %8253 = vmatprep.subr.bf16.mxu0 %v8679_v9 }
0x188c   :  { %8255 = vmatpush3.bf16.msra.mxu0 %v10197_v22 }
0x188d   :  { %8256 = vmatprep.subr.bf16.mxu0 %v8679_v9 }
0x1890   :  { %8258 = vmatpush3.bf16.msra.mxu0 %v10200_v43 }
0x1891   :  { %8259 = vmatprep.subr.bf16.mxu0 %v8679_v9 }
0x1894   :  { %8261 = vmatpush3.bf16.msra.mxu0 %v10204_v19 }
0x1895   :  { %8294 = vmatprep.subr.bf16.mxu0 %v8679_v9 }
0x1949   :  { %v4407_v53 = vpop.f32.mrb[40].mxu0  ;;  %v4478_v36 = vpop.f32.mrb[56].mxu1 }
0x194a   :  { %v4408_v26 = vadd.f32 %v4407_v53, %v9826_v4  ;;  %v4479_v33 = vadd.f32 %v4478_v36, %v9830_v16  ;;  %v4409_v24 = vpop.f32.mrb[41].mxu0  ;;  %v6897_v6 = vpop.f32.mrb[57].mxu1  ;;  %v4614_v53 = vld [vmem:[#allocation8 + $0xe8] sm:$0xff] }
0x194b   :  { %v4410_v29 = vadd.f32 %v4409_v24, %v9834_v7  ;;  %v10262_v36 = vpack.c.bf16 %v4614_v53, %v4611_v42  ;;  %v4615_v6 = vld [vmem:[#allocation8 + $0xf0] sm:$0xff]  ;;  %v4632_v42 = vld [vmem:[#allocation8 + $0x178] sm:$0xff] }
0x194c   :  { %8572 = vtanh.f32 %v4408_v26  ;;  %v5252_v8 = vmul.f32 -1.442695, %v4479_v33  ;;  %v4616_v26 = vld [vmem:[#allocation8 + $0xf8] sm:$0xff]  ;;  %v4619_v33 = vld [vmem:[#allocation8 + $0x110] sm:$0xff]  ;;  %v10281_v53 = vpack.c.bf16 %v4632_v42, %v4629_v11  ;;  %v5101_v11 = vld [vmem:[%s10443_s7 + $0x78] sm:$0xff] }
0x194d   :  { %8574 = vtanh.f32 %v4410_v29  ;;  %v10266_v24 = vpack.c.bf16 %v4619_v33, %v4616_v26  ;;  %v4618_v29 = vld [vmem:[#allocation8 + $0x108] sm:$0xff]  ;;  %v2709_v26 = vadd.f32 %v10170_v48, %v9819_v14 }
0x194e   :  { %8576 = vpow2.f32 %v5252_v8  ;;  %v4617_v8 = vld [vmem:[#allocation8 + $0x100] sm:$0xff] }
0x194f   :  { %8283 = vmatprep.subr.bf16.mxu1 %v10266_v24 }
0x1956   :  { %v8573_v27 = vpop.eup %8572 }
0x1957   :  { %v8575_v23 = vpop.eup %8574 }
0x1958   :  { %v8577_v21 = vpop.eup %8576  ;;  %v4490_v31 = vsub.f32 %v8575_v23, %v8573_v27  ;;  %v4620_v23 = vld [vmem:[#allocation8 + $0x118] sm:$0xff] }
0x1959   :  { %v4487_v25 = vadd.f32 1.0, %v8577_v21  ;;  %v10272_v21 = vpack.c.bf16 %v4620_v23, %v4617_v8 }
0x195b   :  { %8578 = vrcp.f32 %v4487_v25  ;;  %v4625_v25 = vld [vmem:[#allocation8 + $0x140] sm:$0xff] }
0x1965   :  { %v8579_v20 = vpop.eup %8578 }
0x1966   :  { %v4491_v47 = vmul.f32 %v8579_v20, %v4490_v31  ;;  %v4622_v31 = vld [vmem:[#allocation8 + $0x128] sm:$0xff]  ;;  %v4624_v20 = vld [vmem:[#allocation8 + $0x138] sm:$0xff] }
0x1967   :  { %v8286_v52 = vpack.c.bf16 %v4625_v25, %v4622_v31  ;;  %v8288_v63 = vpack.c.bf16 %v4624_v20, %v4621_v2  ;;  %v5093_v2 = vld [vmem:[%s10443_s7 + $0x38] sm:$0xff] }
0x1968   :  { %v10238_v62 = vadd.f32 %v8573_v27, %v4491_v47  ;;  %v10269_v27 = vpack.c.bf16 %v4618_v29, %v4615_v6  ;;  %v4623_v47 = vld [vmem:[#allocation8 + $0x130] sm:$0xff] }
0x1969   :  { %v10277_v49 = vpack.c.bf16 %v4626_v32, %v4623_v47  ;;  %v5094_v47 = vld [vmem:[%s10443_s7 + $0x40] sm:$0xff]  ;;  %v5096_v32 = vld [vmem:[%s10443_s7 + $0x50] sm:$0xff] }
0x196a   :  { %6931 = vmatmul.mubr.f32.vlgmr.msra.gmra.mrb[42].mxu0 %v10238_v62  ;;  %8285 = vmatpush1.bf16.msra.mxu1 %v10269_v27 }
0x196b   :  { %8296 = vmatpush3.bf16.msra.mxu0 %v10236_v56  ;;  %6965 = vmatprep.mubr.msk.f32.mxu0 %vm8680_vm1, %v8678_v0 }
0x196c   :  { %8297 = vmatprep.subr.bf16.mxu0 %v8679_v9  ;;  %8287 = vmatprep.subr.bf16.mxu1 %v8286_v52 }
0x196e   :  { %8289 = vmatpush1.bf16.msra.mxu1 %v8288_v63 }
0x196f   :  { %8299 = vmatpush3.bf16.msra.mxu0 %v10242_v1  ;;  %8291 = vmatprep.subr.bf16.mxu1 %v8290_v18 }
0x1970   :  { %8300 = vmatprep.subr.bf16.mxu0 %v8679_v9 }
0x1972   :  { %8293 = vmatpush1.bf16.msra.mxu1 %v8292_v5 }
0x1973   :  { %8302 = vmatpush3.bf16.msra.mxu0 %v10248_v60  ;;  %8318 = vmatprep.subr.bf16.mxu1 %v8679_v9 }
0x1974   :  { %8303 = vmatprep.subr.bf16.mxu0 %v8679_v9 }
0x1977   :  { %8305 = vmatpush3.bf16.msra.mxu0 %v10252_v39 }
0x1978   :  { %8306 = vmatprep.subr.bf16.mxu0 %v8679_v9 }
0x197b   :  { %8308 = vmatpush3.bf16.msra.mxu0 %v10262_v36 }
0x197c   :  { %8309 = vmatprep.subr.bf16.mxu0 %v8679_v9 }
0x197f   :  { %8311 = vmatpush3.bf16.msra.mxu0 %v10272_v21 }
0x1980   :  { %8312 = vmatprep.subr.bf16.mxu0 %v8679_v9 }
0x1983   :  { %8314 = vmatpush3.bf16.msra.mxu0 %v10277_v49 }
0x1984   :  { %8315 = vmatprep.subr.bf16.mxu0 %v8679_v9 }
0x1987   :  { %8317 = vmatpush3.bf16.msra.mxu0 %v10281_v53 }
0x1988   :  { %8343 = vmatprep.subr.bf16.mxu0 %v10209_v38 }
0x1a3d   :  { %v4577_v33 = vpop.f32.mrb[42].mxu0 }
0x1a3e   :  { %v4581_v6 = vadd.f32 %v4577_v33, %v2709_v26  ;;  %v6932_v29 = vpop.f32.mrb[43].mxu0 }
0x1a40   :  { %v4582_v8 = vmul.f32 0.666, %v4581_v6 }
0x1a42   :  { %8580 = vtanh.f32 %v4582_v8 }
0x1a4c   :  { %v8581_v23 = vpop.eup %8580 }
0x1a4d   :  { %v4584_v31 = vmul.f32 1.7159, %v8581_v23 }
0x1a4f   :  { %4698 = vmatmul.mubr.f32.vlgmr.msra.gmra.mrb[58].mxu1 %v4584_v31  ;;  %6966 = vmatmul.mubr.f32.vlgmr.msra.gmra.mrb[44].mxu0 %v4584_v31 }
0x1a50   :  { %8320 = vmatpush3.bf16.msra.mxu1 %v10177_v51  ;;  %7000 = vmatprep.mubr.msk.f32.mxu1 %vm8680_vm1, %v8678_v0 }
0x1a51   :  { %8321 = vmatprep.subr.bf16.mxu1 %v8679_v9  ;;  %8345 = vmatpush1.bf16.msra.mxu0 %v10211_v59 }
0x1a52   :  { %8347 = vmatprep.subr.bf16.mxu0 %v10214_v35  ;;  %4989 = vmatprep.mubr.f32.mxu0 %v8678_v0 }
0x1a54   :  { %8323 = vmatpush3.bf16.msra.mxu1 %v10181_v54 }
0x1a55   :  { %8324 = vmatprep.subr.bf16.mxu1 %v8679_v9  ;;  %8349 = vmatpush1.bf16.msra.mxu0 %v10217_v50 }
0x1a56   :  { %8351 = vmatprep.subr.bf16.mxu0 %v10220_v12 }
0x1a58   :  { %8326 = vmatpush3.bf16.msra.mxu1 %v10185_v45 }
0x1a59   :  { %8327 = vmatprep.subr.bf16.mxu1 %v8679_v9  ;;  %8353 = vmatpush1.bf16.msra.mxu0 %v10223_v57 }
0x1a5a   :  { %8355 = vmatprep.subr.bf16.mxu0 %v10226_v40 }
0x1a5c   :  { %8329 = vmatpush3.bf16.msra.mxu1 %v10189_v58 }
0x1a5d   :  { %8330 = vmatprep.subr.bf16.mxu1 %v8679_v9  ;;  %8357 = vmatpush1.bf16.msra.mxu0 %v10229_v55  ;;  %v5087_v55 = vld [vmem:[%s10443_s7 + $0x8] sm:$0xff] }
0x1a5e   :  { %8359 = vmatprep.subr.bf16.mxu0 %v10257_v34 }
0x1a60   :  { %8332 = vmatpush3.bf16.msra.mxu1 %v10193_v10 }
0x1a61   :  { %8333 = vmatprep.subr.bf16.mxu1 %v8679_v9  ;;  %8361 = vmatpush1.bf16.msra.mxu0 %v10259_v13 }
0x1a62   :  { %8363 = vmatprep.subr.bf16.mxu0 %v10266_v24 }
0x1a64   :  { %8335 = vmatpush3.bf16.msra.mxu1 %v10197_v22 }
0x1a65   :  { %8336 = vmatprep.subr.bf16.mxu1 %v8679_v9  ;;  %8365 = vmatpush1.bf16.msra.mxu0 %v10269_v27 }
0x1a66   :  { %8367 = vmatprep.subr.bf16.mxu0 %v8286_v52  ;;  %v5092_v52 = vld [vmem:[%s10443_s7 + $0x30] sm:$0xff] }
0x1a67   :  { %v8410_v20 = vpack.c.bf16 %v5093_v2, %v5092_v52 }
0x1a68   :  { %8338 = vmatpush3.bf16.msra.mxu1 %v10200_v43 }
0x1a69   :  { %8339 = vmatprep.subr.bf16.mxu1 %v8679_v9  ;;  %8369 = vmatpush1.bf16.msra.mxu0 %v8288_v63 }
0x1a6a   :  { %8371 = vmatprep.subr.bf16.mxu0 %v8290_v18  ;;  %v5099_v18 = vld [vmem:[%s10443_s7 + $0x68] sm:$0xff] }
0x1a6b   :  { %v8422_v15 = vpack.c.bf16 %v5099_v18, %v5098_v37 }
0x1a6c   :  { %8341 = vmatpush3.bf16.msra.mxu1 %v10204_v19 }
0x1a6d   :  { %8374 = vmatprep.subr.bf16.mxu1 %v8679_v9  ;;  %8373 = vmatpush1.bf16.msra.mxu0 %v8292_v5  ;;  %v8426_v5 = vpack.c.bf16 %v5101_v11, %v5100_v46 }
0x1b22   :  { %v4699_v14 = vpop.f32.mrb[58].mxu1  ;;  %v4770_v51 = vpop.f32.mrb[44].mxu0 }
0x1b23   :  { %v4700_v54 = vadd.f32 %v4699_v14, %v9826_v4  ;;  %v4771_v45 = vadd.f32 %v4770_v51, %v9830_v16  ;;  %v4701_v58 = vpop.f32.mrb[59].mxu1  ;;  %v6967_v10 = vpop.f32.mrb[45].mxu0 }
0x1b24   :  { %v4702_v22 = vadd.f32 %v4701_v58, %v9834_v7 }
0x1b25   :  { %8582 = vtanh.f32 %v4700_v54  ;;  %v5253_v43 = vmul.f32 -1.442695, %v4771_v45 }
0x1b26   :  { %8584 = vtanh.f32 %v4702_v22 }
0x1b27   :  { %8586 = vpow2.f32 %v5253_v43 }
0x1b2f   :  { %v8583_v38 = vpop.eup %8582 }
0x1b30   :  { %v8585_v59 = vpop.eup %8584 }
0x1b31   :  { %v8587_v19 = vpop.eup %8586  ;;  %v4782_v35 = vsub.f32 %v8585_v59, %v8583_v38 }
0x1b32   :  { %v4779_v50 = vadd.f32 1.0, %v8587_v19 }
0x1b34   :  { %8588 = vrcp.f32 %v4779_v50 }
0x1b3e   :  { %v8589_v12 = vpop.eup %8588 }
0x1b3f   :  { %v4783_v57 = vmul.f32 %v8589_v12, %v4782_v35 }
0x1b41   :  { %v10321_v40 = vadd.f32 %v8583_v38, %v4783_v57 }
0x1b43   :  { %7001 = vmatmul.mubr.f32.vlgmr.msra.gmra.mrb[60].mxu1 %v10321_v40 }
0x1b44   :  { %8376 = vmatpush3.bf16.msra.mxu1 %v10236_v56  ;;  %7035 = vmatprep.mubr.msk.f32.mxu1 %vm8680_vm1, %v8678_v0  ;;  %v5086_v0 = vld [vmem:[%s10443_s7] sm:$0xff] }
0x1b45   :  { %8377 = vmatprep.subr.bf16.mxu1 %v8679_v9  ;;  %v8398_v56 = vpack.c.bf16 %v5087_v55, %v5086_v0 }
0x1b47   :  { %8399 = vmatprep.subr.bf16.mxu0 %v8398_v56 }
0x1b48   :  { %8379 = vmatpush3.bf16.msra.mxu1 %v10242_v1  ;;  %v2714_v1 = vadd.f32 %v10170_v48, %v9817_v3  ;;  %v5090_v3 = vld [vmem:[%s10443_s7 + $0x20] sm:$0xff]  ;;  %v5091_v48 = vld [vmem:[%s10443_s7 + $0x28] sm:$0xff] }
0x1b49   :  { %8380 = vmatprep.subr.bf16.mxu1 %v8679_v9  ;;  %v8406_v25 = vpack.c.bf16 %v5091_v48, %v5090_v3 }
0x1b4c   :  { %8382 = vmatpush3.bf16.msra.mxu1 %v10248_v60 }
0x1b4d   :  { %8383 = vmatprep.subr.bf16.mxu1 %v8679_v9 }
0x1b50   :  { %8385 = vmatpush3.bf16.msra.mxu1 %v10252_v39 }
0x1b51   :  { %8386 = vmatprep.subr.bf16.mxu1 %v8679_v9 }
0x1b54   :  { %8388 = vmatpush3.bf16.msra.mxu1 %v10262_v36  ;;  %v5089_v36 = vld [vmem:[%s10443_s7 + $0x18] sm:$0xff] }
0x1b55   :  { %8389 = vmatprep.subr.bf16.mxu1 %v8679_v9 }
0x1b58   :  { %8391 = vmatpush3.bf16.msra.mxu1 %v10272_v21 }
0x1b59   :  { %8392 = vmatprep.subr.bf16.mxu1 %v8679_v9 }
0x1b5c   :  { %8394 = vmatpush3.bf16.msra.mxu1 %v10277_v49  ;;  %v5097_v49 = vld [vmem:[%s10443_s7 + $0x58] sm:$0xff] }
0x1b5d   :  { %8395 = vmatprep.subr.bf16.mxu1 %v8679_v9  ;;  %v5088_v9 = vld [vmem:[%s10443_s7 + $0x10] sm:$0xff]  ;;  %v8418_v30 = vpack.c.bf16 %v5097_v49, %v5096_v32 }
0x1b5e   :  { %v8402_v21 = vpack.c.bf16 %v5089_v36, %v5088_v9 }
0x1b60   :  { %8397 = vmatpush3.bf16.msra.mxu1 %v10281_v53 }
0x1c16   :  { %v4869_v60 = vpop.f32.mrb[60].mxu1 }
0x1c17   :  { %v4873_v39 = vadd.f32 %v4869_v60, %v2714_v1  ;;  %v7002_v34 = vpop.f32.mrb[61].mxu1 }
0x1c19   :  { %v4874_v13 = vmul.f32 0.666, %v4873_v39 }
0x1c1b   :  { %8590 = vtanh.f32 %v4874_v13 }
0x1c25   :  { %v8591_v24 = vpop.eup %8590 }
0x1c26   :  { %v4876_v27 = vmul.f32 1.7159, %v8591_v24 }
0x1c28   :  { %4990 = vmatmul.mubr.f32.vlgmr.msra.gmra.mrb[46].mxu0 %v4876_v27  ;;  %7036 = vmatmul.mubr.f32.vlgmr.msra.gmra.mrb[62].mxu1 %v4876_v27 }
0x1c29   :  { %8401 = vmatpush3.bf16.msra.mxu0 %v8398_v56  ;;  %7070 = vmatprep.mubr.f32.mxu0 %v9839_v28  ;;  %v5095_v28 = vld [vmem:[%s10443_s7 + $0x48] sm:$0xff] }
0x1c2a   :  { %8403 = vmatprep.subr.bf16.mxu0 %v8402_v21  ;;  %v8414_v63 = vpack.c.bf16 %v5095_v28, %v5094_v47 }
0x1c2d   :  { %8405 = vmatpush3.bf16.msra.mxu0 %v8402_v21 }
0x1c2e   :  { %8407 = vmatprep.subr.bf16.mxu0 %v8406_v25 }
0x1c31   :  { %8409 = vmatpush3.bf16.msra.mxu0 %v8406_v25 }
0x1c32   :  { %8411 = vmatprep.subr.bf16.mxu0 %v8410_v20 }
0x1c35   :  { %8413 = vmatpush3.bf16.msra.mxu0 %v8410_v20 }
0x1c36   :  { %8415 = vmatprep.subr.bf16.mxu0 %v8414_v63 }
0x1c39   :  { %8417 = vmatpush3.bf16.msra.mxu0 %v8414_v63 }
0x1c3a   :  { %8419 = vmatprep.subr.bf16.mxu0 %v8418_v30 }
0x1c3d   :  { %8421 = vmatpush3.bf16.msra.mxu0 %v8418_v30 }
0x1c3e   :  { %8423 = vmatprep.subr.bf16.mxu0 %v8422_v15 }
0x1c41   :  { %8425 = vmatpush3.bf16.msra.mxu0 %v8422_v15 }
0x1c42   :  { %8427 = vmatprep.subr.bf16.mxu0 %v8426_v5 }
0x1c45   :  { %8429 = vmatpush3.bf16.msra.mxu0 %v8426_v5 }
0x1c48   :  { %7071 = vmatmul.mubr.f32.vlgmr.msra.gmra.mrb[48].mxu0 %v9900_v44 }
0x1c49   :  { %7073 = vmatprep.mubr.f32.mxu0 %v9986_v41 }
0x1c4c   :  { %7074 = vmatmul.mubr.f32.gmra.mrb[50].mxu0 %v10086_v61 }
0x1c4d   :  { %7076 = vmatprep.mubr.f32.mxu0 %v10147_v17 }
0x1c50   :  { %7077 = vmatmul.mubr.f32.gmra.mrb[52].mxu0 %v10238_v62 }
0x1c51   :  { %7079 = vmatprep.mubr.f32.mxu0 %v10321_v40 }
0x1cfb   :  { %v4991_v42 = vpop.f32.mrb[46].mxu0  ;;  %v5062_v53 = vpop.f32.mrb[62].mxu1 }
0x1cfc   :  { %v4992_v26 = vadd.f32 %v4991_v42, %v9826_v4  ;;  %v5063_v33 = vadd.f32 %v5062_v53, %v9830_v16  ;;  %v4993_v6 = vpop.f32.mrb[47].mxu0  ;;  %v7037_v29 = vpop.f32.mrb[63].mxu1  ;;  %v5255_v4 = vld [vmem:[%s10444_s8] ss:$0 sm:$0xff] }
0x1cfd   :  { %v4994_v44 = vadd.f32 %v4993_v6, %v9834_v7 }
0x1cfe   :  { %8592 = vtanh.f32 %v4992_v26  ;;  %v5254_v41 = vmul.f32 -1.442695, %v5063_v33 }
0x1cff   :  { %8594 = vtanh.f32 %v4994_v44 }
0x1d00   :  { %8596 = vpow2.f32 %v5254_v41 }
0x1d08   :  { %v8593_v61 = vpop.eup %8592 }
0x1d09   :  { %v8595_v17 = vpop.eup %8594 }
0x1d0a   :  { %v8597_v8 = vpop.eup %8596  ;;  %v5074_v62 = vsub.f32 %v8595_v17, %v8593_v61 }
0x1d0b   :  { %v5071_v23 = vadd.f32 1.0, %v8597_v8 }
0x1d0d   :  { %8598 = vrcp.f32 %v5071_v23 }
0x1d17   :  { %v8599_v31 = vpop.eup %8598 }
0x1d18   :  { %v5075_v14 = vmul.f32 %v8599_v31, %v5074_v62 }
0x1d1a   :  { %v5076_v16 = vadd.f32 %v8593_v61, %v5075_v14 }
0x1d1b   :  { %v7072_v51 = vpop.f32.mrb[48].mxu0 }
0x1d1c   :  { %v5181_v7 = vadd.f32 %v7072_v51, %v5255_v4  ;;  %v5175_v54 = vpop.f32.mrb[49].mxu0  ;;  %7080 = vmatmul.mubr.f32.gmra.mrb[54].mxu0 %v5076_v16 }
0x1d1d   :  { %v5176_v45 = vadd.f32 %v5255_v4, %v5175_v54 }
0x1d1e   :  { %5216 = vst.msk [vmem:[%s10445_s9 + $0x8] sm:$0xff] %vm5214_vm2, %v5181_v7 }
0x1d1f   :  { %5215 = vst.msk [vmem:[%s10445_s9] sm:$0xff] %vm5214_vm2, %v5176_v45  ;;  %v7075_v58 = vpop.f32.mrb[50].mxu0 }
0x1d20   :  { %v5191_v10 = vadd.f32 %v7075_v58, %v5255_v4  ;;  %v5185_v22 = vpop.f32.mrb[51].mxu0 }
0x1d21   :  { %v5186_v43 = vadd.f32 %v5255_v4, %v5185_v22 }
0x1d22   :  { %5218 = vst.msk [vmem:[%s10445_s9 + $0x18] sm:$0xff] %vm5214_vm2, %v5191_v10 }
0x1d23   :  { %5217 = vst.msk [vmem:[%s10445_s9 + $0x10] sm:$0xff] %vm5214_vm2, %v5186_v43  ;;  %v7078_v38 = vpop.f32.mrb[52].mxu0 }
0x1d24   :  { %v5201_v59 = vadd.f32 %v7078_v38, %v5255_v4  ;;  %v5195_v19 = vpop.f32.mrb[53].mxu0 }
0x1d25   :  { %v5196_v35 = vadd.f32 %v5255_v4, %v5195_v19 }
0x1d26   :  { %5220 = vst.msk [vmem:[%s10445_s9 + $0x28] sm:$0xff] %vm5214_vm2, %v5201_v59 }
0x1d27   :  { %5219 = vst.msk [vmem:[%s10445_s9 + $0x20] sm:$0xff] %vm5214_vm2, %v5196_v35 }
0x1def   :  { %v7081_v50 = vpop.f32.mrb[54].mxu0 }
0x1df0   :  { %v5211_v12 = vadd.f32 %v7081_v50, %v5255_v4  ;;  %v5205_v57 = vpop.f32.mrb[55].mxu0 }
0x1df1   :  { %v5206_v40 = vadd.f32 %v5255_v4, %v5205_v57 }
0x1df2   :  { %5222 = vst.msk [vmem:[%s10445_s9 + $0x38] sm:$0xff] %vm5214_vm2, %v5211_v12 }
0x1df3   :  { %5221 = vst.msk [vmem:[%s10445_s9 + $0x30] sm:$0xff] %vm5214_vm2, %v5206_v40 }
0x1df4   :  { %5227 = vsyncpa [#allocation5], 1 }
0x1df5   :  { %5228 = vsyncpa [#allocation7], 1 }

</bundles_post_ra>
